<compile_context>
chip_gen: v5e
topology: v5e:2x2
jax: 0.10.0
libtpu: 0.0.40
codegen_flags: <defaults>
</compile_context>

<pallas_src>
import functools

import jax
import jax.numpy as jnp
from jax.experimental import pallas as pl
from jax.experimental.pallas import tpu as pltpu


# MXU operands are bf16; accumulation / BN statistics / softmax stay f32.
MXU_INPUT_DTYPE = jnp.bfloat16


def _round_up(x, m):
    return ((x + m - 1) // m) * m


def _pick_div_tile(padded, max_tile, align):
    """Largest multiple-of-`align` tile <= max_tile that divides `padded`."""
    if padded <= max_tile:
        return padded
    for t in range(max_tile, align - 1, -align):
        if padded % t == 0:
            return t
    return align


def _matmul_dims(M, K, N, max_tm=256):
    tm = min(max_tm, _round_up(M, 8))
    m_pad = _round_up(M, tm)
    n_pad = _round_up(N, 128)
    tn = _pick_div_tile(n_pad, 512, 128)
    k_pad = _round_up(K, 128)
    tk = _pick_div_tile(k_pad, 1024, 128)
    return tm, m_pad, tk, k_pad, tn, n_pad


def _mm_vmem_limit(tm, tk, tn, residual=False):
    """Scoped-VMEM request derived from the actual tile bytes + headroom."""
    need = (2 * (tm * tk + tk * tn) * 2      # bf16 double-buffered operands
            + 2 * tm * tn * 4                # f32 output (double-buffered)
            + tm * tn * 4                    # f32 accumulator scratch
            + 6 * tn * 4)                    # bias / gamma / beta rows
    if residual:
        need += 2 * tm * tn * 4
    return int(min(need + (8 << 20), 32 << 20))


def _pad2(x, rows, cols):
    r, c = x.shape
    if (r, c) == (rows, cols):
        return x
    return jnp.pad(x, ((0, rows - r), (0, cols - c)))


# ----------------------------------------------------------------------------
# Tiled matmul kernels (bf16 MXU operands, f32 accumulation)
# ----------------------------------------------------------------------------
def _mm_kernel(a_ref, b_ref, o_ref, acc_ref):
    @pl.when(pl.program_id(2) == 0)
    def _():
        acc_ref[...] = jnp.zeros_like(acc_ref)

    acc_ref[...] += jnp.dot(a_ref[...], b_ref[...],
                            preferred_element_type=jnp.float32)

    @pl.when(pl.program_id(2) == pl.num_programs(2) - 1)
    def _():
        o_ref[...] = acc_ref[...]


def _mm_bias_kernel(a_ref, b_ref, bias_ref, o_ref, acc_ref):
    @pl.when(pl.program_id(2) == 0)
    def _():
        acc_ref[...] = jnp.zeros_like(acc_ref)

    acc_ref[...] += jnp.dot(a_ref[...], b_ref[...],
                            preferred_element_type=jnp.float32)

    @pl.when(pl.program_id(2) == pl.num_programs(2) - 1)
    def _():
        o_ref[...] = acc_ref[...] + bias_ref[...]


def _mm_bn_kernel(a_ref, b_ref, g_ref, be_ref, o_ref, acc_ref,
                  *, inv_m, eps, relu):
    """Matmul with fused training-mode BN (+optional ReLU) epilogue.

    Valid only when the full M fits one tile: padded (zero) rows contribute 0
    to sum/sumsq and we divide by the true M (inv_m).
    """
    @pl.when(pl.program_id(2) == 0)
    def _():
        acc_ref[...] = jnp.zeros_like(acc_ref)

    acc_ref[...] += jnp.dot(a_ref[...], b_ref[...],
                            preferred_element_type=jnp.float32)

    @pl.when(pl.program_id(2) == pl.num_programs(2) - 1)
    def _():
        acc = acc_ref[...]
        s = jnp.sum(acc, axis=0, keepdims=True)
        sq = jnp.sum(acc * acc, axis=0, keepdims=True)
        mean = s * inv_m
        var = sq * inv_m - mean * mean                 # biased variance
        scale = g_ref[...] * jax.lax.rsqrt(var + eps)  # EUP rsqrt, no divide
        y = (acc - mean) * scale + be_ref[...]
        if relu:
            y = jnp.maximum(y, 0.0)
        o_ref[...] = y


def _mm_bn_add_relu_kernel(a_ref, b_ref, g_ref, be_ref, r_ref, o_ref, acc_ref,
                           *, inv_m, eps):
    """Matmul with fused BN + residual add + ReLU epilogue (basic-block tail)."""
    @pl.when(pl.program_id(2) == 0)
    def _():
        acc_ref[...] = jnp.zeros_like(acc_ref)

    acc_ref[...] += jnp.dot(a_ref[...], b_ref[...],
                            preferred_element_type=jnp.float32)

    @pl.when(pl.program_id(2) == pl.num_programs(2) - 1)
    def _():
        acc = acc_ref[...]
        s = jnp.sum(acc, axis=0, keepdims=True)
        sq = jnp.sum(acc * acc, axis=0, keepdims=True)
        mean = s * inv_m
        var = sq * inv_m - mean * mean
        scale = g_ref[...] * jax.lax.rsqrt(var + eps)
        y = (acc - mean) * scale + be_ref[...]
        o_ref[...] = jnp.maximum(y + r_ref[...], 0.0)


def pallas_matmul(a, b, bias=None):
    """C = A @ B (+ bias).  A:(M,K)  B:(K,N)  -> (M,N) f32, tiled + pipelined."""
    M, K = a.shape
    Kb, N = b.shape
    assert K == Kb
    tm, m_pad, tk, k_pad, tn, n_pad = _matmul_dims(M, K, N)

    a = _pad2(a.astype(MXU_INPUT_DTYPE), m_pad, k_pad)
    b = _pad2(b.astype(MXU_INPUT_DTYPE), k_pad, n_pad)

    grid = (m_pad // tm, n_pad // tn, k_pad // tk)
    a_spec = pl.BlockSpec((tm, tk), lambda i, j, k: (i, k))
    b_spec = pl.BlockSpec((tk, tn), lambda i, j, k: (k, j))
    o_spec = pl.BlockSpec((tm, tn), lambda i, j, k: (i, j))
    scratch = [pltpu.VMEM((tm, tn), jnp.float32)]
    params = pltpu.CompilerParams(
        dimension_semantics=("parallel", "parallel", "arbitrary"),
        vmem_limit_bytes=_mm_vmem_limit(tm, tk, tn))

    out_shape = jax.ShapeDtypeStruct((m_pad, n_pad), jnp.float32)
    if bias is None:
        out = pl.pallas_call(
            _mm_kernel, grid=grid, out_shape=out_shape,
            in_specs=[a_spec, b_spec], out_specs=o_spec,
            scratch_shapes=scratch, compiler_params=params)(a, b)
    else:
        bias2 = _pad2(bias.reshape(1, N).astype(jnp.float32), 1, n_pad)
        bias_spec = pl.BlockSpec((1, tn), lambda i, j, k: (0, j))
        out = pl.pallas_call(
            _mm_bias_kernel, grid=grid, out_shape=out_shape,
            in_specs=[a_spec, b_spec, bias_spec], out_specs=o_spec,
            scratch_shapes=scratch, compiler_params=params)(a, b, bias2)

    if (m_pad, n_pad) != (M, N):
        out = out[:M, :N]
    return out


def pallas_matmul_bn(a, b, gamma, beta, residual=None, relu=True, eps=1e-5):
    """C = BN(A @ B) (+residual) (+ReLU), BN stats fused in the epilogue.

    Falls back to matmul + two-phase Pallas BN when M needs multiple tiles.
    """
    M, K = a.shape
    Kb, N = b.shape
    assert K == Kb
    tm, m_pad, tk, k_pad, tn, n_pad = _matmul_dims(M, K, N, max_tm=1024)

    if m_pad != tm:
        # TODO(synk): multi-M-tile conv+BN fusion (cross-tile stats reduction).
        out = pallas_matmul(a, b)
        return pallas_batchnorm(out, gamma, beta, residual=residual,
                                relu=relu, eps=eps)

    a = _pad2(a.astype(MXU_INPUT_DTYPE), m_pad, k_pad)
    b = _pad2(b.astype(MXU_INPUT_DTYPE), k_pad, n_pad)
    g2 = jnp.pad(gamma.reshape(1, N).astype(jnp.float32),
                 ((0, 0), (0, n_pad - N)), constant_values=1.0)
    b2 = jnp.pad(beta.reshape(1, N).astype(jnp.float32),
                 ((0, 0), (0, n_pad - N)))

    grid = (1, n_pad // tn, k_pad // tk)
    a_spec = pl.BlockSpec((tm, tk), lambda i, j, k: (i, k))
    b_spec = pl.BlockSpec((tk, tn), lambda i, j, k: (k, j))
    vec_spec = pl.BlockSpec((1, tn), lambda i, j, k: (0, j))
    o_spec = pl.BlockSpec((tm, tn), lambda i, j, k: (i, j))
    scratch = [pltpu.VMEM((tm, tn), jnp.float32)]
    params = pltpu.CompilerParams(
        dimension_semantics=("parallel", "parallel", "arbitrary"),
        vmem_limit_bytes=_mm_vmem_limit(tm, tk, tn, residual=residual is not None))
    out_shape = jax.ShapeDtypeStruct((m_pad, n_pad), jnp.float32)

    if residual is None:
        kern = functools.partial(_mm_bn_kernel, inv_m=1.0 / M, eps=eps, relu=relu)
        out = pl.pallas_call(
            kern, grid=grid, out_shape=out_shape,
            in_specs=[a_spec, b_spec, vec_spec, vec_spec], out_specs=o_spec,
            scratch_shapes=scratch, compiler_params=params)(a, b, g2, b2)
    else:
        r = _pad2(residual.astype(jnp.float32), m_pad, n_pad)
        r_spec = pl.BlockSpec((tm, tn), lambda i, j, k: (i, j))
        kern = functools.partial(_mm_bn_add_relu_kernel, inv_m=1.0 / M, eps=eps)
        out = pl.pallas_call(
            kern, grid=grid, out_shape=out_shape,
            in_specs=[a_spec, b_spec, vec_spec, vec_spec, r_spec],
            out_specs=o_spec, scratch_shapes=scratch,
            compiler_params=params)(a, b, g2, b2, r)

    if (m_pad, n_pad) != (M, N):
        out = out[:M, :N]
    return out


# ----------------------------------------------------------------------------
# Two-phase training-mode BatchNorm fallback (only used when M > one tile)
# ----------------------------------------------------------------------------
def _bn_kernel(x_ref, g_ref, b_ref, o_ref, sum_ref, sq_ref, *, inv_m, eps, relu):
    phase = pl.program_id(0)
    step = pl.program_id(1)

    @pl.when((phase == 0) & (step == 0))
    def _():
        sum_ref[...] = jnp.zeros_like(sum_ref)
        sq_ref[...] = jnp.zeros_like(sq_ref)

    @pl.when(phase == 0)
    def _():
        x = x_ref[...]
        sum_ref[...] += jnp.sum(x, axis=0, keepdims=True)
        sq_ref[...] += jnp.sum(x * x, axis=0, keepdims=True)

    @pl.when(phase == 1)
    def _():
        x = x_ref[...]
        mean = sum_ref[...] * inv_m
        var = sq_ref[...] * inv_m - mean * mean        # biased variance
        scale = g_ref[...] * jax.lax.rsqrt(var + eps)
        y = (x - mean) * scale + b_ref[...]
        if relu:
            y = jnp.maximum(y, 0.0)
        o_ref[...] = y


def _bn_add_relu_kernel(x_ref, g_ref, b_ref, r_ref, o_ref, sum_ref, sq_ref,
                        *, inv_m, eps):
    phase = pl.program_id(0)
    step = pl.program_id(1)

    @pl.when((phase == 0) & (step == 0))
    def _():
        sum_ref[...] = jnp.zeros_like(sum_ref)
        sq_ref[...] = jnp.zeros_like(sq_ref)

    @pl.when(phase == 0)
    def _():
        x = x_ref[...]
        sum_ref[...] += jnp.sum(x, axis=0, keepdims=True)
        sq_ref[...] += jnp.sum(x * x, axis=0, keepdims=True)

    @pl.when(phase == 1)
    def _():
        x = x_ref[...]
        mean = sum_ref[...] * inv_m
        var = sq_ref[...] * inv_m - mean * mean
        scale = g_ref[...] * jax.lax.rsqrt(var + eps)
        y = (x - mean) * scale + b_ref[...]
        o_ref[...] = jnp.maximum(y + r_ref[...], 0.0)


def pallas_batchnorm(x2, gamma, beta, residual=None, relu=True, eps=1e-5):
    """x2: (M, C) f32 slab.  Per-channel batch stats over the M rows."""
    M, C = x2.shape
    tm = min(2048, _round_up(M, 8))     # large tiles: BN is HBM-bandwidth bound
    m_pad = _round_up(M, tm)
    if m_pad != M:
        # zero rows contribute 0 to sum/sumsq; we divide by the true M below.
        x2 = jnp.pad(x2, ((0, m_pad - M), (0, 0)))
        if residual is not None:
            residual = jnp.pad(residual, ((0, m_pad - M), (0, 0)))
    nt = m_pad // tm

    g2 = gamma.reshape(1, C).astype(jnp.float32)
    b2 = beta.reshape(1, C).astype(jnp.float32)

    x_spec = pl.BlockSpec((tm, C), lambda p, i: (i, 0))
    vec_spec = pl.BlockSpec((1, C), lambda p, i: (0, 0))
    # Only advances during phase 1 (avoids flushing untouched output blocks /
    # re-reading the residual during the stats pass).
    lazy_spec = pl.BlockSpec((tm, C), lambda p, i: (p * i, 0))

    scratch = [pltpu.VMEM((1, C), jnp.float32), pltpu.VMEM((1, C), jnp.float32)]
    vmem = int(min(6 * tm * C * 4 + (8 << 20), 32 << 20))
    params = pltpu.CompilerParams(
        dimension_semantics=("arbitrary", "arbitrary"), vmem_limit_bytes=vmem)

    if residual is None:
        kern = functools.partial(_bn_kernel, inv_m=1.0 / M, eps=eps, relu=relu)
        inputs = (x2, g2, b2)
        in_specs = [x_spec, vec_spec, vec_spec]
    else:
        kern = functools.partial(_bn_add_relu_kernel, inv_m=1.0 / M, eps=eps)
        inputs = (x2, g2, b2, residual)
        in_specs = [x_spec, vec_spec, vec_spec, lazy_spec]

    y = pl.pallas_call(
        kern, grid=(2, nt),
        out_shape=jax.ShapeDtypeStruct((m_pad, C), jnp.float32),
        in_specs=in_specs, out_specs=lazy_spec,
        scratch_shapes=scratch, compiler_params=params)(*inputs)
    return y[:M] if m_pad != M else y


# ----------------------------------------------------------------------------
# NN building blocks (NHWC everywhere)
# ----------------------------------------------------------------------------
def _im2col(x, kh, kw, stride, padding):
    """Channel-concat im2col on NHWC (no transposes)."""
    # TODO(synk): implicit-GEMM conv would avoid materializing the kh*kw-
    #             expanded patches in HBM (biggest relative win on v5e).
    N, H, W, Cin = x.shape
    Ho = (H + 2 * padding - kh) // stride + 1
    Wo = (W + 2 * padding - kw) // stride + 1
    xp = jnp.pad(x, ((0, 0), (padding, padding), (padding, padding), (0, 0)))
    cols = [xp[:, i:i + Ho * stride:stride, j:j + Wo * stride:stride, :]
            for i in range(kh) for j in range(kw)]
    patches = jnp.concatenate(cols, axis=-1) if len(cols) > 1 else cols[0]
    return patches.reshape(N * Ho * Wo, kh * kw * Cin), N, Ho, Wo


def _weight_to_mat(w):
    Cout, Cin, kh, kw = w.shape
    return w.transpose(2, 3, 1, 0).reshape(kh * kw * Cin, Cout)  # tap-major


def conv2d(x, w, bias=None, stride=1, padding=0):
    """Plain NHWC conv (used only for the bias-carrying incr conv)."""
    Cout = w.shape[0]
    a, N, Ho, Wo = _im2col(x, w.shape[2], w.shape[3], stride, padding)
    out = pallas_matmul(a, _weight_to_mat(w), bias=bias)
    return out.reshape(N, Ho, Wo, Cout)


def conv2d_bn(x, w, gamma, beta, stride=1, padding=0, relu=True,
              residual=None, eps=1e-5):
    """Conv (no bias, as in resnet) + training-mode BN (+res)(+ReLU), fused."""
    Cout = w.shape[0]
    a, N, Ho, Wo = _im2col(x, w.shape[2], w.shape[3], stride, padding)
    r2 = None if residual is None else residual.reshape(N * Ho * Wo, Cout)
    out = pallas_matmul_bn(a, _weight_to_mat(w), gamma, beta,
                           residual=r2, relu=relu, eps=eps)
    return out.reshape(N, Ho, Wo, Cout)


def maxpool2d(x, k=3, stride=2, padding=1):
    """MaxPool2d(3, 2, 1) as a running-maximum tree on the lane-dense NHWC
    layout (bandwidth-only op; left to XLA per perf review)."""
    N, H, W, C = x.shape
    xp = jnp.pad(x, ((0, 0), (padding, padding), (padding, padding), (0, 0)),
                 constant_values=-jnp.inf)
    Ho = (H + 2 * padding - k) // stride + 1
    Wo = (W + 2 * padding - k) // stride + 1
    out = None
    for i in range(k):
        for j in range(k):
            win = xp[:, i:i + Ho * stride:stride, j:j + Wo * stride:stride, :]
            out = win if out is None else jnp.maximum(out, win)
    return out


def basic_block(x, p, stride=1, downsample=False):
    identity = x
    out = conv2d_bn(x, p['conv1_w'], p['bn1_g'], p['bn1_b'],
                    stride=stride, padding=1, relu=True)
    if downsample:
        identity = conv2d_bn(x, p['ds_w'], p['ds_g'], p['ds_b'],
                             stride=stride, padding=0, relu=False)
    return conv2d_bn(out, p['conv2_w'], p['bn2_g'], p['bn2_b'],
                     stride=1, padding=1, relu=True, residual=identity)


def resnet34_trunk(x, p):
    """resnet34 children()[:-4]: conv1, bn1, relu, maxpool, layer1, layer2."""
    # torch.cat([x, x, x], dim=1) folded into conv1's weights: bit-identical
    # math, no 3x input materialization, K shrinks 147 -> 49.
    w1 = p['conv1_w']
    if x.shape[-1] == 1 and w1.shape[1] == 3:
        w1 = jnp.sum(w1, axis=1, keepdims=True)
    x = conv2d_bn(x, w1, p['bn1_g'], p['bn1_b'], stride=2, padding=3, relu=True)
    x = maxpool2d(x)
    for blk in p['layer1']:
        x = basic_block(x, blk, stride=1, downsample=False)
    x = basic_block(x, p['layer2'][0], stride=2, downsample=True)
    for blk in p['layer2'][1:]:
        x = basic_block(x, blk, stride=1, downsample=False)
    return x                                            # (N, H/8, W/8, 128)


def multihead_attention(query, key_value, p, num_heads=8):
    """nn.MultiheadAttention (batch_first=False): inputs are (L, Nb, E).

    In fuse_model key is value (both convex_hull), so the K and V projections
    are fused into a single lane-dense (E, 2E) Pallas matmul.
    """
    L, Nb, E = query.shape
    S = key_value.shape[0]
    Dh = E // num_heads
    Wq = p['in_proj_weight'][:E]
    Wkv = p['in_proj_weight'][E:]
    bq = p['in_proj_bias'][:E]
    bkv = p['in_proj_bias'][E:]

    q = pallas_matmul(query.reshape(L * Nb, E), Wq.T, bias=bq)        # (L*Nb, E)
    kv = pallas_matmul(key_value.reshape(S * Nb, E), Wkv.T, bias=bkv)  # (S*Nb, 2E)
    k, v = kv[:, :E], kv[:, E:]

    # Tiny softmax(QK^T)V core (L=S=2, Dh=16): left to XLA per perf review —
    # a dedicated Pallas launch costs more than the math and every store would
    # be masked (only 16/128 lanes live).
    scale = 1.0 / float(Dh) ** 0.5
    qh = q.reshape(L, Nb, num_heads, Dh).transpose(1, 2, 0, 3)   # (Nb,H,L,Dh)
    kh = k.reshape(S, Nb, num_heads, Dh).transpose(1, 2, 0, 3)
    vh = v.reshape(S, Nb, num_heads, Dh).transpose(1, 2, 0, 3)
    s = jnp.einsum('bhld,bhsd->bhls', qh, kh,
                   preferred_element_type=jnp.float32) * scale
    pw = jax.nn.softmax(s, axis=-1)
    o = jnp.einsum('bhls,bhsd->bhld', pw, vh,
                   preferred_element_type=jnp.float32)
    o = o.transpose(2, 0, 1, 3).reshape(L * Nb, E)
    # TODO(synk): attn_output_weights (2nd torch return value) is unused by the
    # forward output and is not computed.
    o = pallas_matmul(o, p['out_proj_weight'].T, bias=p['out_proj_bias'])
    return o.reshape(L, Nb, E)


def bilinear_matrix(n_in, n_out):
    """align_corners=True interpolation matrix (n_out, n_in)."""
    if n_in == 1:
        return jnp.ones((n_out, 1), jnp.float32)
    src = jnp.arange(n_out, dtype=jnp.float32) * (n_in - 1) / (n_out - 1)
    lo = jnp.clip(jnp.floor(src).astype(jnp.int32), 0, n_in - 2)
    frac = src - lo.astype(jnp.float32)
    idx = jnp.arange(n_out)
    A = jnp.zeros((n_out, n_in), jnp.float32)
    A = A.at[idx, lo].add(1.0 - frac)
    A = A.at[idx, lo + 1].add(frac)
    return A


def upsample_bilinear2x(x):
    """nn.Upsample(scale_factor=2, mode='bilinear', align_corners=True), NHWC.
    Tiny fixed-weight interpolation along H/W; left to XLA on the lane-dense
    NHWC layout (per perf review)."""
    N, H, W, C = x.shape
    Ah = bilinear_matrix(H, 2 * H)
    Aw = bilinear_matrix(W, 2 * W)
    y = jnp.einsum('ph,nhwc->npwc', Ah, x)
    y = jnp.einsum('qw,npwc->npqc', Aw, y)
    return y                                            # (N, 2H, 2W, C)


# ----------------------------------------------------------------------------
# fuse_model forward
# ----------------------------------------------------------------------------
def fuse_model_forward(heatmap, convex_hull, params):
    # NCHW (B,1,H,W) inputs -> NHWC internally (channels on lanes).  The
    # torch.cat([x,x,x],1) triplication is folded into conv1's weights.
    hm = jnp.transpose(heatmap, (0, 2, 3, 1))
    ch = jnp.transpose(convex_hull, (0, 2, 3, 1))
    # TODO(synk): on v7x, run both trunks through megacore-batched pallas_calls
    # (leading "parallel" trunk axis) instead of two sequential call chains.
    hm = resnet34_trunk(hm, params['heatmap_trunk'])    # (B, h, w, 128)
    ch = resnet34_trunk(ch, params['hull_trunk'])       # (B, h, w, 128)

    bs, h, w, n = ch.shape
    # rearrange 'b n h w -> b (h w) n' == NHWC reshape (no transpose needed)
    q = hm.reshape(bs, h * w, n)
    kv = ch.reshape(bs, h * w, n)
    # batch_first=False => dim0 is treated as sequence (=bs), dim1 as batch (=h*w)
    attn = multihead_attention(q, kv, params['mha'], num_heads=8)
    # rearrange 'b (h w) n -> b n h w' == NHWC reshape
    attn = attn.reshape(bs, h, w, n)

    out = conv2d(attn, params['incr_w'], bias=params['incr_b'],
                 stride=1, padding=1)                   # (B, h, w, 256)
    out = upsample_bilinear2x(out)                      # (B, 2h, 2w, 256)
    return jnp.transpose(out, (0, 3, 1, 2))             # back to NCHW


# ----------------------------------------------------------------------------
# Deterministic parameter init (synthetic, shapes match the torch module)
# ----------------------------------------------------------------------------
def kaiming_conv(key, shape):
    cout, _, kh, kw = shape
    std = (2.0 / (cout * kh * kw)) ** 0.5               # fan_out, relu
    return jax.random.normal(key, shape, jnp.float32) * std


def init_trunk(key):
    keys = iter(jax.random.split(key, 32))
    p = {'conv1_w': kaiming_conv(next(keys), (64, 3, 7, 7)),
         'bn1_g': jnp.ones(64, jnp.float32), 'bn1_b': jnp.zeros(64, jnp.float32)}

    def block(cin, cout, downsample):
        d = {'conv1_w': kaiming_conv(next(keys), (cout, cin, 3, 3)),
             'bn1_g': jnp.ones(cout, jnp.float32), 'bn1_b': jnp.zeros(cout, jnp.float32),
             'conv2_w': kaiming_conv(next(keys), (cout, cout, 3, 3)),
             'bn2_g': jnp.ones(cout, jnp.float32), 'bn2_b': jnp.zeros(cout, jnp.float32)}
        if downsample:
            d['ds_w'] = kaiming_conv(next(keys), (cout, cin, 1, 1))
            d['ds_g'] = jnp.ones(cout, jnp.float32)
            d['ds_b'] = jnp.zeros(cout, jnp.float32)
        return d

    p['layer1'] = [block(64, 64, False) for _ in range(3)]
    p['layer2'] = [block(64, 128, True)] + [block(128, 128, False) for _ in range(3)]
    return p


def init_mha(key, embed=128):
    k1, k2 = jax.random.split(key)
    bound = (6.0 / (2 * embed)) ** 0.5                  # xavier-uniform-like
    return {'in_proj_weight': jax.random.uniform(k1, (3 * embed, embed),
                                                 jnp.float32, -bound, bound),
            'in_proj_bias': jnp.zeros((3 * embed,), jnp.float32),
            'out_proj_weight': jax.random.uniform(k2, (embed, embed),
                                                  jnp.float32, -bound, bound),
            'out_proj_bias': jnp.zeros((embed,), jnp.float32)}


def init_params(key):
    k_hm, k_ch, k_mha, k_inc = jax.random.split(key, 4)
    return {'heatmap_trunk': init_trunk(k_hm),
            'hull_trunk': init_trunk(k_ch),
            'mha': init_mha(k_mha),
            'incr_w': kaiming_conv(k_inc, (256, 128, 3, 3)),
            'incr_b': jnp.zeros((256,), jnp.float32)}


# ----------------------------------------------------------------------------
if __name__ == "__main__":
    key = jax.random.PRNGKey(0)
    k_hm, k_ch, k_p = jax.random.split(key, 3)
    heatmap = jax.random.normal(k_hm, (2, 1, 16, 16), jnp.float32)
    convex_hull = jax.random.normal(k_ch, (2, 1, 16, 16), jnp.float32)
    params = init_params(k_p)

    fwd = jax.jit(fuse_model_forward)
    out = jax.block_until_ready(fwd(heatmap, convex_hull, params))
    assert out.shape == (2, 256, 4, 4), out.shape
    assert out.dtype == jnp.float32
    print("KERNEL_OK")
</pallas_src>

<mosaic_0001>
module attributes {stable_mosaic.version = 11 : i64} {
  func.func @_mm_bn_kernel(%arg0: i32, %arg1: i32, %arg2: i32, %arg3: memref<128x128xbf16, #tpu.memory_space<vmem>>, %arg4: memref<128x128xbf16, #tpu.memory_space<vmem>>, %arg5: memref<1x128xf32, #tpu.memory_space<vmem>>, %arg6: memref<1x128xf32, #tpu.memory_space<vmem>>, %arg7: memref<128x128xf32, #tpu.memory_space<vmem>>, %arg8: memref<128x128xf32, #tpu.memory_space<vmem>>) attributes {dimension_semantics = [#tpu.dimension_semantics<parallel>, #tpu.dimension_semantics<parallel>, #tpu.dimension_semantics<arbitrary>], iteration_bounds = array<i64: 1, 1, 1>, scalar_prefetch = 0 : i64, scratch_operands = 1 : i64, tpu.core_type = #tpu.core_type<tc>, window_params = [{transform_indices = @transform_0, window_bounds = array<i64: 128, 128>}, {transform_indices = @transform_1, window_bounds = array<i64: 128, 128>}, {transform_indices = @transform_2, window_bounds = array<i64: 1, 128>}, {transform_indices = @transform_3, window_bounds = array<i64: 1, 128>}, {transform_indices = @transform_4, window_bounds = array<i64: 128, 128>}]} {
    %c0_i32 = arith.constant 0 : i32
    %0 = arith.cmpi eq, %arg2, %c0_i32 : i32
    %1 = arith.extui %0 : i1 to i32
    %c0_i32_0 = arith.constant 0 : i32
    %2 = arith.cmpi ne, %1, %c0_i32_0 : i32
    scf.if %2 {
      %cst_10 = arith.constant 0.000000e+00 : f32
      %12 = vector.broadcast %cst_10 : f32 to vector<128x128xf32>
      %c0_11 = arith.constant 0 : index
      %c0_12 = arith.constant 0 : index
      %13 = vector.load %arg8[%c0_11, %c0_12] : memref<128x128xf32, #tpu.memory_space<vmem>>, vector<128x128xf32>
      tpu.vector_store %arg8[%c0_11, %c0_12], %12 {strides = array<i32>} : memref<128x128xf32, #tpu.memory_space<vmem>>, vector<128x128xf32>,
    } else {
    }
    %c0 = arith.constant 0 : index
    %c0_1 = arith.constant 0 : index
    %3 = vector.load %arg8[%c0, %c0_1] : memref<128x128xf32, #tpu.memory_space<vmem>>, vector<128x128xf32>
    %c0_2 = arith.constant 0 : index
    %c0_3 = arith.constant 0 : index
    %4 = vector.load %arg3[%c0_2, %c0_3] : memref<128x128xbf16, #tpu.memory_space<vmem>>, vector<128x128xbf16>
    %c0_4 = arith.constant 0 : index
    %c0_5 = arith.constant 0 : index
    %5 = vector.load %arg4[%c0_4, %c0_5] : memref<128x128xbf16, #tpu.memory_space<vmem>>, vector<128x128xbf16>
    %cst = arith.constant dense<0.000000e+00> : vector<128x128xf32>
    %6 = tpu.matmul %4, %5, %cst {dimension_numbers = #tpu.dot_dimension_numbers<[1], [0], [0], [1], [0, 0, 1, 1], [], []>} : vector<128x128xbf16>, vector<128x128xbf16>, vector<128x128xf32> -> vector<128x128xf32>
    %7 = arith.addf %3, %6 : vector<128x128xf32>
    %c0_6 = arith.constant 0 : index
    %c0_7 = arith.constant 0 : index
    %8 = vector.load %arg8[%c0_6, %c0_7] : memref<128x128xf32, #tpu.memory_space<vmem>>, vector<128x128xf32>
    tpu.vector_store %arg8[%c0_6, %c0_7], %7 {strides = array<i32>} : memref<128x128xf32, #tpu.memory_space<vmem>>, vector<128x128xf32>,
    %c0_i32_8 = arith.constant 0 : i32
    %9 = arith.cmpi eq, %arg2, %c0_i32_8 : i32
    %10 = arith.extui %9 : i1 to i32
    %c0_i32_9 = arith.constant 0 : i32
    %11 = arith.cmpi ne, %10, %c0_i32_9 : i32
    scf.if %11 {
      %c0_10 = arith.constant 0 : index
      %c0_11 = arith.constant 0 : index
      %12 = vector.load %arg8[%c0_10, %c0_11] : memref<128x128xf32, #tpu.memory_space<vmem>>, vector<128x128xf32>
      %cst_12 = arith.constant dense<0.000000e+00> : vector<128xf32>
      %13 = vector.multi_reduction <add>, %12, %cst_12 [0] : vector<128x128xf32> to vector<128xf32>
      %14 = vector.shape_cast %13 : vector<128xf32> to vector<1x128xf32>
      %15 = arith.mulf %12, %12 : vector<128x128xf32>
      %cst_13 = arith.constant dense<0.000000e+00> : vector<128xf32>
      %16 = vector.multi_reduction <add>, %15, %cst_13 [0] : vector<128x128xf32> to vector<128xf32>
      %17 = vector.shape_cast %16 : vector<128xf32> to vector<1x128xf32>
      %cst_14 = arith.constant 7.812500e-03 : f32
      %18 = vector.broadcast %cst_14 : f32 to vector<1x128xf32>
      %19 = arith.mulf %14, %18 : vector<1x128xf32>
      %cst_15 = arith.constant 7.812500e-03 : f32
      %20 = vector.broadcast %cst_15 : f32 to vector<1x128xf32>
      %21 = arith.mulf %17, %20 : vector<1x128xf32>
      %22 = arith.mulf %19, %19 : vector<1x128xf32>
      %23 = arith.subf %21, %22 : vector<1x128xf32>
      %c0_16 = arith.constant 0 : index
      %c0_17 = arith.constant 0 : index
      %24 = vector.load %arg5[%c0_16, %c0_17] : memref<1x128xf32, #tpu.memory_space<vmem>>, vector<1x128xf32>
      %cst_18 = arith.constant 9.99999974E-6 : f32
      %25 = vector.broadcast %cst_18 : f32 to vector<1x128xf32>
      %26 = arith.addf %23, %25 : vector<1x128xf32>
      %27 = math.rsqrt %26 : vector<1x128xf32>
      %28 = arith.mulf %24, %27 : vector<1x128xf32>
      %29 = vector.broadcast %19 : vector<1x128xf32> to vector<128x128xf32>
      %30 = arith.subf %12, %29 : vector<128x128xf32>
      %31 = vector.broadcast %28 : vector<1x128xf32> to vector<128x128xf32>
      %32 = arith.mulf %30, %31 : vector<128x128xf32>
      %c0_19 = arith.constant 0 : index
      %c0_20 = arith.constant 0 : index
      %33 = vector.load %arg6[%c0_19, %c0_20] : memref<1x128xf32, #tpu.memory_space<vmem>>, vector<1x128xf32>
      %34 = vector.broadcast %33 : vector<1x128xf32> to vector<128x128xf32>
      %35 = arith.addf %32, %34 : vector<128x128xf32>
      %cst_21 = arith.constant 0.000000e+00 : f32
      %36 = vector.broadcast %cst_21 : f32 to vector<128x128xf32>
      %37 = arith.maximumf %35, %36 : vector<128x128xf32>
      %c0_22 = arith.constant 0 : index
      %c0_23 = arith.constant 0 : index
      %38 = vector.load %arg7[%c0_22, %c0_23] : memref<128x128xf32, #tpu.memory_space<vmem>>, vector<128x128xf32>
      tpu.vector_store %arg7[%c0_22, %c0_23], %37 {strides = array<i32>} : memref<128x128xf32, #tpu.memory_space<vmem>>, vector<128x128xf32>,
    } else {
    }
    return
  }
  func.func @transform_0(%arg0: i32, %arg1: i32, %arg2: i32) -> (i32, i32) {
    %c0_i32 = arith.constant 0 : i32
    return %arg0, %arg2 : i32, i32
  }
  func.func @transform_1(%arg0: i32, %arg1: i32, %arg2: i32) -> (i32, i32) {
    %c0_i32 = arith.constant 0 : i32
    return %arg2, %arg1 : i32, i32
  }
  func.func @transform_2(%arg0: i32, %arg1: i32, %arg2: i32) -> (i32, i32) {
    %c0_i32 = arith.constant 0 : i32
    %c0_i32_0 = arith.constant 0 : i32
    return %c0_i32, %arg1 : i32, i32
  }
  func.func @transform_3(%arg0: i32, %arg1: i32, %arg2: i32) -> (i32, i32) {
    %c0_i32 = arith.constant 0 : i32
    %c0_i32_0 = arith.constant 0 : i32
    return %c0_i32, %arg1 : i32, i32
  }
  func.func @transform_4(%arg0: i32, %arg1: i32, %arg2: i32) -> (i32, i32) {
    %c0_i32 = arith.constant 0 : i32
    return %arg0, %arg1 : i32, i32
  }
}

module attributes {stable_mosaic.version = 11 : i64} {
  func.func @_mm_bn_kernel(%arg0: i32, %arg1: i32, %arg2: i32, %arg3: memref<32x640xbf16, #tpu.memory_space<vmem>>, %arg4: memref<640x128xbf16, #tpu.memory_space<vmem>>, %arg5: memref<1x128xf32, #tpu.memory_space<vmem>>, %arg6: memref<1x128xf32, #tpu.memory_space<vmem>>, %arg7: memref<32x128xf32, #tpu.memory_space<vmem>>, %arg8: memref<32x128xf32, #tpu.memory_space<vmem>>) attributes {dimension_semantics = [#tpu.dimension_semantics<parallel>, #tpu.dimension_semantics<parallel>, #tpu.dimension_semantics<arbitrary>], iteration_bounds = array<i64: 1, 1, 1>, scalar_prefetch = 0 : i64, scratch_operands = 1 : i64, tpu.core_type = #tpu.core_type<tc>, window_params = [{transform_indices = @transform_0, window_bounds = array<i64: 32, 640>}, {transform_indices = @transform_1, window_bounds = array<i64: 640, 128>}, {transform_indices = @transform_2, window_bounds = array<i64: 1, 128>}, {transform_indices = @transform_3, window_bounds = array<i64: 1, 128>}, {transform_indices = @transform_4, window_bounds = array<i64: 32, 128>}]} {
    %c0_i32 = arith.constant 0 : i32
    %0 = arith.cmpi eq, %arg2, %c0_i32 : i32
    %1 = arith.extui %0 : i1 to i32
    %c0_i32_0 = arith.constant 0 : i32
    %2 = arith.cmpi ne, %1, %c0_i32_0 : i32
    scf.if %2 {
      %cst_10 = arith.constant 0.000000e+00 : f32
      %12 = vector.broadcast %cst_10 : f32 to vector<32x128xf32>
      %c0_11 = arith.constant 0 : index
      %c0_12 = arith.constant 0 : index
      %13 = vector.load %arg8[%c0_11, %c0_12] : memref<32x128xf32, #tpu.memory_space<vmem>>, vector<32x128xf32>
      tpu.vector_store %arg8[%c0_11, %c0_12], %12 {strides = array<i32>} : memref<32x128xf32, #tpu.memory_space<vmem>>, vector<32x128xf32>,
    } else {
    }
    %c0 = arith.constant 0 : index
    %c0_1 = arith.constant 0 : index
    %3 = vector.load %arg8[%c0, %c0_1] : memref<32x128xf32, #tpu.memory_space<vmem>>, vector<32x128xf32>
    %c0_2 = arith.constant 0 : index
    %c0_3 = arith.constant 0 : index
    %4 = vector.load %arg3[%c0_2, %c0_3] : memref<32x640xbf16, #tpu.memory_space<vmem>>, vector<32x640xbf16>
    %c0_4 = arith.constant 0 : index
    %c0_5 = arith.constant 0 : index
    %5 = vector.load %arg4[%c0_4, %c0_5] : memref<640x128xbf16, #tpu.memory_space<vmem>>, vector<640x128xbf16>
    %cst = arith.constant dense<0.000000e+00> : vector<32x128xf32>
    %6 = tpu.matmul %4, %5, %cst {dimension_numbers = #tpu.dot_dimension_numbers<[1], [0], [0], [1], [0, 0, 1, 1], [], []>} : vector<32x640xbf16>, vector<640x128xbf16>, vector<32x128xf32> -> vector<32x128xf32>
    %7 = arith.addf %3, %6 : vector<32x128xf32>
    %c0_6 = arith.constant 0 : index
    %c0_7 = arith.constant 0 : index
    %8 = vector.load %arg8[%c0_6, %c0_7] : memref<32x128xf32, #tpu.memory_space<vmem>>, vector<32x128xf32>
    tpu.vector_store %arg8[%c0_6, %c0_7], %7 {strides = array<i32>} : memref<32x128xf32, #tpu.memory_space<vmem>>, vector<32x128xf32>,
    %c0_i32_8 = arith.constant 0 : i32
    %9 = arith.cmpi eq, %arg2, %c0_i32_8 : i32
    %10 = arith.extui %9 : i1 to i32
    %c0_i32_9 = arith.constant 0 : i32
    %11 = arith.cmpi ne, %10, %c0_i32_9 : i32
    scf.if %11 {
      %c0_10 = arith.constant 0 : index
      %c0_11 = arith.constant 0 : index
      %12 = vector.load %arg8[%c0_10, %c0_11] : memref<32x128xf32, #tpu.memory_space<vmem>>, vector<32x128xf32>
      %cst_12 = arith.constant dense<0.000000e+00> : vector<128xf32>
      %13 = vector.multi_reduction <add>, %12, %cst_12 [0] : vector<32x128xf32> to vector<128xf32>
      %14 = vector.shape_cast %13 : vector<128xf32> to vector<1x128xf32>
      %15 = arith.mulf %12, %12 : vector<32x128xf32>
      %cst_13 = arith.constant dense<0.000000e+00> : vector<128xf32>
      %16 = vector.multi_reduction <add>, %15, %cst_13 [0] : vector<32x128xf32> to vector<128xf32>
      %17 = vector.shape_cast %16 : vector<128xf32> to vector<1x128xf32>
      %cst_14 = arith.constant 3.125000e-02 : f32
      %18 = vector.broadcast %cst_14 : f32 to vector<1x128xf32>
      %19 = arith.mulf %14, %18 : vector<1x128xf32>
      %cst_15 = arith.constant 3.125000e-02 : f32
      %20 = vector.broadcast %cst_15 : f32 to vector<1x128xf32>
      %21 = arith.mulf %17, %20 : vector<1x128xf32>
      %22 = arith.mulf %19, %19 : vector<1x128xf32>
      %23 = arith.subf %21, %22 : vector<1x128xf32>
      %c0_16 = arith.constant 0 : index
      %c0_17 = arith.constant 0 : index
      %24 = vector.load %arg5[%c0_16, %c0_17] : memref<1x128xf32, #tpu.memory_space<vmem>>, vector<1x128xf32>
      %cst_18 = arith.constant 9.99999974E-6 : f32
      %25 = vector.broadcast %cst_18 : f32 to vector<1x128xf32>
      %26 = arith.addf %23, %25 : vector<1x128xf32>
      %27 = math.rsqrt %26 : vector<1x128xf32>
      %28 = arith.mulf %24, %27 : vector<1x128xf32>
      %29 = vector.broadcast %19 : vector<1x128xf32> to vector<32x128xf32>
      %30 = arith.subf %12, %29 : vector<32x128xf32>
      %31 = vector.broadcast %28 : vector<1x128xf32> to vector<32x128xf32>
      %32 = arith.mulf %30, %31 : vector<32x128xf32>
      %c0_19 = arith.constant 0 : index
      %c0_20 = arith.constant 0 : index
      %33 = vector.load %arg6[%c0_19, %c0_20] : memref<1x128xf32, #tpu.memory_space<vmem>>, vector<1x128xf32>
      %34 = vector.broadcast %33 : vector<1x128xf32> to vector<32x128xf32>
      %35 = arith.addf %32, %34 : vector<32x128xf32>
      %cst_21 = arith.constant 0.000000e+00 : f32
      %36 = vector.broadcast %cst_21 : f32 to vector<32x128xf32>
      %37 = arith.maximumf %35, %36 : vector<32x128xf32>
      %c0_22 = arith.constant 0 : index
      %c0_23 = arith.constant 0 : index
      %38 = vector.load %arg7[%c0_22, %c0_23] : memref<32x128xf32, #tpu.memory_space<vmem>>, vector<32x128xf32>
      tpu.vector_store %arg7[%c0_22, %c0_23], %37 {strides = array<i32>} : memref<32x128xf32, #tpu.memory_space<vmem>>, vector<32x128xf32>,
    } else {
    }
    return
  }
  func.func @transform_0(%arg0: i32, %arg1: i32, %arg2: i32) -> (i32, i32) {
    %c0_i32 = arith.constant 0 : i32
    return %arg0, %arg2 : i32, i32
  }
  func.func @transform_1(%arg0: i32, %arg1: i32, %arg2: i32) -> (i32, i32) {
    %c0_i32 = arith.constant 0 : i32
    return %arg2, %arg1 : i32, i32
  }
  func.func @transform_2(%arg0: i32, %arg1: i32, %arg2: i32) -> (i32, i32) {
    %c0_i32 = arith.constant 0 : i32
    %c0_i32_0 = arith.constant 0 : i32
    return %c0_i32, %arg1 : i32, i32
  }
  func.func @transform_3(%arg0: i32, %arg1: i32, %arg2: i32) -> (i32, i32) {
    %c0_i32 = arith.constant 0 : i32
    %c0_i32_0 = arith.constant 0 : i32
    return %c0_i32, %arg1 : i32, i32
  }
  func.func @transform_4(%arg0: i32, %arg1: i32, %arg2: i32) -> (i32, i32) {
    %c0_i32 = arith.constant 0 : i32
    return %arg0, %arg1 : i32, i32
  }
}

module attributes {stable_mosaic.version = 11 : i64} {
  func.func @_mm_bn_add_relu_kernel(%arg0: i32, %arg1: i32, %arg2: i32, %arg3: memref<32x640xbf16, #tpu.memory_space<vmem>>, %arg4: memref<640x128xbf16, #tpu.memory_space<vmem>>, %arg5: memref<1x128xf32, #tpu.memory_space<vmem>>, %arg6: memref<1x128xf32, #tpu.memory_space<vmem>>, %arg7: memref<32x128xf32, #tpu.memory_space<vmem>>, %arg8: memref<32x128xf32, #tpu.memory_space<vmem>>, %arg9: memref<32x128xf32, #tpu.memory_space<vmem>>) attributes {dimension_semantics = [#tpu.dimension_semantics<parallel>, #tpu.dimension_semantics<parallel>, #tpu.dimension_semantics<arbitrary>], iteration_bounds = array<i64: 1, 1, 1>, scalar_prefetch = 0 : i64, scratch_operands = 1 : i64, tpu.core_type = #tpu.core_type<tc>, window_params = [{transform_indices = @transform_0, window_bounds = array<i64: 32, 640>}, {transform_indices = @transform_1, window_bounds = array<i64: 640, 128>}, {transform_indices = @transform_2, window_bounds = array<i64: 1, 128>}, {transform_indices = @transform_3, window_bounds = array<i64: 1, 128>}, {transform_indices = @transform_4, window_bounds = array<i64: 32, 128>}, {transform_indices = @transform_5, window_bounds = array<i64: 32, 128>}]} {
    %c0_i32 = arith.constant 0 : i32
    %0 = arith.cmpi eq, %arg2, %c0_i32 : i32
    %1 = arith.extui %0 : i1 to i32
    %c0_i32_0 = arith.constant 0 : i32
    %2 = arith.cmpi ne, %1, %c0_i32_0 : i32
    scf.if %2 {
      %cst_10 = arith.constant 0.000000e+00 : f32
      %12 = vector.broadcast %cst_10 : f32 to vector<32x128xf32>
      %c0_11 = arith.constant 0 : index
      %c0_12 = arith.constant 0 : index
      %13 = vector.load %arg9[%c0_11, %c0_12] : memref<32x128xf32, #tpu.memory_space<vmem>>, vector<32x128xf32>
      tpu.vector_store %arg9[%c0_11, %c0_12], %12 {strides = array<i32>} : memref<32x128xf32, #tpu.memory_space<vmem>>, vector<32x128xf32>,
    } else {
    }
    %c0 = arith.constant 0 : index
    %c0_1 = arith.constant 0 : index
    %3 = vector.load %arg9[%c0, %c0_1] : memref<32x128xf32, #tpu.memory_space<vmem>>, vector<32x128xf32>
    %c0_2 = arith.constant 0 : index
    %c0_3 = arith.constant 0 : index
    %4 = vector.load %arg3[%c0_2, %c0_3] : memref<32x640xbf16, #tpu.memory_space<vmem>>, vector<32x640xbf16>
    %c0_4 = arith.constant 0 : index
    %c0_5 = arith.constant 0 : index
    %5 = vector.load %arg4[%c0_4, %c0_5] : memref<640x128xbf16, #tpu.memory_space<vmem>>, vector<640x128xbf16>
    %cst = arith.constant dense<0.000000e+00> : vector<32x128xf32>
    %6 = tpu.matmul %4, %5, %cst {dimension_numbers = #tpu.dot_dimension_numbers<[1], [0], [0], [1], [0, 0, 1, 1], [], []>} : vector<32x640xbf16>, vector<640x128xbf16>, vector<32x128xf32> -> vector<32x128xf32>
    %7 = arith.addf %3, %6 : vector<32x128xf32>
    %c0_6 = arith.constant 0 : index
    %c0_7 = arith.constant 0 : index
    %8 = vector.load %arg9[%c0_6, %c0_7] : memref<32x128xf32, #tpu.memory_space<vmem>>, vector<32x128xf32>
    tpu.vector_store %arg9[%c0_6, %c0_7], %7 {strides = array<i32>} : memref<32x128xf32, #tpu.memory_space<vmem>>, vector<32x128xf32>,
    %c0_i32_8 = arith.constant 0 : i32
    %9 = arith.cmpi eq, %arg2, %c0_i32_8 : i32
    %10 = arith.extui %9 : i1 to i32
    %c0_i32_9 = arith.constant 0 : i32
    %11 = arith.cmpi ne, %10, %c0_i32_9 : i32
    scf.if %11 {
      %c0_10 = arith.constant 0 : index
      %c0_11 = arith.constant 0 : index
      %12 = vector.load %arg9[%c0_10, %c0_11] : memref<32x128xf32, #tpu.memory_space<vmem>>, vector<32x128xf32>
      %cst_12 = arith.constant dense<0.000000e+00> : vector<128xf32>
      %13 = vector.multi_reduction <add>, %12, %cst_12 [0] : vector<32x128xf32> to vector<128xf32>
      %14 = vector.shape_cast %13 : vector<128xf32> to vector<1x128xf32>
      %15 = arith.mulf %12, %12 : vector<32x128xf32>
      %cst_13 = arith.constant dense<0.000000e+00> : vector<128xf32>
      %16 = vector.multi_reduction <add>, %15, %cst_13 [0] : vector<32x128xf32> to vector<128xf32>
      %17 = vector.shape_cast %16 : vector<128xf32> to vector<1x128xf32>
      %cst_14 = arith.constant 3.125000e-02 : f32
      %18 = vector.broadcast %cst_14 : f32 to vector<1x128xf32>
      %19 = arith.mulf %14, %18 : vector<1x128xf32>
      %cst_15 = arith.constant 3.125000e-02 : f32
      %20 = vector.broadcast %cst_15 : f32 to vector<1x128xf32>
      %21 = arith.mulf %17, %20 : vector<1x128xf32>
      %22 = arith.mulf %19, %19 : vector<1x128xf32>
      %23 = arith.subf %21, %22 : vector<1x128xf32>
      %c0_16 = arith.constant 0 : index
      %c0_17 = arith.constant 0 : index
      %24 = vector.load %arg5[%c0_16, %c0_17] : memref<1x128xf32, #tpu.memory_space<vmem>>, vector<1x128xf32>
      %cst_18 = arith.constant 9.99999974E-6 : f32
      %25 = vector.broadcast %cst_18 : f32 to vector<1x128xf32>
      %26 = arith.addf %23, %25 : vector<1x128xf32>
      %27 = math.rsqrt %26 : vector<1x128xf32>
      %28 = arith.mulf %24, %27 : vector<1x128xf32>
      %29 = vector.broadcast %19 : vector<1x128xf32> to vector<32x128xf32>
      %30 = arith.subf %12, %29 : vector<32x128xf32>
      %31 = vector.broadcast %28 : vector<1x128xf32> to vector<32x128xf32>
      %32 = arith.mulf %30, %31 : vector<32x128xf32>
      %c0_19 = arith.constant 0 : index
      %c0_20 = arith.constant 0 : index
      %33 = vector.load %arg6[%c0_19, %c0_20] : memref<1x128xf32, #tpu.memory_space<vmem>>, vector<1x128xf32>
      %34 = vector.broadcast %33 : vector<1x128xf32> to vector<32x128xf32>
      %35 = arith.addf %32, %34 : vector<32x128xf32>
      %c0_21 = arith.constant 0 : index
      %c0_22 = arith.constant 0 : index
      %36 = vector.load %arg7[%c0_21, %c0_22] : memref<32x128xf32, #tpu.memory_space<vmem>>, vector<32x128xf32>
      %37 = arith.addf %35, %36 : vector<32x128xf32>
      %cst_23 = arith.constant 0.000000e+00 : f32
      %38 = vector.broadcast %cst_23 : f32 to vector<32x128xf32>
      %39 = arith.maximumf %37, %38 : vector<32x128xf32>
      %c0_24 = arith.constant 0 : index
      %c0_25 = arith.constant 0 : index
      %40 = vector.load %arg8[%c0_24, %c0_25] : memref<32x128xf32, #tpu.memory_space<vmem>>, vector<32x128xf32>
      tpu.vector_store %arg8[%c0_24, %c0_25], %39 {strides = array<i32>} : memref<32x128xf32, #tpu.memory_space<vmem>>, vector<32x128xf32>,
    } else {
    }
    return
  }
  func.func @transform_0(%arg0: i32, %arg1: i32, %arg2: i32) -> (i32, i32) {
    %c0_i32 = arith.constant 0 : i32
    return %arg0, %arg2 : i32, i32
  }
  func.func @transform_1(%arg0: i32, %arg1: i32, %arg2: i32) -> (i32, i32) {
    %c0_i32 = arith.constant 0 : i32
    return %arg2, %arg1 : i32, i32
  }
  func.func @transform_2(%arg0: i32, %arg1: i32, %arg2: i32) -> (i32, i32) {
    %c0_i32 = arith.constant 0 : i32
    %c0_i32_0 = arith.constant 0 : i32
    return %c0_i32, %arg1 : i32, i32
  }
  func.func @transform_3(%arg0: i32, %arg1: i32, %arg2: i32) -> (i32, i32) {
    %c0_i32 = arith.constant 0 : i32
    %c0_i32_0 = arith.constant 0 : i32
    return %c0_i32, %arg1 : i32, i32
  }
  func.func @transform_4(%arg0: i32, %arg1: i32, %arg2: i32) -> (i32, i32) {
    %c0_i32 = arith.constant 0 : i32
    return %arg0, %arg1 : i32, i32
  }
  func.func @transform_5(%arg0: i32, %arg1: i32, %arg2: i32) -> (i32, i32) {
    %c0_i32 = arith.constant 0 : i32
    return %arg0, %arg1 : i32, i32
  }
}

module attributes {stable_mosaic.version = 11 : i64} {
  func.func @_mm_bn_kernel(%arg0: i32, %arg1: i32, %arg2: i32, %arg3: memref<8x640xbf16, #tpu.memory_space<vmem>>, %arg4: memref<640x128xbf16, #tpu.memory_space<vmem>>, %arg5: memref<1x128xf32, #tpu.memory_space<vmem>>, %arg6: memref<1x128xf32, #tpu.memory_space<vmem>>, %arg7: memref<8x128xf32, #tpu.memory_space<vmem>>, %arg8: memref<8x128xf32, #tpu.memory_space<vmem>>) attributes {dimension_semantics = [#tpu.dimension_semantics<parallel>, #tpu.dimension_semantics<parallel>, #tpu.dimension_semantics<arbitrary>], iteration_bounds = array<i64: 1, 1, 1>, scalar_prefetch = 0 : i64, scratch_operands = 1 : i64, tpu.core_type = #tpu.core_type<tc>, window_params = [{transform_indices = @transform_0, window_bounds = array<i64: 8, 640>}, {transform_indices = @transform_1, window_bounds = array<i64: 640, 128>}, {transform_indices = @transform_2, window_bounds = array<i64: 1, 128>}, {transform_indices = @transform_3, window_bounds = array<i64: 1, 128>}, {transform_indices = @transform_4, window_bounds = array<i64: 8, 128>}]} {
    %c0_i32 = arith.constant 0 : i32
    %0 = arith.cmpi eq, %arg2, %c0_i32 : i32
    %1 = arith.extui %0 : i1 to i32
    %c0_i32_0 = arith.constant 0 : i32
    %2 = arith.cmpi ne, %1, %c0_i32_0 : i32
    scf.if %2 {
      %cst_10 = arith.constant 0.000000e+00 : f32
      %12 = vector.broadcast %cst_10 : f32 to vector<8x128xf32>
      %c0_11 = arith.constant 0 : index
      %c0_12 = arith.constant 0 : index
      %13 = vector.load %arg8[%c0_11, %c0_12] : memref<8x128xf32, #tpu.memory_space<vmem>>, vector<8x128xf32>
      tpu.vector_store %arg8[%c0_11, %c0_12], %12 {strides = array<i32>} : memref<8x128xf32, #tpu.memory_space<vmem>>, vector<8x128xf32>,
    } else {
    }
    %c0 = arith.constant 0 : index
    %c0_1 = arith.constant 0 : index
    %3 = vector.load %arg8[%c0, %c0_1] : memref<8x128xf32, #tpu.memory_space<vmem>>, vector<8x128xf32>
    %c0_2 = arith.constant 0 : index
    %c0_3 = arith.constant 0 : index
    %4 = vector.load %arg3[%c0_2, %c0_3] : memref<8x640xbf16, #tpu.memory_space<vmem>>, vector<8x640xbf16>
    %c0_4 = arith.constant 0 : index
    %c0_5 = arith.constant 0 : index
    %5 = vector.load %arg4[%c0_4, %c0_5] : memref<640x128xbf16, #tpu.memory_space<vmem>>, vector<640x128xbf16>
    %cst = arith.constant dense<0.000000e+00> : vector<8x128xf32>
    %6 = tpu.matmul %4, %5, %cst {dimension_numbers = #tpu.dot_dimension_numbers<[1], [0], [0], [1], [0, 0, 1, 1], [], []>} : vector<8x640xbf16>, vector<640x128xbf16>, vector<8x128xf32> -> vector<8x128xf32>
    %7 = arith.addf %3, %6 : vector<8x128xf32>
    %c0_6 = arith.constant 0 : index
    %c0_7 = arith.constant 0 : index
    %8 = vector.load %arg8[%c0_6, %c0_7] : memref<8x128xf32, #tpu.memory_space<vmem>>, vector<8x128xf32>
    tpu.vector_store %arg8[%c0_6, %c0_7], %7 {strides = array<i32>} : memref<8x128xf32, #tpu.memory_space<vmem>>, vector<8x128xf32>,
    %c0_i32_8 = arith.constant 0 : i32
    %9 = arith.cmpi eq, %arg2, %c0_i32_8 : i32
    %10 = arith.extui %9 : i1 to i32
    %c0_i32_9 = arith.constant 0 : i32
    %11 = arith.cmpi ne, %10, %c0_i32_9 : i32
    scf.if %11 {
      %c0_10 = arith.constant 0 : index
      %c0_11 = arith.constant 0 : index
      %12 = vector.load %arg8[%c0_10, %c0_11] : memref<8x128xf32, #tpu.memory_space<vmem>>, vector<8x128xf32>
      %cst_12 = arith.constant dense<0.000000e+00> : vector<128xf32>
      %13 = vector.multi_reduction <add>, %12, %cst_12 [0] : vector<8x128xf32> to vector<128xf32>
      %14 = vector.shape_cast %13 : vector<128xf32> to vector<1x128xf32>
      %15 = arith.mulf %12, %12 : vector<8x128xf32>
      %cst_13 = arith.constant dense<0.000000e+00> : vector<128xf32>
      %16 = vector.multi_reduction <add>, %15, %cst_13 [0] : vector<8x128xf32> to vector<128xf32>
      %17 = vector.shape_cast %16 : vector<128xf32> to vector<1x128xf32>
      %cst_14 = arith.constant 1.250000e-01 : f32
      %18 = vector.broadcast %cst_14 : f32 to vector<1x128xf32>
      %19 = arith.mulf %14, %18 : vector<1x128xf32>
      %cst_15 = arith.constant 1.250000e-01 : f32
      %20 = vector.broadcast %cst_15 : f32 to vector<1x128xf32>
      %21 = arith.mulf %17, %20 : vector<1x128xf32>
      %22 = arith.mulf %19, %19 : vector<1x128xf32>
      %23 = arith.subf %21, %22 : vector<1x128xf32>
      %c0_16 = arith.constant 0 : index
      %c0_17 = arith.constant 0 : index
      %24 = vector.load %arg5[%c0_16, %c0_17] : memref<1x128xf32, #tpu.memory_space<vmem>>, vector<1x128xf32>
      %cst_18 = arith.constant 9.99999974E-6 : f32
      %25 = vector.broadcast %cst_18 : f32 to vector<1x128xf32>
      %26 = arith.addf %23, %25 : vector<1x128xf32>
      %27 = math.rsqrt %26 : vector<1x128xf32>
      %28 = arith.mulf %24, %27 : vector<1x128xf32>
      %29 = vector.broadcast %19 : vector<1x128xf32> to vector<8x128xf32>
      %30 = arith.subf %12, %29 : vector<8x128xf32>
      %31 = vector.broadcast %28 : vector<1x128xf32> to vector<8x128xf32>
      %32 = arith.mulf %30, %31 : vector<8x128xf32>
      %c0_19 = arith.constant 0 : index
      %c0_20 = arith.constant 0 : index
      %33 = vector.load %arg6[%c0_19, %c0_20] : memref<1x128xf32, #tpu.memory_space<vmem>>, vector<1x128xf32>
      %34 = vector.broadcast %33 : vector<1x128xf32> to vector<8x128xf32>
      %35 = arith.addf %32, %34 : vector<8x128xf32>
      %cst_21 = arith.constant 0.000000e+00 : f32
      %36 = vector.broadcast %cst_21 : f32 to vector<8x128xf32>
      %37 = arith.maximumf %35, %36 : vector<8x128xf32>
      %c0_22 = arith.constant 0 : index
      %c0_23 = arith.constant 0 : index
      %38 = vector.load %arg7[%c0_22, %c0_23] : memref<8x128xf32, #tpu.memory_space<vmem>>, vector<8x128xf32>
      tpu.vector_store %arg7[%c0_22, %c0_23], %37 {strides = array<i32>} : memref<8x128xf32, #tpu.memory_space<vmem>>, vector<8x128xf32>,
    } else {
    }
    return
  }
  func.func @transform_0(%arg0: i32, %arg1: i32, %arg2: i32) -> (i32, i32) {
    %c0_i32 = arith.constant 0 : i32
    return %arg0, %arg2 : i32, i32
  }
  func.func @transform_1(%arg0: i32, %arg1: i32, %arg2: i32) -> (i32, i32) {
    %c0_i32 = arith.constant 0 : i32
    return %arg2, %arg1 : i32, i32
  }
  func.func @transform_2(%arg0: i32, %arg1: i32, %arg2: i32) -> (i32, i32) {
    %c0_i32 = arith.constant 0 : i32
    %c0_i32_0 = arith.constant 0 : i32
    return %c0_i32, %arg1 : i32, i32
  }
  func.func @transform_3(%arg0: i32, %arg1: i32, %arg2: i32) -> (i32, i32) {
    %c0_i32 = arith.constant 0 : i32
    %c0_i32_0 = arith.constant 0 : i32
    return %c0_i32, %arg1 : i32, i32
  }
  func.func @transform_4(%arg0: i32, %arg1: i32, %arg2: i32) -> (i32, i32) {
    %c0_i32 = arith.constant 0 : i32
    return %arg0, %arg1 : i32, i32
  }
}

module attributes {stable_mosaic.version = 11 : i64} {
  func.func @_mm_bn_kernel(%arg0: i32, %arg1: i32, %arg2: i32, %arg3: memref<8x128xbf16, #tpu.memory_space<vmem>>, %arg4: memref<128x128xbf16, #tpu.memory_space<vmem>>, %arg5: memref<1x128xf32, #tpu.memory_space<vmem>>, %arg6: memref<1x128xf32, #tpu.memory_space<vmem>>, %arg7: memref<8x128xf32, #tpu.memory_space<vmem>>, %arg8: memref<8x128xf32, #tpu.memory_space<vmem>>) attributes {dimension_semantics = [#tpu.dimension_semantics<parallel>, #tpu.dimension_semantics<parallel>, #tpu.dimension_semantics<arbitrary>], iteration_bounds = array<i64: 1, 1, 1>, scalar_prefetch = 0 : i64, scratch_operands = 1 : i64, tpu.core_type = #tpu.core_type<tc>, window_params = [{transform_indices = @transform_0, window_bounds = array<i64: 8, 128>}, {transform_indices = @transform_1, window_bounds = array<i64: 128, 128>}, {transform_indices = @transform_2, window_bounds = array<i64: 1, 128>}, {transform_indices = @transform_3, window_bounds = array<i64: 1, 128>}, {transform_indices = @transform_4, window_bounds = array<i64: 8, 128>}]} {
    %c0_i32 = arith.constant 0 : i32
    %0 = arith.cmpi eq, %arg2, %c0_i32 : i32
    %1 = arith.extui %0 : i1 to i32
    %c0_i32_0 = arith.constant 0 : i32
    %2 = arith.cmpi ne, %1, %c0_i32_0 : i32
    scf.if %2 {
      %cst_10 = arith.constant 0.000000e+00 : f32
      %12 = vector.broadcast %cst_10 : f32 to vector<8x128xf32>
      %c0_11 = arith.constant 0 : index
      %c0_12 = arith.constant 0 : index
      %13 = vector.load %arg8[%c0_11, %c0_12] : memref<8x128xf32, #tpu.memory_space<vmem>>, vector<8x128xf32>
      tpu.vector_store %arg8[%c0_11, %c0_12], %12 {strides = array<i32>} : memref<8x128xf32, #tpu.memory_space<vmem>>, vector<8x128xf32>,
    } else {
    }
    %c0 = arith.constant 0 : index
    %c0_1 = arith.constant 0 : index
    %3 = vector.load %arg8[%c0, %c0_1] : memref<8x128xf32, #tpu.memory_space<vmem>>, vector<8x128xf32>
    %c0_2 = arith.constant 0 : index
    %c0_3 = arith.constant 0 : index
    %4 = vector.load %arg3[%c0_2, %c0_3] : memref<8x128xbf16, #tpu.memory_space<vmem>>, vector<8x128xbf16>
    %c0_4 = arith.constant 0 : index
    %c0_5 = arith.constant 0 : index
    %5 = vector.load %arg4[%c0_4, %c0_5] : memref<128x128xbf16, #tpu.memory_space<vmem>>, vector<128x128xbf16>
    %cst = arith.constant dense<0.000000e+00> : vector<8x128xf32>
    %6 = tpu.matmul %4, %5, %cst {dimension_numbers = #tpu.dot_dimension_numbers<[1], [0], [0], [1], [0, 0, 1, 1], [], []>} : vector<8x128xbf16>, vector<128x128xbf16>, vector<8x128xf32> -> vector<8x128xf32>
    %7 = arith.addf %3, %6 : vector<8x128xf32>
    %c0_6 = arith.constant 0 : index
    %c0_7 = arith.constant 0 : index
    %8 = vector.load %arg8[%c0_6, %c0_7] : memref<8x128xf32, #tpu.memory_space<vmem>>, vector<8x128xf32>
    tpu.vector_store %arg8[%c0_6, %c0_7], %7 {strides = array<i32>} : memref<8x128xf32, #tpu.memory_space<vmem>>, vector<8x128xf32>,
    %c0_i32_8 = arith.constant 0 : i32
    %9 = arith.cmpi eq, %arg2, %c0_i32_8 : i32
    %10 = arith.extui %9 : i1 to i32
    %c0_i32_9 = arith.constant 0 : i32
    %11 = arith.cmpi ne, %10, %c0_i32_9 : i32
    scf.if %11 {
      %c0_10 = arith.constant 0 : index
      %c0_11 = arith.constant 0 : index
      %12 = vector.load %arg8[%c0_10, %c0_11] : memref<8x128xf32, #tpu.memory_space<vmem>>, vector<8x128xf32>
      %cst_12 = arith.constant dense<0.000000e+00> : vector<128xf32>
      %13 = vector.multi_reduction <add>, %12, %cst_12 [0] : vector<8x128xf32> to vector<128xf32>
      %14 = vector.shape_cast %13 : vector<128xf32> to vector<1x128xf32>
      %15 = arith.mulf %12, %12 : vector<8x128xf32>
      %cst_13 = arith.constant dense<0.000000e+00> : vector<128xf32>
      %16 = vector.multi_reduction <add>, %15, %cst_13 [0] : vector<8x128xf32> to vector<128xf32>
      %17 = vector.shape_cast %16 : vector<128xf32> to vector<1x128xf32>
      %cst_14 = arith.constant 1.250000e-01 : f32
      %18 = vector.broadcast %cst_14 : f32 to vector<1x128xf32>
      %19 = arith.mulf %14, %18 : vector<1x128xf32>
      %cst_15 = arith.constant 1.250000e-01 : f32
      %20 = vector.broadcast %cst_15 : f32 to vector<1x128xf32>
      %21 = arith.mulf %17, %20 : vector<1x128xf32>
      %22 = arith.mulf %19, %19 : vector<1x128xf32>
      %23 = arith.subf %21, %22 : vector<1x128xf32>
      %c0_16 = arith.constant 0 : index
      %c0_17 = arith.constant 0 : index
      %24 = vector.load %arg5[%c0_16, %c0_17] : memref<1x128xf32, #tpu.memory_space<vmem>>, vector<1x128xf32>
      %cst_18 = arith.constant 9.99999974E-6 : f32
      %25 = vector.broadcast %cst_18 : f32 to vector<1x128xf32>
      %26 = arith.addf %23, %25 : vector<1x128xf32>
      %27 = math.rsqrt %26 : vector<1x128xf32>
      %28 = arith.mulf %24, %27 : vector<1x128xf32>
      %29 = vector.broadcast %19 : vector<1x128xf32> to vector<8x128xf32>
      %30 = arith.subf %12, %29 : vector<8x128xf32>
      %31 = vector.broadcast %28 : vector<1x128xf32> to vector<8x128xf32>
      %32 = arith.mulf %30, %31 : vector<8x128xf32>
      %c0_19 = arith.constant 0 : index
      %c0_20 = arith.constant 0 : index
      %33 = vector.load %arg6[%c0_19, %c0_20] : memref<1x128xf32, #tpu.memory_space<vmem>>, vector<1x128xf32>
      %34 = vector.broadcast %33 : vector<1x128xf32> to vector<8x128xf32>
      %35 = arith.addf %32, %34 : vector<8x128xf32>
      %c0_21 = arith.constant 0 : index
      %c0_22 = arith.constant 0 : index
      %36 = vector.load %arg7[%c0_21, %c0_22] : memref<8x128xf32, #tpu.memory_space<vmem>>, vector<8x128xf32>
      tpu.vector_store %arg7[%c0_21, %c0_22], %35 {strides = array<i32>} : memref<8x128xf32, #tpu.memory_space<vmem>>, vector<8x128xf32>,
    } else {
    }
    return
  }
  func.func @transform_0(%arg0: i32, %arg1: i32, %arg2: i32) -> (i32, i32) {
    %c0_i32 = arith.constant 0 : i32
    return %arg0, %arg2 : i32, i32
  }
  func.func @transform_1(%arg0: i32, %arg1: i32, %arg2: i32) -> (i32, i32) {
    %c0_i32 = arith.constant 0 : i32
    return %arg2, %arg1 : i32, i32
  }
  func.func @transform_2(%arg0: i32, %arg1: i32, %arg2: i32) -> (i32, i32) {
    %c0_i32 = arith.constant 0 : i32
    %c0_i32_0 = arith.constant 0 : i32
    return %c0_i32, %arg1 : i32, i32
  }
  func.func @transform_3(%arg0: i32, %arg1: i32, %arg2: i32) -> (i32, i32) {
    %c0_i32 = arith.constant 0 : i32
    %c0_i32_0 = arith.constant 0 : i32
    return %c0_i32, %arg1 : i32, i32
  }
  func.func @transform_4(%arg0: i32, %arg1: i32, %arg2: i32) -> (i32, i32) {
    %c0_i32 = arith.constant 0 : i32
    return %arg0, %arg1 : i32, i32
  }
}

module attributes {stable_mosaic.version = 11 : i64} {
  func.func @_mm_bn_add_relu_kernel(%arg0: i32, %arg1: i32, %arg2: i32, %arg3: memref<8x384xbf16, #tpu.memory_space<vmem>>, %arg4: memref<384x128xbf16, #tpu.memory_space<vmem>>, %arg5: memref<1x128xf32, #tpu.memory_space<vmem>>, %arg6: memref<1x128xf32, #tpu.memory_space<vmem>>, %arg7: memref<8x128xf32, #tpu.memory_space<vmem>>, %arg8: memref<8x128xf32, #tpu.memory_space<vmem>>, %arg9: memref<8x128xf32, #tpu.memory_space<vmem>>) attributes {dimension_semantics = [#tpu.dimension_semantics<parallel>, #tpu.dimension_semantics<parallel>, #tpu.dimension_semantics<arbitrary>], iteration_bounds = array<i64: 1, 1, 3>, scalar_prefetch = 0 : i64, scratch_operands = 1 : i64, tpu.core_type = #tpu.core_type<tc>, window_params = [{transform_indices = @transform_0, window_bounds = array<i64: 8, 384>}, {transform_indices = @transform_1, window_bounds = array<i64: 384, 128>}, {transform_indices = @transform_2, window_bounds = array<i64: 1, 128>}, {transform_indices = @transform_3, window_bounds = array<i64: 1, 128>}, {transform_indices = @transform_4, window_bounds = array<i64: 8, 128>}, {transform_indices = @transform_5, window_bounds = array<i64: 8, 128>}]} {
    %c0_i32 = arith.constant 0 : i32
    %0 = arith.cmpi eq, %arg2, %c0_i32 : i32
    %1 = arith.extui %0 : i1 to i32
    %c0_i32_0 = arith.constant 0 : i32
    %2 = arith.cmpi ne, %1, %c0_i32_0 : i32
    scf.if %2 {
      %cst_9 = arith.constant 0.000000e+00 : f32
      %12 = vector.broadcast %cst_9 : f32 to vector<8x128xf32>
      %c0_10 = arith.constant 0 : index
      %c0_11 = arith.constant 0 : index
      %13 = vector.load %arg9[%c0_10, %c0_11] : memref<8x128xf32, #tpu.memory_space<vmem>>, vector<8x128xf32>
      tpu.vector_store %arg9[%c0_10, %c0_11], %12 {strides = array<i32>} : memref<8x128xf32, #tpu.memory_space<vmem>>, vector<8x128xf32>,
    } else {
    }
    %c0 = arith.constant 0 : index
    %c0_1 = arith.constant 0 : index
    %3 = vector.load %arg9[%c0, %c0_1] : memref<8x128xf32, #tpu.memory_space<vmem>>, vector<8x128xf32>
    %c0_2 = arith.constant 0 : index
    %c0_3 = arith.constant 0 : index
    %4 = vector.load %arg3[%c0_2, %c0_3] : memref<8x384xbf16, #tpu.memory_space<vmem>>, vector<8x384xbf16>
    %c0_4 = arith.constant 0 : index
    %c0_5 = arith.constant 0 : index
    %5 = vector.load %arg4[%c0_4, %c0_5] : memref<384x128xbf16, #tpu.memory_space<vmem>>, vector<384x128xbf16>
    %cst = arith.constant dense<0.000000e+00> : vector<8x128xf32>
    %6 = tpu.matmul %4, %5, %cst {dimension_numbers = #tpu.dot_dimension_numbers<[1], [0], [0], [1], [0, 0, 1, 1], [], []>} : vector<8x384xbf16>, vector<384x128xbf16>, vector<8x128xf32> -> vector<8x128xf32>
    %7 = arith.addf %3, %6 : vector<8x128xf32>
    %c0_6 = arith.constant 0 : index
    %c0_7 = arith.constant 0 : index
    %8 = vector.load %arg9[%c0_6, %c0_7] : memref<8x128xf32, #tpu.memory_space<vmem>>, vector<8x128xf32>
    tpu.vector_store %arg9[%c0_6, %c0_7], %7 {strides = array<i32>} : memref<8x128xf32, #tpu.memory_space<vmem>>, vector<8x128xf32>,
    %c2_i32 = arith.constant 2 : i32
    %9 = arith.cmpi eq, %arg2, %c2_i32 : i32
    %10 = arith.extui %9 : i1 to i32
    %c0_i32_8 = arith.constant 0 : i32
    %11 = arith.cmpi ne, %10, %c0_i32_8 : i32
    scf.if %11 {
      %c0_9 = arith.constant 0 : index
      %c0_10 = arith.constant 0 : index
      %12 = vector.load %arg9[%c0_9, %c0_10] : memref<8x128xf32, #tpu.memory_space<vmem>>, vector<8x128xf32>
      %cst_11 = arith.constant dense<0.000000e+00> : vector<128xf32>
      %13 = vector.multi_reduction <add>, %12, %cst_11 [0] : vector<8x128xf32> to vector<128xf32>
      %14 = vector.shape_cast %13 : vector<128xf32> to vector<1x128xf32>
      %15 = arith.mulf %12, %12 : vector<8x128xf32>
      %cst_12 = arith.constant dense<0.000000e+00> : vector<128xf32>
      %16 = vector.multi_reduction <add>, %15, %cst_12 [0] : vector<8x128xf32> to vector<128xf32>
      %17 = vector.shape_cast %16 : vector<128xf32> to vector<1x128xf32>
      %cst_13 = arith.constant 1.250000e-01 : f32
      %18 = vector.broadcast %cst_13 : f32 to vector<1x128xf32>
      %19 = arith.mulf %14, %18 : vector<1x128xf32>
      %cst_14 = arith.constant 1.250000e-01 : f32
      %20 = vector.broadcast %cst_14 : f32 to vector<1x128xf32>
      %21 = arith.mulf %17, %20 : vector<1x128xf32>
      %22 = arith.mulf %19, %19 : vector<1x128xf32>
      %23 = arith.subf %21, %22 : vector<1x128xf32>
      %c0_15 = arith.constant 0 : index
      %c0_16 = arith.constant 0 : index
      %24 = vector.load %arg5[%c0_15, %c0_16] : memref<1x128xf32, #tpu.memory_space<vmem>>, vector<1x128xf32>
      %cst_17 = arith.constant 9.99999974E-6 : f32
      %25 = vector.broadcast %cst_17 : f32 to vector<1x128xf32>
      %26 = arith.addf %23, %25 : vector<1x128xf32>
      %27 = math.rsqrt %26 : vector<1x128xf32>
      %28 = arith.mulf %24, %27 : vector<1x128xf32>
      %29 = vector.broadcast %19 : vector<1x128xf32> to vector<8x128xf32>
      %30 = arith.subf %12, %29 : vector<8x128xf32>
      %31 = vector.broadcast %28 : vector<1x128xf32> to vector<8x128xf32>
      %32 = arith.mulf %30, %31 : vector<8x128xf32>
      %c0_18 = arith.constant 0 : index
      %c0_19 = arith.constant 0 : index
      %33 = vector.load %arg6[%c0_18, %c0_19] : memref<1x128xf32, #tpu.memory_space<vmem>>, vector<1x128xf32>
      %34 = vector.broadcast %33 : vector<1x128xf32> to vector<8x128xf32>
      %35 = arith.addf %32, %34 : vector<8x128xf32>
      %c0_20 = arith.constant 0 : index
      %c0_21 = arith.constant 0 : index
      %36 = vector.load %arg7[%c0_20, %c0_21] : memref<8x128xf32, #tpu.memory_space<vmem>>, vector<8x128xf32>
      %37 = arith.addf %35, %36 : vector<8x128xf32>
      %cst_22 = arith.constant 0.000000e+00 : f32
      %38 = vector.broadcast %cst_22 : f32 to vector<8x128xf32>
      %39 = arith.maximumf %37, %38 : vector<8x128xf32>
      %c0_23 = arith.constant 0 : index
      %c0_24 = arith.constant 0 : index
      %40 = vector.load %arg8[%c0_23, %c0_24] : memref<8x128xf32, #tpu.memory_space<vmem>>, vector<8x128xf32>
      tpu.vector_store %arg8[%c0_23, %c0_24], %39 {strides = array<i32>} : memref<8x128xf32, #tpu.memory_space<vmem>>, vector<8x128xf32>,
    } else {
    }
    return
  }
  func.func @transform_0(%arg0: i32, %arg1: i32, %arg2: i32) -> (i32, i32) {
    %c0_i32 = arith.constant 0 : i32
    return %arg0, %arg2 : i32, i32
  }
  func.func @transform_1(%arg0: i32, %arg1: i32, %arg2: i32) -> (i32, i32) {
    %c0_i32 = arith.constant 0 : i32
    return %arg2, %arg1 : i32, i32
  }
  func.func @transform_2(%arg0: i32, %arg1: i32, %arg2: i32) -> (i32, i32) {
    %c0_i32 = arith.constant 0 : i32
    %c0_i32_0 = arith.constant 0 : i32
    return %c0_i32, %arg1 : i32, i32
  }
  func.func @transform_3(%arg0: i32, %arg1: i32, %arg2: i32) -> (i32, i32) {
    %c0_i32 = arith.constant 0 : i32
    %c0_i32_0 = arith.constant 0 : i32
    return %c0_i32, %arg1 : i32, i32
  }
  func.func @transform_4(%arg0: i32, %arg1: i32, %arg2: i32) -> (i32, i32) {
    %c0_i32 = arith.constant 0 : i32
    return %arg0, %arg1 : i32, i32
  }
  func.func @transform_5(%arg0: i32, %arg1: i32, %arg2: i32) -> (i32, i32) {
    %c0_i32 = arith.constant 0 : i32
    return %arg0, %arg1 : i32, i32
  }
}

module attributes {stable_mosaic.version = 11 : i64} {
  func.func @_mm_bn_kernel(%arg0: i32, %arg1: i32, %arg2: i32, %arg3: memref<8x384xbf16, #tpu.memory_space<vmem>>, %arg4: memref<384x128xbf16, #tpu.memory_space<vmem>>, %arg5: memref<1x128xf32, #tpu.memory_space<vmem>>, %arg6: memref<1x128xf32, #tpu.memory_space<vmem>>, %arg7: memref<8x128xf32, #tpu.memory_space<vmem>>, %arg8: memref<8x128xf32, #tpu.memory_space<vmem>>) attributes {dimension_semantics = [#tpu.dimension_semantics<parallel>, #tpu.dimension_semantics<parallel>, #tpu.dimension_semantics<arbitrary>], iteration_bounds = array<i64: 1, 1, 3>, scalar_prefetch = 0 : i64, scratch_operands = 1 : i64, tpu.core_type = #tpu.core_type<tc>, window_params = [{transform_indices = @transform_0, window_bounds = array<i64: 8, 384>}, {transform_indices = @transform_1, window_bounds = array<i64: 384, 128>}, {transform_indices = @transform_2, window_bounds = array<i64: 1, 128>}, {transform_indices = @transform_3, window_bounds = array<i64: 1, 128>}, {transform_indices = @transform_4, window_bounds = array<i64: 8, 128>}]} {
    %c0_i32 = arith.constant 0 : i32
    %0 = arith.cmpi eq, %arg2, %c0_i32 : i32
    %1 = arith.extui %0 : i1 to i32
    %c0_i32_0 = arith.constant 0 : i32
    %2 = arith.cmpi ne, %1, %c0_i32_0 : i32
    scf.if %2 {
      %cst_9 = arith.constant 0.000000e+00 : f32
      %12 = vector.broadcast %cst_9 : f32 to vector<8x128xf32>
      %c0_10 = arith.constant 0 : index
      %c0_11 = arith.constant 0 : index
      %13 = vector.load %arg8[%c0_10, %c0_11] : memref<8x128xf32, #tpu.memory_space<vmem>>, vector<8x128xf32>
      tpu.vector_store %arg8[%c0_10, %c0_11], %12 {strides = array<i32>} : memref<8x128xf32, #tpu.memory_space<vmem>>, vector<8x128xf32>,
    } else {
    }
    %c0 = arith.constant 0 : index
    %c0_1 = arith.constant 0 : index
    %3 = vector.load %arg8[%c0, %c0_1] : memref<8x128xf32, #tpu.memory_space<vmem>>, vector<8x128xf32>
    %c0_2 = arith.constant 0 : index
    %c0_3 = arith.constant 0 : index
    %4 = vector.load %arg3[%c0_2, %c0_3] : memref<8x384xbf16, #tpu.memory_space<vmem>>, vector<8x384xbf16>
    %c0_4 = arith.constant 0 : index
    %c0_5 = arith.constant 0 : index
    %5 = vector.load %arg4[%c0_4, %c0_5] : memref<384x128xbf16, #tpu.memory_space<vmem>>, vector<384x128xbf16>
    %cst = arith.constant dense<0.000000e+00> : vector<8x128xf32>
    %6 = tpu.matmul %4, %5, %cst {dimension_numbers = #tpu.dot_dimension_numbers<[1], [0], [0], [1], [0, 0, 1, 1], [], []>} : vector<8x384xbf16>, vector<384x128xbf16>, vector<8x128xf32> -> vector<8x128xf32>
    %7 = arith.addf %3, %6 : vector<8x128xf32>
    %c0_6 = arith.constant 0 : index
    %c0_7 = arith.constant 0 : index
    %8 = vector.load %arg8[%c0_6, %c0_7] : memref<8x128xf32, #tpu.memory_space<vmem>>, vector<8x128xf32>
    tpu.vector_store %arg8[%c0_6, %c0_7], %7 {strides = array<i32>} : memref<8x128xf32, #tpu.memory_space<vmem>>, vector<8x128xf32>,
    %c2_i32 = arith.constant 2 : i32
    %9 = arith.cmpi eq, %arg2, %c2_i32 : i32
    %10 = arith.extui %9 : i1 to i32
    %c0_i32_8 = arith.constant 0 : i32
    %11 = arith.cmpi ne, %10, %c0_i32_8 : i32
    scf.if %11 {
      %c0_9 = arith.constant 0 : index
      %c0_10 = arith.constant 0 : index
      %12 = vector.load %arg8[%c0_9, %c0_10] : memref<8x128xf32, #tpu.memory_space<vmem>>, vector<8x128xf32>
      %cst_11 = arith.constant dense<0.000000e+00> : vector<128xf32>
      %13 = vector.multi_reduction <add>, %12, %cst_11 [0] : vector<8x128xf32> to vector<128xf32>
      %14 = vector.shape_cast %13 : vector<128xf32> to vector<1x128xf32>
      %15 = arith.mulf %12, %12 : vector<8x128xf32>
      %cst_12 = arith.constant dense<0.000000e+00> : vector<128xf32>
      %16 = vector.multi_reduction <add>, %15, %cst_12 [0] : vector<8x128xf32> to vector<128xf32>
      %17 = vector.shape_cast %16 : vector<128xf32> to vector<1x128xf32>
      %cst_13 = arith.constant 1.250000e-01 : f32
      %18 = vector.broadcast %cst_13 : f32 to vector<1x128xf32>
      %19 = arith.mulf %14, %18 : vector<1x128xf32>
      %cst_14 = arith.constant 1.250000e-01 : f32
      %20 = vector.broadcast %cst_14 : f32 to vector<1x128xf32>
      %21 = arith.mulf %17, %20 : vector<1x128xf32>
      %22 = arith.mulf %19, %19 : vector<1x128xf32>
      %23 = arith.subf %21, %22 : vector<1x128xf32>
      %c0_15 = arith.constant 0 : index
      %c0_16 = arith.constant 0 : index
      %24 = vector.load %arg5[%c0_15, %c0_16] : memref<1x128xf32, #tpu.memory_space<vmem>>, vector<1x128xf32>
      %cst_17 = arith.constant 9.99999974E-6 : f32
      %25 = vector.broadcast %cst_17 : f32 to vector<1x128xf32>
      %26 = arith.addf %23, %25 : vector<1x128xf32>
      %27 = math.rsqrt %26 : vector<1x128xf32>
      %28 = arith.mulf %24, %27 : vector<1x128xf32>
      %29 = vector.broadcast %19 : vector<1x128xf32> to vector<8x128xf32>
      %30 = arith.subf %12, %29 : vector<8x128xf32>
      %31 = vector.broadcast %28 : vector<1x128xf32> to vector<8x128xf32>
      %32 = arith.mulf %30, %31 : vector<8x128xf32>
      %c0_18 = arith.constant 0 : index
      %c0_19 = arith.constant 0 : index
      %33 = vector.load %arg6[%c0_18, %c0_19] : memref<1x128xf32, #tpu.memory_space<vmem>>, vector<1x128xf32>
      %34 = vector.broadcast %33 : vector<1x128xf32> to vector<8x128xf32>
      %35 = arith.addf %32, %34 : vector<8x128xf32>
      %cst_20 = arith.constant 0.000000e+00 : f32
      %36 = vector.broadcast %cst_20 : f32 to vector<8x128xf32>
      %37 = arith.maximumf %35, %36 : vector<8x128xf32>
      %c0_21 = arith.constant 0 : index
      %c0_22 = arith.constant 0 : index
      %38 = vector.load %arg7[%c0_21, %c0_22] : memref<8x128xf32, #tpu.memory_space<vmem>>, vector<8x128xf32>
      tpu.vector_store %arg7[%c0_21, %c0_22], %37 {strides = array<i32>} : memref<8x128xf32, #tpu.memory_space<vmem>>, vector<8x128xf32>,
    } else {
    }
    return
  }
  func.func @transform_0(%arg0: i32, %arg1: i32, %arg2: i32) -> (i32, i32) {
    %c0_i32 = arith.constant 0 : i32
    return %arg0, %arg2 : i32, i32
  }
  func.func @transform_1(%arg0: i32, %arg1: i32, %arg2: i32) -> (i32, i32) {
    %c0_i32 = arith.constant 0 : i32
    return %arg2, %arg1 : i32, i32
  }
  func.func @transform_2(%arg0: i32, %arg1: i32, %arg2: i32) -> (i32, i32) {
    %c0_i32 = arith.constant 0 : i32
    %c0_i32_0 = arith.constant 0 : i32
    return %c0_i32, %arg1 : i32, i32
  }
  func.func @transform_3(%arg0: i32, %arg1: i32, %arg2: i32) -> (i32, i32) {
    %c0_i32 = arith.constant 0 : i32
    %c0_i32_0 = arith.constant 0 : i32
    return %c0_i32, %arg1 : i32, i32
  }
  func.func @transform_4(%arg0: i32, %arg1: i32, %arg2: i32) -> (i32, i32) {
    %c0_i32 = arith.constant 0 : i32
    return %arg0, %arg1 : i32, i32
  }
}

module attributes {stable_mosaic.version = 11 : i64} {
  func.func @_mm_bias_kernel(%arg0: i32, %arg1: i32, %arg2: i32, %arg3: memref<8x128xbf16, #tpu.memory_space<vmem>>, %arg4: memref<128x128xbf16, #tpu.memory_space<vmem>>, %arg5: memref<1x128xf32, #tpu.memory_space<vmem>>, %arg6: memref<8x128xf32, #tpu.memory_space<vmem>>, %arg7: memref<8x128xf32, #tpu.memory_space<vmem>>) attributes {dimension_semantics = [#tpu.dimension_semantics<parallel>, #tpu.dimension_semantics<parallel>, #tpu.dimension_semantics<arbitrary>], iteration_bounds = array<i64: 1, 1, 1>, scalar_prefetch = 0 : i64, scratch_operands = 1 : i64, tpu.core_type = #tpu.core_type<tc>, window_params = [{transform_indices = @transform_0, window_bounds = array<i64: 8, 128>}, {transform_indices = @transform_1, window_bounds = array<i64: 128, 128>}, {transform_indices = @transform_2, window_bounds = array<i64: 1, 128>}, {transform_indices = @transform_3, window_bounds = array<i64: 8, 128>}]} {
    %c0_i32 = arith.constant 0 : i32
    %0 = arith.cmpi eq, %arg2, %c0_i32 : i32
    %1 = arith.extui %0 : i1 to i32
    %c0_i32_0 = arith.constant 0 : i32
    %2 = arith.cmpi ne, %1, %c0_i32_0 : i32
    scf.if %2 {
      %cst_10 = arith.constant 0.000000e+00 : f32
      %12 = vector.broadcast %cst_10 : f32 to vector<8x128xf32>
      %c0_11 = arith.constant 0 : index
      %c0_12 = arith.constant 0 : index
      %13 = vector.load %arg7[%c0_11, %c0_12] : memref<8x128xf32, #tpu.memory_space<vmem>>, vector<8x128xf32>
      tpu.vector_store %arg7[%c0_11, %c0_12], %12 {strides = array<i32>} : memref<8x128xf32, #tpu.memory_space<vmem>>, vector<8x128xf32>,
    } else {
    }
    %c0 = arith.constant 0 : index
    %c0_1 = arith.constant 0 : index
    %3 = vector.load %arg7[%c0, %c0_1] : memref<8x128xf32, #tpu.memory_space<vmem>>, vector<8x128xf32>
    %c0_2 = arith.constant 0 : index
    %c0_3 = arith.constant 0 : index
    %4 = vector.load %arg3[%c0_2, %c0_3] : memref<8x128xbf16, #tpu.memory_space<vmem>>, vector<8x128xbf16>
    %c0_4 = arith.constant 0 : index
    %c0_5 = arith.constant 0 : index
    %5 = vector.load %arg4[%c0_4, %c0_5] : memref<128x128xbf16, #tpu.memory_space<vmem>>, vector<128x128xbf16>
    %cst = arith.constant dense<0.000000e+00> : vector<8x128xf32>
    %6 = tpu.matmul %4, %5, %cst {dimension_numbers = #tpu.dot_dimension_numbers<[1], [0], [0], [1], [0, 0, 1, 1], [], []>} : vector<8x128xbf16>, vector<128x128xbf16>, vector<8x128xf32> -> vector<8x128xf32>
    %7 = arith.addf %3, %6 : vector<8x128xf32>
    %c0_6 = arith.constant 0 : index
    %c0_7 = arith.constant 0 : index
    %8 = vector.load %arg7[%c0_6, %c0_7] : memref<8x128xf32, #tpu.memory_space<vmem>>, vector<8x128xf32>
    tpu.vector_store %arg7[%c0_6, %c0_7], %7 {strides = array<i32>} : memref<8x128xf32, #tpu.memory_space<vmem>>, vector<8x128xf32>,
    %c0_i32_8 = arith.constant 0 : i32
    %9 = arith.cmpi eq, %arg2, %c0_i32_8 : i32
    %10 = arith.extui %9 : i1 to i32
    %c0_i32_9 = arith.constant 0 : i32
    %11 = arith.cmpi ne, %10, %c0_i32_9 : i32
    scf.if %11 {
      %c0_10 = arith.constant 0 : index
      %c0_11 = arith.constant 0 : index
      %12 = vector.load %arg7[%c0_10, %c0_11] : memref<8x128xf32, #tpu.memory_space<vmem>>, vector<8x128xf32>
      %c0_12 = arith.constant 0 : index
      %c0_13 = arith.constant 0 : index
      %13 = vector.load %arg5[%c0_12, %c0_13] : memref<1x128xf32, #tpu.memory_space<vmem>>, vector<1x128xf32>
      %14 = vector.broadcast %13 : vector<1x128xf32> to vector<8x128xf32>
      %15 = arith.addf %12, %14 : vector<8x128xf32>
      %c0_14 = arith.constant 0 : index
      %c0_15 = arith.constant 0 : index
      %16 = vector.load %arg6[%c0_14, %c0_15] : memref<8x128xf32, #tpu.memory_space<vmem>>, vector<8x128xf32>
      tpu.vector_store %arg6[%c0_14, %c0_15], %15 {strides = array<i32>} : memref<8x128xf32, #tpu.memory_space<vmem>>, vector<8x128xf32>,
    } else {
    }
    return
  }
  func.func @transform_0(%arg0: i32, %arg1: i32, %arg2: i32) -> (i32, i32) {
    %c0_i32 = arith.constant 0 : i32
    return %arg0, %arg2 : i32, i32
  }
  func.func @transform_1(%arg0: i32, %arg1: i32, %arg2: i32) -> (i32, i32) {
    %c0_i32 = arith.constant 0 : i32
    return %arg2, %arg1 : i32, i32
  }
  func.func @transform_2(%arg0: i32, %arg1: i32, %arg2: i32) -> (i32, i32) {
    %c0_i32 = arith.constant 0 : i32
    %c0_i32_0 = arith.constant 0 : i32
    return %c0_i32, %arg1 : i32, i32
  }
  func.func @transform_3(%arg0: i32, %arg1: i32, %arg2: i32) -> (i32, i32) {
    %c0_i32 = arith.constant 0 : i32
    return %arg0, %arg1 : i32, i32
  }
}

module attributes {stable_mosaic.version = 11 : i64} {
  func.func @_mm_bias_kernel(%arg0: i32, %arg1: i32, %arg2: i32, %arg3: memref<8x128xbf16, #tpu.memory_space<vmem>>, %arg4: memref<128x256xbf16, #tpu.memory_space<vmem>>, %arg5: memref<1x256xf32, #tpu.memory_space<vmem>>, %arg6: memref<8x256xf32, #tpu.memory_space<vmem>>, %arg7: memref<8x256xf32, #tpu.memory_space<vmem>>) attributes {dimension_semantics = [#tpu.dimension_semantics<parallel>, #tpu.dimension_semantics<parallel>, #tpu.dimension_semantics<arbitrary>], iteration_bounds = array<i64: 1, 1, 1>, scalar_prefetch = 0 : i64, scratch_operands = 1 : i64, tpu.core_type = #tpu.core_type<tc>, window_params = [{transform_indices = @transform_0, window_bounds = array<i64: 8, 128>}, {transform_indices = @transform_1, window_bounds = array<i64: 128, 256>}, {transform_indices = @transform_2, window_bounds = array<i64: 1, 256>}, {transform_indices = @transform_3, window_bounds = array<i64: 8, 256>}]} {
    %c0_i32 = arith.constant 0 : i32
    %0 = arith.cmpi eq, %arg2, %c0_i32 : i32
    %1 = arith.extui %0 : i1 to i32
    %c0_i32_0 = arith.constant 0 : i32
    %2 = arith.cmpi ne, %1, %c0_i32_0 : i32
    scf.if %2 {
      %cst_10 = arith.constant 0.000000e+00 : f32
      %12 = vector.broadcast %cst_10 : f32 to vector<8x256xf32>
      %c0_11 = arith.constant 0 : index
      %c0_12 = arith.constant 0 : index
      %13 = vector.load %arg7[%c0_11, %c0_12] : memref<8x256xf32, #tpu.memory_space<vmem>>, vector<8x256xf32>
      tpu.vector_store %arg7[%c0_11, %c0_12], %12 {strides = array<i32>} : memref<8x256xf32, #tpu.memory_space<vmem>>, vector<8x256xf32>,
    } else {
    }
    %c0 = arith.constant 0 : index
    %c0_1 = arith.constant 0 : index
    %3 = vector.load %arg7[%c0, %c0_1] : memref<8x256xf32, #tpu.memory_space<vmem>>, vector<8x256xf32>
    %c0_2 = arith.constant 0 : index
    %c0_3 = arith.constant 0 : index
    %4 = vector.load %arg3[%c0_2, %c0_3] : memref<8x128xbf16, #tpu.memory_space<vmem>>, vector<8x128xbf16>
    %c0_4 = arith.constant 0 : index
    %c0_5 = arith.constant 0 : index
    %5 = vector.load %arg4[%c0_4, %c0_5] : memref<128x256xbf16, #tpu.memory_space<vmem>>, vector<128x256xbf16>
    %cst = arith.constant dense<0.000000e+00> : vector<8x256xf32>
    %6 = tpu.matmul %4, %5, %cst {dimension_numbers = #tpu.dot_dimension_numbers<[1], [0], [0], [1], [0, 0, 1, 1], [], []>} : vector<8x128xbf16>, vector<128x256xbf16>, vector<8x256xf32> -> vector<8x256xf32>
    %7 = arith.addf %3, %6 : vector<8x256xf32>
    %c0_6 = arith.constant 0 : index
    %c0_7 = arith.constant 0 : index
    %8 = vector.load %arg7[%c0_6, %c0_7] : memref<8x256xf32, #tpu.memory_space<vmem>>, vector<8x256xf32>
    tpu.vector_store %arg7[%c0_6, %c0_7], %7 {strides = array<i32>} : memref<8x256xf32, #tpu.memory_space<vmem>>, vector<8x256xf32>,
    %c0_i32_8 = arith.constant 0 : i32
    %9 = arith.cmpi eq, %arg2, %c0_i32_8 : i32
    %10 = arith.extui %9 : i1 to i32
    %c0_i32_9 = arith.constant 0 : i32
    %11 = arith.cmpi ne, %10, %c0_i32_9 : i32
    scf.if %11 {
      %c0_10 = arith.constant 0 : index
      %c0_11 = arith.constant 0 : index
      %12 = vector.load %arg7[%c0_10, %c0_11] : memref<8x256xf32, #tpu.memory_space<vmem>>, vector<8x256xf32>
      %c0_12 = arith.constant 0 : index
      %c0_13 = arith.constant 0 : index
      %13 = vector.load %arg5[%c0_12, %c0_13] : memref<1x256xf32, #tpu.memory_space<vmem>>, vector<1x256xf32>
      %14 = vector.broadcast %13 : vector<1x256xf32> to vector<8x256xf32>
      %15 = arith.addf %12, %14 : vector<8x256xf32>
      %c0_14 = arith.constant 0 : index
      %c0_15 = arith.constant 0 : index
      %16 = vector.load %arg6[%c0_14, %c0_15] : memref<8x256xf32, #tpu.memory_space<vmem>>, vector<8x256xf32>
      tpu.vector_store %arg6[%c0_14, %c0_15], %15 {strides = array<i32>} : memref<8x256xf32, #tpu.memory_space<vmem>>, vector<8x256xf32>,
    } else {
    }
    return
  }
  func.func @transform_0(%arg0: i32, %arg1: i32, %arg2: i32) -> (i32, i32) {
    %c0_i32 = arith.constant 0 : i32
    return %arg0, %arg2 : i32, i32
  }
  func.func @transform_1(%arg0: i32, %arg1: i32, %arg2: i32) -> (i32, i32) {
    %c0_i32 = arith.constant 0 : i32
    return %arg2, %arg1 : i32, i32
  }
  func.func @transform_2(%arg0: i32, %arg1: i32, %arg2: i32) -> (i32, i32) {
    %c0_i32 = arith.constant 0 : i32
    %c0_i32_0 = arith.constant 0 : i32
    return %c0_i32, %arg1 : i32, i32
  }
  func.func @transform_3(%arg0: i32, %arg1: i32, %arg2: i32) -> (i32, i32) {
    %c0_i32 = arith.constant 0 : i32
    return %arg0, %arg1 : i32, i32
  }
}

module attributes {stable_mosaic.version = 11 : i64} {
  func.func @_mm_bias_kernel(%arg0: i32, %arg1: i32, %arg2: i32, %arg3: memref<8x384xbf16, #tpu.memory_space<vmem>>, %arg4: memref<384x256xbf16, #tpu.memory_space<vmem>>, %arg5: memref<1x256xf32, #tpu.memory_space<vmem>>, %arg6: memref<8x256xf32, #tpu.memory_space<vmem>>, %arg7: memref<8x256xf32, #tpu.memory_space<vmem>>) attributes {dimension_semantics = [#tpu.dimension_semantics<parallel>, #tpu.dimension_semantics<parallel>, #tpu.dimension_semantics<arbitrary>], iteration_bounds = array<i64: 1, 1, 3>, scalar_prefetch = 0 : i64, scratch_operands = 1 : i64, tpu.core_type = #tpu.core_type<tc>, window_params = [{transform_indices = @transform_0, window_bounds = array<i64: 8, 384>}, {transform_indices = @transform_1, window_bounds = array<i64: 384, 256>}, {transform_indices = @transform_2, window_bounds = array<i64: 1, 256>}, {transform_indices = @transform_3, window_bounds = array<i64: 8, 256>}]} {
    %c0_i32 = arith.constant 0 : i32
    %0 = arith.cmpi eq, %arg2, %c0_i32 : i32
    %1 = arith.extui %0 : i1 to i32
    %c0_i32_0 = arith.constant 0 : i32
    %2 = arith.cmpi ne, %1, %c0_i32_0 : i32
    scf.if %2 {
      %cst_9 = arith.constant 0.000000e+00 : f32
      %12 = vector.broadcast %cst_9 : f32 to vector<8x256xf32>
      %c0_10 = arith.constant 0 : index
      %c0_11 = arith.constant 0 : index
      %13 = vector.load %arg7[%c0_10, %c0_11] : memref<8x256xf32, #tpu.memory_space<vmem>>, vector<8x256xf32>
      tpu.vector_store %arg7[%c0_10, %c0_11], %12 {strides = array<i32>} : memref<8x256xf32, #tpu.memory_space<vmem>>, vector<8x256xf32>,
    } else {
    }
    %c0 = arith.constant 0 : index
    %c0_1 = arith.constant 0 : index
    %3 = vector.load %arg7[%c0, %c0_1] : memref<8x256xf32, #tpu.memory_space<vmem>>, vector<8x256xf32>
    %c0_2 = arith.constant 0 : index
    %c0_3 = arith.constant 0 : index
    %4 = vector.load %arg3[%c0_2, %c0_3] : memref<8x384xbf16, #tpu.memory_space<vmem>>, vector<8x384xbf16>
    %c0_4 = arith.constant 0 : index
    %c0_5 = arith.constant 0 : index
    %5 = vector.load %arg4[%c0_4, %c0_5] : memref<384x256xbf16, #tpu.memory_space<vmem>>, vector<384x256xbf16>
    %cst = arith.constant dense<0.000000e+00> : vector<8x256xf32>
    %6 = tpu.matmul %4, %5, %cst {dimension_numbers = #tpu.dot_dimension_numbers<[1], [0], [0], [1], [0, 0, 1, 1], [], []>} : vector<8x384xbf16>, vector<384x256xbf16>, vector<8x256xf32> -> vector<8x256xf32>
    %7 = arith.addf %3, %6 : vector<8x256xf32>
    %c0_6 = arith.constant 0 : index
    %c0_7 = arith.constant 0 : index
    %8 = vector.load %arg7[%c0_6, %c0_7] : memref<8x256xf32, #tpu.memory_space<vmem>>, vector<8x256xf32>
    tpu.vector_store %arg7[%c0_6, %c0_7], %7 {strides = array<i32>} : memref<8x256xf32, #tpu.memory_space<vmem>>, vector<8x256xf32>,
    %c2_i32 = arith.constant 2 : i32
    %9 = arith.cmpi eq, %arg2, %c2_i32 : i32
    %10 = arith.extui %9 : i1 to i32
    %c0_i32_8 = arith.constant 0 : i32
    %11 = arith.cmpi ne, %10, %c0_i32_8 : i32
    scf.if %11 {
      %c0_9 = arith.constant 0 : index
      %c0_10 = arith.constant 0 : index
      %12 = vector.load %arg7[%c0_9, %c0_10] : memref<8x256xf32, #tpu.memory_space<vmem>>, vector<8x256xf32>
      %c0_11 = arith.constant 0 : index
      %c0_12 = arith.constant 0 : index
      %13 = vector.load %arg5[%c0_11, %c0_12] : memref<1x256xf32, #tpu.memory_space<vmem>>, vector<1x256xf32>
      %14 = vector.broadcast %13 : vector<1x256xf32> to vector<8x256xf32>
      %15 = arith.addf %12, %14 : vector<8x256xf32>
      %c0_13 = arith.constant 0 : index
      %c0_14 = arith.constant 0 : index
      %16 = vector.load %arg6[%c0_13, %c0_14] : memref<8x256xf32, #tpu.memory_space<vmem>>, vector<8x256xf32>
      tpu.vector_store %arg6[%c0_13, %c0_14], %15 {strides = array<i32>} : memref<8x256xf32, #tpu.memory_space<vmem>>, vector<8x256xf32>,
    } else {
    }
    return
  }
  func.func @transform_0(%arg0: i32, %arg1: i32, %arg2: i32) -> (i32, i32) {
    %c0_i32 = arith.constant 0 : i32
    return %arg0, %arg2 : i32, i32
  }
  func.func @transform_1(%arg0: i32, %arg1: i32, %arg2: i32) -> (i32, i32) {
    %c0_i32 = arith.constant 0 : i32
    return %arg2, %arg1 : i32, i32
  }
  func.func @transform_2(%arg0: i32, %arg1: i32, %arg2: i32) -> (i32, i32) {
    %c0_i32 = arith.constant 0 : i32
    %c0_i32_0 = arith.constant 0 : i32
    return %c0_i32, %arg1 : i32, i32
  }
  func.func @transform_3(%arg0: i32, %arg1: i32, %arg2: i32) -> (i32, i32) {
    %c0_i32 = arith.constant 0 : i32
    return %arg0, %arg1 : i32, i32
  }
}

</mosaic_0001>

<bundles_post_ra>
// kernel: fuse_model_forward.36
= control target key start
LH: loop header
LB: loop body
LE: loop exit
PB: predicated region body
PF: predicated region fallthrough
CT: control target
= control target key end

     0   :  { %s797_s1 = inlined_call_operand.vmem [shape: bf16[128,128], index: 1, kind: input, shape index: {}]   ;;  %s798_s0 = inlined_call_operand.vmem [shape: bf16[128,128], index: 0, kind: input, shape index: {}]   ;;  %s799_s3 = inlined_call_operand.vmem [shape: f32[1,128], index: 3, kind: input, shape index: {}]   ;;  %s800_s2 = inlined_call_operand.vmem [shape: f32[1,128], index: 2, kind: input, shape index: {}]   ;;  %s801_s4 = inlined_call_operand.vmem [shape: f32[128,128], index: 4, kind: output, shape index: {}]  }
   0x1   :  { %v526_v0 = vld [vmem:[%s797_s1 + $0x38] sm:$0xff]  ;;  %v525_v1 = vld [vmem:[%s797_s1 + $0x30] sm:$0xff]  ;;  %v524_v2 = vld [vmem:[%s797_s1 + $0x28] sm:$0xff] }
   0x2   :  { %181 = vmatpush.bf16.msra.mxu0 %v526_v0  ;;  %527 = vmatpush.bf16.msra.mxu1 %v526_v0  ;;  %v523_v3 = vld [vmem:[%s797_s1 + $0x20] sm:$0xff]  ;;  %v522_v4 = vld [vmem:[%s797_s1 + $0x18] sm:$0xff]  ;;  %v521_v5 = vld [vmem:[%s797_s1 + $0x10] sm:$0xff] }
   0x3   :  { %528 = vmatpush.bf16.msra.mxu2 %v526_v0  ;;  %529 = vmatpush.bf16.msra.mxu3 %v526_v0  ;;  %v520_v6 = vld [vmem:[%s797_s1 + $0x8] sm:$0xff]  ;;  %v519_v7 = vld [vmem:[%s797_s1] sm:$0xff]  ;;  %v513_v9 = vld [vmem:[%s798_s0 + $0x10] sm:$0xff] }
   0x4   :  { %v511_v8 = vld [vmem:[%s798_s0] sm:$0xff]  ;;  %v517_v11 = vld [vmem:[%s798_s0 + $0x30] sm:$0xff]  ;;  %v512_v12 = vld [vmem:[%s798_s0 + $0x8] sm:$0xff] }
   0x5   :  { %v515_v10 = vld [vmem:[%s798_s0 + $0x20] sm:$0xff]  ;;  %v514_v13 = vld [vmem:[%s798_s0 + $0x18] sm:$0xff]  ;;  %v516_v14 = vld [vmem:[%s798_s0 + $0x28] sm:$0xff] }
   0x6   :  { %182 = vmatpush.bf16.msra.mxu0 %v525_v1  ;;  %530 = vmatpush.bf16.msra.mxu1 %v525_v1  ;;  %v518_v15 = vld [vmem:[%s798_s0 + $0x38] sm:$0xff] }
   0x7   :  { %531 = vmatpush.bf16.msra.mxu2 %v525_v1  ;;  %532 = vmatpush.bf16.msra.mxu3 %v525_v1 }
   0xa   :  { %183 = vmatpush.bf16.msra.mxu0 %v524_v2  ;;  %533 = vmatpush.bf16.msra.mxu1 %v524_v2 }
   0xb   :  { %534 = vmatpush.bf16.msra.mxu2 %v524_v2  ;;  %535 = vmatpush.bf16.msra.mxu3 %v524_v2 }
   0xe   :  { %184 = vmatpush.bf16.msra.mxu0 %v523_v3  ;;  %536 = vmatpush.bf16.msra.mxu1 %v523_v3 }
   0xf   :  { %537 = vmatpush.bf16.msra.mxu2 %v523_v3  ;;  %538 = vmatpush.bf16.msra.mxu3 %v523_v3 }
  0x12   :  { %185 = vmatpush.bf16.msra.mxu0 %v522_v4  ;;  %539 = vmatpush.bf16.msra.mxu1 %v522_v4 }
  0x13   :  { %540 = vmatpush.bf16.msra.mxu2 %v522_v4  ;;  %541 = vmatpush.bf16.msra.mxu3 %v522_v4 }
  0x16   :  { %186 = vmatpush.bf16.msra.mxu0 %v521_v5  ;;  %542 = vmatpush.bf16.msra.mxu1 %v521_v5 }
  0x17   :  { %543 = vmatpush.bf16.msra.mxu2 %v521_v5  ;;  %544 = vmatpush.bf16.msra.mxu3 %v521_v5 }
  0x1a   :  { %187 = vmatpush.bf16.msra.mxu0 %v520_v6  ;;  %545 = vmatpush.bf16.msra.mxu1 %v520_v6 }
  0x1b   :  { %546 = vmatpush.bf16.msra.mxu2 %v520_v6  ;;  %547 = vmatpush.bf16.msra.mxu3 %v520_v6 }
  0x1e   :  { %188 = vmatpush.bf16.msra.mxu0 %v519_v7  ;;  %548 = vmatpush.bf16.msra.mxu1 %v519_v7 }
  0x1f   :  { %549 = vmatpush.bf16.msra.mxu2 %v519_v7  ;;  %550 = vmatpush.bf16.msra.mxu3 %v519_v7 }
  0x21   :  { %189 = vmatmul.bf16.vlgmr.msra.gmra.mxu0 %v511_v8  ;;  %199 = vmatmul.bf16.vlgmr.msra.gmra.mxu1 %v513_v9 }
  0x22   :  { %209 = vmatmul.bf16.vlgmr.msra.gmra.mxu2 %v515_v10  ;;  %219 = vmatmul.bf16.vlgmr.msra.gmra.mxu3 %v517_v11 }
  0x31   :  { %194 = vmatmul.bf16.gmra.mxu0 %v512_v12  ;;  %204 = vmatmul.bf16.gmra.mxu1 %v514_v13 }
  0x32   :  { %214 = vmatmul.bf16.gmra.mxu2 %v516_v14  ;;  %224 = vmatmul.bf16.gmra.mxu3 %v518_v15 }
  0x9e   :  { %v627_v16 = vpop.f32.mrf.mxu0  ;;  %v629_v17 = vpop.f32.mrf.mxu1 }
  0x9f   :  { %v302_v26 = vmul.f32 %v627_v16, %v627_v16  ;;  %v306_v36 = vmul.f32 %v629_v17, %v629_v17 }
  0xa5   :  { %v633_v19 = vpop.f32.mrf.mxu2  ;;  %v639_v22 = vpop.f32.mrf.mxu3 }
  0xa6   :  { %v631_v18 = vpop.f32.mrf.mxu0  ;;  %v635_v20 = vpop.f32.mrf.mxu1  ;;  %v310_v50 = vmul.f32 %v633_v19, %v633_v19  ;;  %v314_v0 = vmul.f32 %v639_v22, %v639_v22 }
  0xa7   :  { %v303_v24 = vmul.f32 %v631_v18, %v631_v18  ;;  %v281_v27 = vadd.f32 %v631_v18, %v627_v16  ;;  %v307_v40 = vmul.f32 %v635_v20, %v635_v20 }
  0xa9   :  { %v318_v29 = vadd.f32 %v303_v24, %v302_v26 }
  0xad   :  { %v641_v23 = vpop.f32.mrf.mxu2  ;;  %v659_v35 = vpop.f32.mrf.mxu3 }
  0xae   :  { %v637_v21 = vpop.f32.mrf.mxu0  ;;  %v645_v25 = vpop.f32.mrf.mxu1  ;;  %v311_v54 = vmul.f32 %v641_v23, %v641_v23  ;;  %v315_v3 = vmul.f32 %v659_v35, %v659_v35 }
  0xaf   :  { %v304_v28 = vmul.f32 %v637_v21, %v637_v21  ;;  %v282_v30 = vadd.f32 %v281_v27, %v637_v21  ;;  %v308_v44 = vmul.f32 %v645_v25, %v645_v25 }
  0xb1   :  { %v319_v32 = vadd.f32 %v318_v29, %v304_v28 }
  0xb5   :  { %v664_v39 = vpop.f32.mrf.mxu2  ;;  %v680_v53 = vpop.f32.mrf.mxu3 }
  0xb6   :  { %v654_v31 = vpop.f32.mrf.mxu0  ;;  %v669_v43 = vpop.f32.mrf.mxu1  ;;  %v312_v59 = vmul.f32 %v664_v39, %v664_v39  ;;  %v316_v8 = vmul.f32 %v680_v53, %v680_v53 }
  0xb7   :  { %v283_v33 = vadd.f32 %v282_v30, %v654_v31  ;;  %v305_v34 = vmul.f32 %v654_v31, %v654_v31  ;;  %v309_v48 = vmul.f32 %v669_v43, %v669_v43 }
  0xb9   :  { %v284_v37 = vadd.f32 %v283_v33, %v629_v17  ;;  %v320_v38 = vadd.f32 %v319_v32, %v305_v34 }
  0xbb   :  { %v321_v41 = vadd.f32 %v320_v38, %v306_v36  ;;  %v285_v42 = vadd.f32 %v284_v37, %v635_v20 }
  0xbd   :  { %v286_v45 = vadd.f32 %v285_v42, %v645_v25  ;;  %v322_v46 = vadd.f32 %v321_v41, %v307_v40  ;;  %v685_v57 = vpop.f32.mrf.mxu2  ;;  %v699_v6 = vpop.f32.mrf.mxu3 }
  0xbe   :  { %v313_v63 = vmul.f32 %v685_v57, %v685_v57  ;;  %v317_v12 = vmul.f32 %v699_v6, %v699_v6 }
  0xbf   :  { %v287_v47 = vadd.f32 %v286_v45, %v669_v43  ;;  %v323_v49 = vadd.f32 %v322_v46, %v308_v44 }
  0xc1   :  { %v288_v51 = vadd.f32 %v287_v47, %v633_v19  ;;  %v324_v52 = vadd.f32 %v323_v49, %v309_v48  ;;  %v343_v49 = vld [vmem:[%s800_s2] sm:$0x1] }
  0xc3   :  { %v325_v55 = vadd.f32 %v324_v52, %v310_v50  ;;  %v289_v56 = vadd.f32 %v288_v51, %v641_v23 }
  0xc5   :  { %v290_v58 = vadd.f32 %v289_v56, %v664_v39  ;;  %v326_v60 = vadd.f32 %v325_v55, %v311_v54 }
  0xc7   :  { %v327_v61 = vadd.f32 %v326_v60, %v312_v59  ;;  %v291_v62 = vadd.f32 %v290_v58, %v685_v57 }
  0xc9   :  { %v292_v1 = vadd.f32 %v291_v62, %v639_v22  ;;  %v328_v2 = vadd.f32 %v327_v61, %v313_v63 }
  0xcb   :  { %v329_v4 = vadd.f32 %v328_v2, %v314_v0  ;;  %v293_v5 = vadd.f32 %v292_v1, %v659_v35 }
  0xcd   :  { %v294_v7 = vadd.f32 %v293_v5, %v680_v53  ;;  %v330_v9 = vadd.f32 %v329_v4, %v315_v3 }
  0xcf   :  { %v331_v10 = vadd.f32 %v330_v9, %v316_v8  ;;  %v295_v11 = vadd.f32 %v294_v7, %v699_v6 }
  0xd1   :  { %v296_v13 = vrot.slane %v295_v11, 4  ;;  %v332_v14 = vadd.f32 %v331_v10, %v317_v12 }
  0xd3   :  { %v297_v15 = vadd.f32 %v296_v13, %v295_v11  ;;  %v333_v24 = vrot.slane %v332_v14, 4 }
  0xd5   :  { %v298_v26 = vrot.slane %v297_v15, 2  ;;  %v334_v27 = vadd.f32 %v333_v24, %v332_v14 }
  0xd7   :  { %v299_v28 = vadd.f32 %v298_v26, %v297_v15  ;;  %v335_v29 = vrot.slane %v334_v27, 2 }
  0xd9   :  { %v300_v30 = vrot.slane %v299_v28, 1  ;;  %v336_v32 = vadd.f32 %v335_v29, %v334_v27 }
  0xdb   :  { %v301_v33 = vadd.f32 %v300_v30, %v299_v28  ;;  %v337_v34 = vrot.slane %v336_v32, 1 }
  0xdd   :  { %v338_v36 = vadd.f32 %v337_v34, %v336_v32  ;;  %v707_v37 = vmul.f32 0.0078125, %v301_v33 }
  0xdf   :  { %v340_v38 = vmul.f32 0.0078125, %v338_v36  ;;  %v341_v40 = vmul.f32 %v707_v37, %v707_v37  ;;  %v356_v54 = vsub.f32 %v627_v16, %v707_v37  ;;  %v357_v55 = vsub.f32 %v631_v18, %v707_v37  ;;  %v551_v16 = vld [vmem:[%s799_s3] ss:$0 sm:$0xff] }
  0xe0   :  { %v358_v56 = vsub.f32 %v637_v21, %v707_v37  ;;  %v359_v59 = vsub.f32 %v654_v31, %v707_v37  ;;  %v360_v60 = vsub.f32 %v629_v17, %v707_v37  ;;  %v361_v18 = vsub.f32 %v635_v20, %v707_v37 }
  0xe1   :  { %v342_v41 = vsub.f32 %v340_v38, %v341_v40  ;;  %v362_v21 = vsub.f32 %v645_v25, %v707_v37  ;;  %v363_v31 = vsub.f32 %v669_v43, %v707_v37  ;;  %v364_v17 = vsub.f32 %v633_v19, %v707_v37 }
  0xe2   :  { %v365_v8 = vsub.f32 %v641_v23, %v707_v37  ;;  %v366_v20 = vsub.f32 %v664_v39, %v707_v37  ;;  %v367_v10 = vsub.f32 %v685_v57, %v707_v37  ;;  %v368_v19 = vsub.f32 %v639_v22, %v707_v37 }
  0xe3   :  { %v344_v42 = vadd.f32 1e-05, %v342_v41  ;;  %v369_v39 = vsub.f32 %v659_v35, %v707_v37  ;;  %v370_v57 = vsub.f32 %v680_v53, %v707_v37  ;;  %v371_v22 = vsub.f32 %v699_v6, %v707_v37 }
  0xe5   :  { %552 = vrsqrt.f32 %v344_v42  ;;  %vm351_vm1 = vweird.f32 %v344_v42 }
  0xeb   :  { %v553_v44 = vpop.eup %552 }
  0xec   :  { %v346_v45 = vmul.f32 %v553_v44, %v344_v42  ;;  %vm352_vm0 = vweird.f32 %v553_v44 }
  0xed   :  { %vm353_vm2 = vmor %vm351_vm1, %vm352_vm0 }
  0xee   :  { %v347_v46 = vmul.f32 %v553_v44, %v346_v45 }
  0xf0   :  { %v348_v47 = vmul.f32 0.5, %v347_v46 }
  0xf2   :  { %v349_v48 = vsub.f32 1.5, %v348_v47 }
  0xf4   :  { %v350_v50 = vmul.f32 %v553_v44, %v349_v48 }
  0xf6   :  { %v354_v51 = vsel %vm353_vm2, %v553_v44, %v350_v50 }
  0xf7   :  { %v355_v52 = vmul.f32 %v354_v51, %v343_v49 }
  0xf9   :  { %v373_v58 = vperm.slane %v355_v52, 0 }
  0xfb   :  { %v375_v61 = vmul.f32 %v373_v58, %v356_v54  ;;  %v376_v62 = vmul.f32 %v373_v58, %v357_v55  ;;  %v377_v63 = vmul.f32 %v373_v58, %v358_v56  ;;  %v378_v0 = vmul.f32 %v373_v58, %v359_v59 }
  0xfc   :  { %v379_v1 = vmul.f32 %v373_v58, %v360_v60  ;;  %v380_v2 = vmul.f32 %v373_v58, %v361_v18  ;;  %v381_v3 = vmul.f32 %v373_v58, %v362_v21  ;;  %v382_v9 = vmul.f32 %v373_v58, %v363_v31 }
  0xfd   :  { %v395_v4 = vadd.f32 %v551_v16, %v375_v61  ;;  %v396_v5 = vadd.f32 %v551_v16, %v376_v62  ;;  %v397_v7 = vadd.f32 %v551_v16, %v377_v63  ;;  %v398_v25 = vadd.f32 %v551_v16, %v378_v0 }
  0xfe   :  { %v383_v43 = vmul.f32 %v373_v58, %v364_v17  ;;  %v399_v11 = vadd.f32 %v551_v16, %v379_v1  ;;  %v384_v12 = vmul.f32 %v373_v58, %v365_v8  ;;  %v385_v13 = vmul.f32 %v373_v58, %v366_v20 }
  0xff   :  { %v400_v14 = vadd.f32 %v551_v16, %v380_v2  ;;  %v401_v15 = vadd.f32 %v551_v16, %v381_v3  ;;  %v411_v24 = vmax.f32 %v395_v4, 0.0  ;;  %v412_v26 = vmax.f32 %v396_v5, 0.0 }
 0x100   :  { %v413_v23 = vmax.f32 %v397_v7, 0.0  ;;  %v386_v27 = vmul.f32 %v373_v58, %v367_v10  ;;  %v402_v28 = vadd.f32 %v551_v16, %v382_v9  ;;  %v414_v29 = vmax.f32 %v398_v25, 0.0 }
 0x101   :  { %v387_v30 = vmul.f32 %v373_v58, %v368_v19  ;;  %v403_v32 = vadd.f32 %v551_v16, %v383_v43  ;;  %v415_v33 = vmax.f32 %v399_v11, 0.0  ;;  %427 = vst [vmem:[%s801_s4] sm:$0xff] %v411_v24  ;;  %v388_v34 = vmul.f32 %v373_v58, %v369_v39 }
 0x102   :  { %v404_v36 = vadd.f32 %v551_v16, %v384_v12  ;;  %v416_v38 = vmax.f32 %v400_v14, 0.0  ;;  %428 = vst [vmem:[%s801_s4 + $0x8] sm:$0xff] %v412_v26  ;;  %v389_v35 = vmul.f32 %v373_v58, %v370_v57  ;;  %v405_v40 = vadd.f32 %v551_v16, %v385_v13 }
 0x103   :  { %v417_v53 = vmax.f32 %v401_v15, 0.0  ;;  %429 = vst [vmem:[%s801_s4 + $0x10] sm:$0xff] %v413_v23  ;;  %v390_v41 = vmul.f32 %v373_v58, %v371_v22  ;;  %v406_v42 = vadd.f32 %v551_v16, %v386_v27  ;;  %v418_v44 = vmax.f32 %v402_v28, 0.0 }
 0x104   :  { %430 = vst [vmem:[%s801_s4 + $0x18] sm:$0xff] %v414_v29  ;;  %v407_v6 = vadd.f32 %v551_v16, %v387_v30  ;;  %v419_v37 = vmax.f32 %v403_v32, 0.0  ;;  %v408_v45 = vadd.f32 %v551_v16, %v388_v34  ;;  %v420_v46 = vmax.f32 %v404_v36, 0.0 }
 0x105   :  { %431 = vst [vmem:[%s801_s4 + $0x20] sm:$0xff] %v415_v33  ;;  %v409_v47 = vadd.f32 %v551_v16, %v389_v35  ;;  %v421_v48 = vmax.f32 %v405_v40, 0.0  ;;  %v410_v49 = vadd.f32 %v551_v16, %v390_v41  ;;  %v422_v50 = vmax.f32 %v406_v42, 0.0 }
 0x106   :  { %432 = vst [vmem:[%s801_s4 + $0x28] sm:$0xff] %v416_v38  ;;  %v423_v51 = vmax.f32 %v407_v6, 0.0  ;;  %v424_v52 = vmax.f32 %v408_v45, 0.0 }
 0x107   :  { %433 = vst [vmem:[%s801_s4 + $0x30] sm:$0xff] %v417_v53  ;;  %v425_v54 = vmax.f32 %v409_v47, 0.0  ;;  %v426_v55 = vmax.f32 %v410_v49, 0.0 }
 0x108   :  { %434 = vst [vmem:[%s801_s4 + $0x38] sm:$0xff] %v418_v44 }
 0x109   :  { %435 = vst [vmem:[%s801_s4 + $0x40] sm:$0xff] %v419_v37 }
 0x10a   :  { %436 = vst [vmem:[%s801_s4 + $0x48] sm:$0xff] %v420_v46 }
 0x10b   :  { %437 = vst [vmem:[%s801_s4 + $0x50] sm:$0xff] %v421_v48 }
 0x10c   :  { %438 = vst [vmem:[%s801_s4 + $0x58] sm:$0xff] %v422_v50 }
 0x10d   :  { %439 = vst [vmem:[%s801_s4 + $0x60] sm:$0xff] %v423_v51 }
 0x10e   :  { %440 = vst [vmem:[%s801_s4 + $0x68] sm:$0xff] %v424_v52 }
 0x10f   :  { %441 = vst [vmem:[%s801_s4 + $0x70] sm:$0xff] %v425_v54 }
 0x110   :  { %442 = vst [vmem:[%s801_s4 + $0x78] sm:$0xff] %v426_v55 }

// kernel: fuse_model_forward.37
= control target key start
LH: loop header
LB: loop body
LE: loop exit
PB: predicated region body
PF: predicated region fallthrough
CT: control target
= control target key end

     0   :  { %s1077_s1 = inlined_call_operand.vmem [shape: bf16[640,128], index: 1, kind: input, shape index: {}]   ;;  %s1078_s0 = inlined_call_operand.vmem [shape: bf16[32,640], index: 0, kind: input, shape index: {}]   ;;  %s1079_s3 = inlined_call_operand.vmem [shape: f32[1,128], index: 3, kind: input, shape index: {}]   ;;  %s1080_s2 = inlined_call_operand.vmem [shape: f32[1,128], index: 2, kind: input, shape index: {}]   ;;  %s1081_s4 = inlined_call_operand.vmem [shape: f32[32,128], index: 4, kind: output, shape index: {}]  }
   0x1   :  { %v810_v0 = vld [vmem:[%s1077_s1 + $0x38] sm:$0xff]  ;;  %v809_v4 = vld [vmem:[%s1077_s1 + $0x30] sm:$0xff]  ;;  %v808_v8 = vld [vmem:[%s1077_s1 + $0x28] sm:$0xff] }
   0x2   :  { %v818_v1 = vld [vmem:[%s1077_s1 + $0x78] sm:$0xff]  ;;  %413 = vmatpush.bf16.msra.mxu0 %v810_v0  ;;  %v817_v5 = vld [vmem:[%s1077_s1 + $0x70] sm:$0xff]  ;;  %v816_v9 = vld [vmem:[%s1077_s1 + $0x68] sm:$0xff] }
   0x3   :  { %v826_v2 = vld [vmem:[%s1077_s1 + $0xb8] sm:$0xff]  ;;  %432 = vmatpush.bf16.msra.mxu1 %v818_v1  ;;  %v825_v6 = vld [vmem:[%s1077_s1 + $0xb0] sm:$0xff]  ;;  %v824_v10 = vld [vmem:[%s1077_s1 + $0xa8] sm:$0xff] }
   0x4   :  { %v834_v3 = vld [vmem:[%s1077_s1 + $0xf8] sm:$0xff]  ;;  %451 = vmatpush.bf16.msra.mxu2 %v826_v2  ;;  %v833_v7 = vld [vmem:[%s1077_s1 + $0xf0] sm:$0xff]  ;;  %v832_v11 = vld [vmem:[%s1077_s1 + $0xe8] sm:$0xff] }
   0x5   :  { %470 = vmatpush.bf16.msra.mxu3 %v834_v3  ;;  %v807_v12 = vld [vmem:[%s1077_s1 + $0x20] sm:$0xff]  ;;  %v806_v16 = vld [vmem:[%s1077_s1 + $0x18] sm:$0xff]  ;;  %v805_v20 = vld [vmem:[%s1077_s1 + $0x10] sm:$0xff] }
   0x6   :  { %414 = vmatpush.bf16.msra.mxu0 %v809_v4  ;;  %v815_v13 = vld [vmem:[%s1077_s1 + $0x60] sm:$0xff]  ;;  %v814_v17 = vld [vmem:[%s1077_s1 + $0x58] sm:$0xff]  ;;  %v813_v21 = vld [vmem:[%s1077_s1 + $0x50] sm:$0xff] }
   0x7   :  { %433 = vmatpush.bf16.msra.mxu1 %v817_v5  ;;  %v823_v14 = vld [vmem:[%s1077_s1 + $0xa0] sm:$0xff]  ;;  %v822_v18 = vld [vmem:[%s1077_s1 + $0x98] sm:$0xff]  ;;  %v821_v22 = vld [vmem:[%s1077_s1 + $0x90] sm:$0xff] }
   0x8   :  { %452 = vmatpush.bf16.msra.mxu2 %v825_v6  ;;  %v831_v15 = vld [vmem:[%s1077_s1 + $0xe0] sm:$0xff]  ;;  %v830_v19 = vld [vmem:[%s1077_s1 + $0xd8] sm:$0xff]  ;;  %v829_v23 = vld [vmem:[%s1077_s1 + $0xd0] sm:$0xff] }
   0x9   :  { %471 = vmatpush.bf16.msra.mxu3 %v833_v7  ;;  %v804_v24 = vld [vmem:[%s1077_s1 + $0x8] sm:$0xff]  ;;  %v803_v28 = vld [vmem:[%s1077_s1] sm:$0xff]  ;;  %v795_v33 = vld [vmem:[%s1078_s0 + $0x10] sm:$0xf0] }
   0xa   :  { %415 = vmatpush.bf16.msra.mxu0 %v808_v8  ;;  %v812_v25 = vld [vmem:[%s1077_s1 + $0x48] sm:$0xff]  ;;  %v811_v29 = vld [vmem:[%s1077_s1 + $0x40] sm:$0xff]  ;;  %v597_v35 = vld [vmem:[%s1078_s0 + $0x14] sm:$0xf0] }
   0xb   :  { %434 = vmatpush.bf16.msra.mxu1 %v816_v9  ;;  %v820_v26 = vld [vmem:[%s1077_s1 + $0x88] sm:$0xff]  ;;  %v819_v30 = vld [vmem:[%s1077_s1 + $0x80] sm:$0xff]  ;;  %v796_v37 = vld [vmem:[%s1078_s0 + $0x18] sm:$0xf0] }
   0xc   :  { %453 = vmatpush.bf16.msra.mxu2 %v824_v10  ;;  %v828_v27 = vld [vmem:[%s1077_s1 + $0xc8] sm:$0xff]  ;;  %v827_v31 = vld [vmem:[%s1077_s1 + $0xc0] sm:$0xff]  ;;  %v842_v40 = vld [vmem:[%s1077_s1 + $0x138] sm:$0xff] }
   0xd   :  { %472 = vmatpush.bf16.msra.mxu3 %v832_v11  ;;  %v595_v32 = vld [vmem:[%s1078_s0] sm:$0xf]  ;;  %v793_v34 = vld [vmem:[%s1078_s0 + $0x4] sm:$0xf]  ;;  %v603_v36 = vld [vmem:[%s1078_s0 + $0x8] sm:$0xf] }
   0xe   :  { %416 = vmatpush.bf16.msra.mxu0 %v807_v12  ;;  %v794_v38 = vld [vmem:[%s1078_s0 + $0xc] sm:$0xf]  ;;  %v605_v39 = vld [vmem:[%s1078_s0 + $0x1c] sm:$0xf0]  ;;  %v596_v41 = vor.u32 %v795_v33, %v595_v32  ;;  %v600_v42 = vor.u32 %v793_v34, %v597_v35  ;;  %v604_v43 = vor.u32 %v796_v37, %v603_v36  ;;  %v841_v45 = vld [vmem:[%s1077_s1 + $0x130] sm:$0xff] }
   0xf   :  { %435 = vmatpush.bf16.msra.mxu1 %v815_v13  ;;  %v608_v44 = vor.u32 %v794_v38, %v605_v39  ;;  %v840_v46 = vld [vmem:[%s1077_s1 + $0x128] sm:$0xff]  ;;  %v839_v47 = vld [vmem:[%s1077_s1 + $0x120] sm:$0xff]  ;;  %v800_v49 = vld [vmem:[%s1078_s0 + $0x38] sm:$0xf0] }
  0x10   :  { %454 = vmatpush.bf16.msra.mxu2 %v823_v14  ;;  %v615_v48 = vld [vmem:[%s1078_s0 + $0x28] sm:$0xf]  ;;  %v798_v50 = vld [vmem:[%s1078_s0 + $0x2c] sm:$0xf]  ;;  %v617_v51 = vld [vmem:[%s1078_s0 + $0x3c] sm:$0xf0] }
  0x11   :  { %473 = vmatpush.bf16.msra.mxu3 %v831_v15  ;;  %v623_v52 = vld [vmem:[%s1078_s0 + $0x30] sm:$0xf]  ;;  %v801_v53 = vld [vmem:[%s1078_s0 + $0x40] sm:$0xf0]  ;;  %v799_v54 = vld [vmem:[%s1078_s0 + $0x34] sm:$0xf]  ;;  %v616_v57 = vor.u32 %v800_v49, %v615_v48  ;;  %v620_v58 = vor.u32 %v798_v50, %v617_v51 }
  0x12   :  { %417 = vmatpush.bf16.msra.mxu0 %v806_v16  ;;  %v625_v55 = vld [vmem:[%s1078_s0 + $0x44] sm:$0xf0]  ;;  %v838_v56 = vld [vmem:[%s1077_s1 + $0x118] sm:$0xff]  ;;  %v624_v59 = vor.u32 %v801_v53, %v623_v52  ;;  %v837_v61 = vld [vmem:[%s1077_s1 + $0x110] sm:$0xff] }
  0x13   :  { %436 = vmatpush.bf16.msra.mxu1 %v814_v17  ;;  %v628_v60 = vor.u32 %v799_v54, %v625_v55  ;;  %v836_v62 = vld [vmem:[%s1077_s1 + $0x108] sm:$0xff]  ;;  %v835_v63 = vld [vmem:[%s1077_s1 + $0x100] sm:$0xff]  ;;  %v611_v0 = vld [vmem:[%s1078_s0 + $0x10] sm:$0xf] }
  0x14   :  { %455 = vmatpush.bf16.msra.mxu2 %v822_v18  ;;  %v797_v1 = vld [vmem:[%s1078_s0 + $0x20] sm:$0xf0]  ;;  %v631_v2 = vld [vmem:[%s1078_s0 + $0x38] sm:$0xf]  ;;  %v802_v3 = vld [vmem:[%s1078_s0 + $0x48] sm:$0xf0] }
  0x15   :  { %474 = vmatpush.bf16.msra.mxu3 %v830_v19  ;;  %v612_v4 = vor.u32 %v797_v1, %v611_v0  ;;  %v632_v5 = vor.u32 %v802_v3, %v631_v2 }
  0x16   :  { %418 = vmatpush.bf16.msra.mxu0 %v805_v20 }
  0x17   :  { %437 = vmatpush.bf16.msra.mxu1 %v813_v21 }
  0x18   :  { %456 = vmatpush.bf16.msra.mxu2 %v821_v22 }
  0x19   :  { %475 = vmatpush.bf16.msra.mxu3 %v829_v23 }
  0x1a   :  { %419 = vmatpush.bf16.msra.mxu0 %v804_v24 }
  0x1b   :  { %438 = vmatpush.bf16.msra.mxu1 %v812_v25 }
  0x1c   :  { %457 = vmatpush.bf16.msra.mxu2 %v820_v26 }
  0x1d   :  { %476 = vmatpush.bf16.msra.mxu3 %v828_v27 }
  0x1e   :  { %420 = vmatpush.bf16.msra.mxu0 %v803_v28 }
  0x1f   :  { %439 = vmatpush.bf16.msra.mxu1 %v811_v29 }
  0x20   :  { %458 = vmatpush.bf16.msra.mxu2 %v819_v30 }
  0x21   :  { %477 = vmatpush.bf16.msra.mxu3 %v827_v31  ;;  %421 = vmatmul.bf16.vlgmr.msra.gmra.mxu0 %v596_v41 }
  0x22   :  { %489 = vmatpush.bf16.msrb.mxu0 %v842_v40  ;;  %440 = vmatmul.bf16.vlgmr.msra.gmra.mxu1 %v600_v42 }
  0x23   :  { %843 = vmatpush.bf16.msrb.mxu1 %v842_v40  ;;  %459 = vmatmul.bf16.vlgmr.msra.gmra.mxu2 %v604_v43 }
  0x24   :  { %478 = vmatmul.bf16.vlgmr.msra.gmra.mxu3 %v608_v44 }
  0x26   :  { %490 = vmatpush.bf16.msrb.mxu0 %v841_v45 }
  0x27   :  { %844 = vmatpush.bf16.msrb.mxu1 %v841_v45 }
  0x2a   :  { %491 = vmatpush.bf16.msrb.mxu0 %v840_v46 }
  0x2b   :  { %845 = vmatpush.bf16.msrb.mxu1 %v840_v46 }
  0x2e   :  { %492 = vmatpush.bf16.msrb.mxu0 %v839_v47 }
  0x2f   :  { %846 = vmatpush.bf16.msrb.mxu1 %v839_v47 }
  0x31   :  { %426 = vmatmul.bf16.gmra.mxu0 %v616_v57 }
  0x32   :  { %493 = vmatpush.bf16.msrb.mxu0 %v838_v56  ;;  %445 = vmatmul.bf16.gmra.mxu1 %v620_v58 }
  0x33   :  { %847 = vmatpush.bf16.msrb.mxu1 %v838_v56  ;;  %464 = vmatmul.bf16.gmra.mxu2 %v624_v59 }
  0x34   :  { %483 = vmatmul.bf16.gmra.mxu3 %v628_v60 }
  0x36   :  { %494 = vmatpush.bf16.msrb.mxu0 %v837_v61 }
  0x37   :  { %848 = vmatpush.bf16.msrb.mxu1 %v837_v61 }
  0x3a   :  { %495 = vmatpush.bf16.msrb.mxu0 %v836_v62 }
  0x3b   :  { %849 = vmatpush.bf16.msrb.mxu1 %v836_v62 }
  0x3e   :  { %496 = vmatpush.bf16.msrb.mxu0 %v835_v63 }
  0x3f   :  { %850 = vmatpush.bf16.msrb.mxu1 %v835_v63 }
  0x41   :  { %497 = vmatmul.bf16.vlgmr.msrb.gmra.mxu0 %v612_v4 }
  0x42   :  { %502 = vmatmul.bf16.vlgmr.msrb.gmra.mxu1 %v632_v5 }
  0x9e   :  { %v422_v6 = vpop.f32.mrf.mxu0 }
  0x9f   :  { %v441_v7 = vpop.f32.mrf.mxu1 }
  0xa0   :  { %v442_v20 = vadd.f32 %v441_v7, %v422_v6 }
  0xa6   :  { %v460_v8 = vpop.f32.mrf.mxu2  ;;  %v424_v10 = vpop.f32.mrf.mxu0 }
  0xa7   :  { %v479_v9 = vpop.f32.mrf.mxu3  ;;  %v443_v11 = vpop.f32.mrf.mxu1  ;;  %v461_v23 = vadd.f32 %v460_v8, %v442_v20 }
  0xa8   :  { %v444_v24 = vadd.f32 %v443_v11, %v424_v10  ;;  %v549_v10 = vld [vmem:[%s1080_s2] sm:$0x1] }
  0xa9   :  { %v480_v30 = vadd.f32 %v479_v9, %v461_v23 }
  0xae   :  { %v462_v12 = vpop.f32.mrf.mxu2  ;;  %v427_v13 = vpop.f32.mrf.mxu0 }
  0xaf   :  { %v446_v14 = vpop.f32.mrf.mxu1  ;;  %v481_v15 = vpop.f32.mrf.mxu3  ;;  %v463_v27 = vadd.f32 %v462_v12, %v444_v24 }
  0xb0   :  { %v447_v25 = vadd.f32 %v446_v14, %v427_v13 }
  0xb1   :  { %v482_v33 = vadd.f32 %v481_v15, %v463_v27 }
  0xb6   :  { %v465_v16 = vpop.f32.mrf.mxu2  ;;  %v429_v17 = vpop.f32.mrf.mxu0 }
  0xb7   :  { %v448_v18 = vpop.f32.mrf.mxu1  ;;  %v484_v19 = vpop.f32.mrf.mxu3  ;;  %v466_v28 = vadd.f32 %v465_v16, %v447_v25 }
  0xb8   :  { %v449_v29 = vadd.f32 %v448_v18, %v429_v17 }
  0xb9   :  { %v485_v34 = vadd.f32 %v484_v19, %v466_v28  ;;  %v851_v19 = vld [vmem:[%s1079_s3] ss:$0 sm:$0xff] }
  0xbe   :  { %v498_v21 = vpop.f32.mrf.mxu0  ;;  %v467_v26 = vpop.f32.mrf.mxu2 }
  0xbf   :  { %v503_v22 = vpop.f32.mrf.mxu1  ;;  %v468_v31 = vadd.f32 %v467_v26, %v449_v29  ;;  %v486_v32 = vpop.f32.mrf.mxu3  ;;  %v499_v35 = vadd.f32 %v498_v21, %v480_v30 }
  0xc0   :  { %v504_v39 = vadd.f32 %v503_v22, %v485_v34 }
  0xc1   :  { %v487_v38 = vadd.f32 %v486_v32, %v468_v31  ;;  %v532_v41 = vmul.f32 %v499_v35, %v499_v35 }
  0xc2   :  { %v534_v45 = vmul.f32 %v504_v39, %v504_v39 }
  0xc6   :  { %v500_v36 = vpop.f32.mrf.mxu0 }
  0xc7   :  { %v505_v37 = vpop.f32.mrf.mxu1  ;;  %v501_v40 = vadd.f32 %v500_v36, %v482_v33 }
  0xc8   :  { %v506_v44 = vadd.f32 %v505_v37, %v487_v38 }
  0xc9   :  { %v523_v42 = vadd.f32 %v501_v40, %v499_v35  ;;  %v533_v43 = vmul.f32 %v501_v40, %v501_v40 }
  0xca   :  { %v535_v49 = vmul.f32 %v506_v44, %v506_v44 }
  0xcb   :  { %v536_v46 = vadd.f32 %v533_v43, %v532_v41  ;;  %v524_v47 = vadd.f32 %v523_v42, %v504_v39 }
  0xcd   :  { %v525_v48 = vadd.f32 %v524_v47, %v506_v44  ;;  %v537_v50 = vadd.f32 %v536_v46, %v534_v45 }
  0xcf   :  { %v526_v51 = vrot.slane %v525_v48, 4  ;;  %v538_v52 = vadd.f32 %v537_v50, %v535_v49 }
  0xd1   :  { %v527_v53 = vadd.f32 %v526_v51, %v525_v48  ;;  %v539_v54 = vrot.slane %v538_v52, 4 }
  0xd3   :  { %v528_v55 = vrot.slane %v527_v53, 2  ;;  %v540_v56 = vadd.f32 %v539_v54, %v538_v52 }
  0xd5   :  { %v529_v57 = vadd.f32 %v528_v55, %v527_v53  ;;  %v541_v58 = vrot.slane %v540_v56, 2 }
  0xd7   :  { %v530_v59 = vrot.slane %v529_v57, 1  ;;  %v542_v60 = vadd.f32 %v541_v58, %v540_v56 }
  0xd9   :  { %v531_v61 = vadd.f32 %v530_v59, %v529_v57  ;;  %v543_v62 = vrot.slane %v542_v60, 1 }
  0xdb   :  { %v544_v63 = vadd.f32 %v543_v62, %v542_v60  ;;  %v545_v0 = vmul.f32 0.03125, %v531_v61 }
  0xdd   :  { %v546_v1 = vmul.f32 0.03125, %v544_v63  ;;  %v547_v2 = vmul.f32 %v545_v0, %v545_v0  ;;  %v562_v14 = vsub.f32 %v499_v35, %v545_v0  ;;  %v563_v15 = vsub.f32 %v501_v40, %v545_v0 }
  0xde   :  { %v564_v16 = vsub.f32 %v504_v39, %v545_v0  ;;  %v565_v17 = vsub.f32 %v506_v44, %v545_v0 }
  0xdf   :  { %v548_v3 = vsub.f32 %v546_v1, %v547_v2 }
  0xe1   :  { %v550_v4 = vadd.f32 1e-05, %v548_v3 }
  0xe3   :  { %852 = vrsqrt.f32 %v550_v4  ;;  %vm557_vm1 = vweird.f32 %v550_v4 }
  0xe9   :  { %v853_v5 = vpop.eup %852 }
  0xea   :  { %v552_v6 = vmul.f32 %v853_v5, %v550_v4  ;;  %vm558_vm0 = vweird.f32 %v853_v5 }
  0xeb   :  { %vm559_vm2 = vmor %vm557_vm1, %vm558_vm0 }
  0xec   :  { %v553_v7 = vmul.f32 %v853_v5, %v552_v6 }
  0xee   :  { %v554_v8 = vmul.f32 0.5, %v553_v7 }
  0xf0   :  { %v555_v9 = vsub.f32 1.5, %v554_v8 }
  0xf2   :  { %v556_v11 = vmul.f32 %v853_v5, %v555_v9 }
  0xf4   :  { %v560_v12 = vsel %vm559_vm2, %v853_v5, %v556_v11 }
  0xf5   :  { %v561_v13 = vmul.f32 %v560_v12, %v549_v10 }
  0xf7   :  { %v567_v18 = vperm.slane %v561_v13, 0 }
  0xf9   :  { %v569_v20 = vmul.f32 %v567_v18, %v562_v14  ;;  %v570_v21 = vmul.f32 %v567_v18, %v563_v15  ;;  %v571_v22 = vmul.f32 %v567_v18, %v564_v16  ;;  %v572_v23 = vmul.f32 %v567_v18, %v565_v17 }
  0xfb   :  { %v577_v24 = vadd.f32 %v851_v19, %v569_v20  ;;  %v578_v25 = vadd.f32 %v851_v19, %v570_v21  ;;  %v579_v26 = vadd.f32 %v851_v19, %v571_v22  ;;  %v580_v27 = vadd.f32 %v851_v19, %v572_v23 }
  0xfd   :  { %v581_v28 = vmax.f32 %v577_v24, 0.0  ;;  %v582_v29 = vmax.f32 %v578_v25, 0.0  ;;  %v583_v30 = vmax.f32 %v579_v26, 0.0  ;;  %v584_v31 = vmax.f32 %v580_v27, 0.0 }
  0xff   :  { %585 = vst [vmem:[%s1081_s4] sm:$0xff] %v581_v28 }
 0x100   :  { %586 = vst [vmem:[%s1081_s4 + $0x8] sm:$0xff] %v582_v29 }
 0x101   :  { %587 = vst [vmem:[%s1081_s4 + $0x10] sm:$0xff] %v583_v30 }
 0x102   :  { %588 = vst [vmem:[%s1081_s4 + $0x18] sm:$0xff] %v584_v31 }

// kernel: fuse_model_forward.38
= control target key start
LH: loop header
LB: loop body
LE: loop exit
PB: predicated region body
PF: predicated region fallthrough
CT: control target
= control target key end

     0   :  { %s1105_s1 = inlined_call_operand.vmem [shape: bf16[640,128], index: 1, kind: input, shape index: {}]   ;;  %s1106_s0 = inlined_call_operand.vmem [shape: bf16[32,640], index: 0, kind: input, shape index: {}]   ;;  %s1107_s3 = inlined_call_operand.vmem [shape: f32[1,128], index: 3, kind: input, shape index: {}]   ;;  %s1108_s2 = inlined_call_operand.vmem [shape: f32[1,128], index: 2, kind: input, shape index: {}]   ;;  %s1109_s4 = inlined_call_operand.vmem [shape: f32[32,128], index: 4, kind: input, shape index: {}]   ;;  %s1110_s5 = inlined_call_operand.vmem [shape: f32[32,128], index: 5, kind: output, shape index: {}]  }
   0x1   :  { %v821_v0 = vld [vmem:[%s1105_s1 + $0x38] sm:$0xff]  ;;  %v820_v4 = vld [vmem:[%s1105_s1 + $0x30] sm:$0xff]  ;;  %v819_v8 = vld [vmem:[%s1105_s1 + $0x28] sm:$0xff] }
   0x2   :  { %v829_v1 = vld [vmem:[%s1105_s1 + $0x78] sm:$0xff]  ;;  %416 = vmatpush.bf16.msra.mxu0 %v821_v0  ;;  %v828_v5 = vld [vmem:[%s1105_s1 + $0x70] sm:$0xff]  ;;  %v827_v9 = vld [vmem:[%s1105_s1 + $0x68] sm:$0xff] }
   0x3   :  { %v837_v2 = vld [vmem:[%s1105_s1 + $0xb8] sm:$0xff]  ;;  %435 = vmatpush.bf16.msra.mxu1 %v829_v1  ;;  %v836_v6 = vld [vmem:[%s1105_s1 + $0xb0] sm:$0xff]  ;;  %v835_v10 = vld [vmem:[%s1105_s1 + $0xa8] sm:$0xff] }
   0x4   :  { %v845_v3 = vld [vmem:[%s1105_s1 + $0xf8] sm:$0xff]  ;;  %454 = vmatpush.bf16.msra.mxu2 %v837_v2  ;;  %v844_v7 = vld [vmem:[%s1105_s1 + $0xf0] sm:$0xff]  ;;  %v843_v11 = vld [vmem:[%s1105_s1 + $0xe8] sm:$0xff] }
   0x5   :  { %473 = vmatpush.bf16.msra.mxu3 %v845_v3  ;;  %v818_v12 = vld [vmem:[%s1105_s1 + $0x20] sm:$0xff]  ;;  %v817_v16 = vld [vmem:[%s1105_s1 + $0x18] sm:$0xff]  ;;  %v816_v20 = vld [vmem:[%s1105_s1 + $0x10] sm:$0xff] }
   0x6   :  { %417 = vmatpush.bf16.msra.mxu0 %v820_v4  ;;  %v826_v13 = vld [vmem:[%s1105_s1 + $0x60] sm:$0xff]  ;;  %v825_v17 = vld [vmem:[%s1105_s1 + $0x58] sm:$0xff]  ;;  %v824_v21 = vld [vmem:[%s1105_s1 + $0x50] sm:$0xff] }
   0x7   :  { %436 = vmatpush.bf16.msra.mxu1 %v828_v5  ;;  %v834_v14 = vld [vmem:[%s1105_s1 + $0xa0] sm:$0xff]  ;;  %v833_v18 = vld [vmem:[%s1105_s1 + $0x98] sm:$0xff]  ;;  %v832_v22 = vld [vmem:[%s1105_s1 + $0x90] sm:$0xff] }
   0x8   :  { %455 = vmatpush.bf16.msra.mxu2 %v836_v6  ;;  %v842_v15 = vld [vmem:[%s1105_s1 + $0xe0] sm:$0xff]  ;;  %v841_v19 = vld [vmem:[%s1105_s1 + $0xd8] sm:$0xff]  ;;  %v840_v23 = vld [vmem:[%s1105_s1 + $0xd0] sm:$0xff] }
   0x9   :  { %474 = vmatpush.bf16.msra.mxu3 %v844_v7  ;;  %v815_v24 = vld [vmem:[%s1105_s1 + $0x8] sm:$0xff]  ;;  %v814_v28 = vld [vmem:[%s1105_s1] sm:$0xff]  ;;  %v806_v33 = vld [vmem:[%s1106_s0 + $0x10] sm:$0xf0] }
   0xa   :  { %418 = vmatpush.bf16.msra.mxu0 %v819_v8  ;;  %v823_v25 = vld [vmem:[%s1105_s1 + $0x48] sm:$0xff]  ;;  %v822_v29 = vld [vmem:[%s1105_s1 + $0x40] sm:$0xff]  ;;  %v608_v35 = vld [vmem:[%s1106_s0 + $0x14] sm:$0xf0] }
   0xb   :  { %437 = vmatpush.bf16.msra.mxu1 %v827_v9  ;;  %v831_v26 = vld [vmem:[%s1105_s1 + $0x88] sm:$0xff]  ;;  %v830_v30 = vld [vmem:[%s1105_s1 + $0x80] sm:$0xff]  ;;  %v807_v37 = vld [vmem:[%s1106_s0 + $0x18] sm:$0xf0] }
   0xc   :  { %456 = vmatpush.bf16.msra.mxu2 %v835_v10  ;;  %v839_v27 = vld [vmem:[%s1105_s1 + $0xc8] sm:$0xff]  ;;  %v838_v31 = vld [vmem:[%s1105_s1 + $0xc0] sm:$0xff]  ;;  %v853_v40 = vld [vmem:[%s1105_s1 + $0x138] sm:$0xff] }
   0xd   :  { %475 = vmatpush.bf16.msra.mxu3 %v843_v11  ;;  %v606_v32 = vld [vmem:[%s1106_s0] sm:$0xf]  ;;  %v804_v34 = vld [vmem:[%s1106_s0 + $0x4] sm:$0xf]  ;;  %v614_v36 = vld [vmem:[%s1106_s0 + $0x8] sm:$0xf] }
   0xe   :  { %419 = vmatpush.bf16.msra.mxu0 %v818_v12  ;;  %v805_v38 = vld [vmem:[%s1106_s0 + $0xc] sm:$0xf]  ;;  %v616_v39 = vld [vmem:[%s1106_s0 + $0x1c] sm:$0xf0]  ;;  %v607_v41 = vor.u32 %v806_v33, %v606_v32  ;;  %v611_v42 = vor.u32 %v804_v34, %v608_v35  ;;  %v615_v43 = vor.u32 %v807_v37, %v614_v36  ;;  %v852_v45 = vld [vmem:[%s1105_s1 + $0x130] sm:$0xff] }
   0xf   :  { %438 = vmatpush.bf16.msra.mxu1 %v826_v13  ;;  %v619_v44 = vor.u32 %v805_v38, %v616_v39  ;;  %v851_v46 = vld [vmem:[%s1105_s1 + $0x128] sm:$0xff]  ;;  %v850_v47 = vld [vmem:[%s1105_s1 + $0x120] sm:$0xff]  ;;  %v811_v49 = vld [vmem:[%s1106_s0 + $0x38] sm:$0xf0] }
  0x10   :  { %457 = vmatpush.bf16.msra.mxu2 %v834_v14  ;;  %v626_v48 = vld [vmem:[%s1106_s0 + $0x28] sm:$0xf]  ;;  %v809_v50 = vld [vmem:[%s1106_s0 + $0x2c] sm:$0xf]  ;;  %v628_v51 = vld [vmem:[%s1106_s0 + $0x3c] sm:$0xf0] }
  0x11   :  { %476 = vmatpush.bf16.msra.mxu3 %v842_v15  ;;  %v634_v52 = vld [vmem:[%s1106_s0 + $0x30] sm:$0xf]  ;;  %v812_v53 = vld [vmem:[%s1106_s0 + $0x40] sm:$0xf0]  ;;  %v810_v54 = vld [vmem:[%s1106_s0 + $0x34] sm:$0xf]  ;;  %v627_v57 = vor.u32 %v811_v49, %v626_v48  ;;  %v631_v58 = vor.u32 %v809_v50, %v628_v51 }
  0x12   :  { %420 = vmatpush.bf16.msra.mxu0 %v817_v16  ;;  %v636_v55 = vld [vmem:[%s1106_s0 + $0x44] sm:$0xf0]  ;;  %v849_v56 = vld [vmem:[%s1105_s1 + $0x118] sm:$0xff]  ;;  %v635_v59 = vor.u32 %v812_v53, %v634_v52  ;;  %v848_v61 = vld [vmem:[%s1105_s1 + $0x110] sm:$0xff] }
  0x13   :  { %439 = vmatpush.bf16.msra.mxu1 %v825_v17  ;;  %v639_v60 = vor.u32 %v810_v54, %v636_v55  ;;  %v847_v62 = vld [vmem:[%s1105_s1 + $0x108] sm:$0xff]  ;;  %v846_v63 = vld [vmem:[%s1105_s1 + $0x100] sm:$0xff]  ;;  %v622_v0 = vld [vmem:[%s1106_s0 + $0x10] sm:$0xf] }
  0x14   :  { %458 = vmatpush.bf16.msra.mxu2 %v833_v18  ;;  %v808_v1 = vld [vmem:[%s1106_s0 + $0x20] sm:$0xf0]  ;;  %v642_v2 = vld [vmem:[%s1106_s0 + $0x38] sm:$0xf]  ;;  %v813_v3 = vld [vmem:[%s1106_s0 + $0x48] sm:$0xf0] }
  0x15   :  { %477 = vmatpush.bf16.msra.mxu3 %v841_v19  ;;  %v623_v4 = vor.u32 %v808_v1, %v622_v0  ;;  %v643_v5 = vor.u32 %v813_v3, %v642_v2 }
  0x16   :  { %421 = vmatpush.bf16.msra.mxu0 %v816_v20 }
  0x17   :  { %440 = vmatpush.bf16.msra.mxu1 %v824_v21 }
  0x18   :  { %459 = vmatpush.bf16.msra.mxu2 %v832_v22 }
  0x19   :  { %478 = vmatpush.bf16.msra.mxu3 %v840_v23 }
  0x1a   :  { %422 = vmatpush.bf16.msra.mxu0 %v815_v24 }
  0x1b   :  { %441 = vmatpush.bf16.msra.mxu1 %v823_v25 }
  0x1c   :  { %460 = vmatpush.bf16.msra.mxu2 %v831_v26 }
  0x1d   :  { %479 = vmatpush.bf16.msra.mxu3 %v839_v27 }
  0x1e   :  { %423 = vmatpush.bf16.msra.mxu0 %v814_v28 }
  0x1f   :  { %442 = vmatpush.bf16.msra.mxu1 %v822_v29 }
  0x20   :  { %461 = vmatpush.bf16.msra.mxu2 %v830_v30 }
  0x21   :  { %480 = vmatpush.bf16.msra.mxu3 %v838_v31  ;;  %424 = vmatmul.bf16.vlgmr.msra.gmra.mxu0 %v607_v41 }
  0x22   :  { %492 = vmatpush.bf16.msrb.mxu0 %v853_v40  ;;  %443 = vmatmul.bf16.vlgmr.msra.gmra.mxu1 %v611_v42 }
  0x23   :  { %854 = vmatpush.bf16.msrb.mxu1 %v853_v40  ;;  %462 = vmatmul.bf16.vlgmr.msra.gmra.mxu2 %v615_v43 }
  0x24   :  { %481 = vmatmul.bf16.vlgmr.msra.gmra.mxu3 %v619_v44 }
  0x26   :  { %493 = vmatpush.bf16.msrb.mxu0 %v852_v45 }
  0x27   :  { %855 = vmatpush.bf16.msrb.mxu1 %v852_v45 }
  0x2a   :  { %494 = vmatpush.bf16.msrb.mxu0 %v851_v46 }
  0x2b   :  { %856 = vmatpush.bf16.msrb.mxu1 %v851_v46 }
  0x2e   :  { %495 = vmatpush.bf16.msrb.mxu0 %v850_v47 }
  0x2f   :  { %857 = vmatpush.bf16.msrb.mxu1 %v850_v47 }
  0x31   :  { %429 = vmatmul.bf16.gmra.mxu0 %v627_v57 }
  0x32   :  { %496 = vmatpush.bf16.msrb.mxu0 %v849_v56  ;;  %448 = vmatmul.bf16.gmra.mxu1 %v631_v58 }
  0x33   :  { %858 = vmatpush.bf16.msrb.mxu1 %v849_v56  ;;  %467 = vmatmul.bf16.gmra.mxu2 %v635_v59 }
  0x34   :  { %486 = vmatmul.bf16.gmra.mxu3 %v639_v60 }
  0x36   :  { %497 = vmatpush.bf16.msrb.mxu0 %v848_v61 }
  0x37   :  { %859 = vmatpush.bf16.msrb.mxu1 %v848_v61 }
  0x3a   :  { %498 = vmatpush.bf16.msrb.mxu0 %v847_v62 }
  0x3b   :  { %860 = vmatpush.bf16.msrb.mxu1 %v847_v62 }
  0x3e   :  { %499 = vmatpush.bf16.msrb.mxu0 %v846_v63 }
  0x3f   :  { %861 = vmatpush.bf16.msrb.mxu1 %v846_v63 }
  0x41   :  { %500 = vmatmul.bf16.vlgmr.msrb.gmra.mxu0 %v623_v4 }
  0x42   :  { %505 = vmatmul.bf16.vlgmr.msrb.gmra.mxu1 %v643_v5 }
  0x9e   :  { %v425_v6 = vpop.f32.mrf.mxu0 }
  0x9f   :  { %v444_v7 = vpop.f32.mrf.mxu1 }
  0xa0   :  { %v445_v20 = vadd.f32 %v444_v7, %v425_v6 }
  0xa6   :  { %v463_v8 = vpop.f32.mrf.mxu2  ;;  %v427_v10 = vpop.f32.mrf.mxu0 }
  0xa7   :  { %v482_v9 = vpop.f32.mrf.mxu3  ;;  %v446_v11 = vpop.f32.mrf.mxu1  ;;  %v464_v23 = vadd.f32 %v463_v8, %v445_v20 }
  0xa8   :  { %v447_v24 = vadd.f32 %v446_v11, %v427_v10  ;;  %v552_v10 = vld [vmem:[%s1108_s2] sm:$0x1] }
  0xa9   :  { %v483_v30 = vadd.f32 %v482_v9, %v464_v23 }
  0xae   :  { %v465_v12 = vpop.f32.mrf.mxu2  ;;  %v430_v13 = vpop.f32.mrf.mxu0 }
  0xaf   :  { %v449_v14 = vpop.f32.mrf.mxu1  ;;  %v484_v15 = vpop.f32.mrf.mxu3  ;;  %v466_v27 = vadd.f32 %v465_v12, %v447_v24  ;;  %v584_v24 = vld [vmem:[%s1109_s4] sm:$0xff] }
  0xb0   :  { %v450_v25 = vadd.f32 %v449_v14, %v430_v13 }
  0xb1   :  { %v485_v33 = vadd.f32 %v484_v15, %v466_v27  ;;  %v587_v27 = vld [vmem:[%s1109_s4 + $0x18] sm:$0xff] }
  0xb6   :  { %v468_v16 = vpop.f32.mrf.mxu2  ;;  %v432_v17 = vpop.f32.mrf.mxu0 }
  0xb7   :  { %v451_v18 = vpop.f32.mrf.mxu1  ;;  %v487_v19 = vpop.f32.mrf.mxu3  ;;  %v469_v28 = vadd.f32 %v468_v16, %v450_v25  ;;  %v585_v25 = vld [vmem:[%s1109_s4 + $0x8] sm:$0xff] }
  0xb8   :  { %v452_v29 = vadd.f32 %v451_v18, %v432_v17 }
  0xb9   :  { %v488_v34 = vadd.f32 %v487_v19, %v469_v28  ;;  %v862_v19 = vld [vmem:[%s1107_s3] ss:$0 sm:$0xff] }
  0xbe   :  { %v501_v21 = vpop.f32.mrf.mxu0  ;;  %v470_v26 = vpop.f32.mrf.mxu2 }
  0xbf   :  { %v506_v22 = vpop.f32.mrf.mxu1  ;;  %v471_v31 = vadd.f32 %v470_v26, %v452_v29  ;;  %v489_v32 = vpop.f32.mrf.mxu3  ;;  %v502_v35 = vadd.f32 %v501_v21, %v483_v30  ;;  %v586_v26 = vld [vmem:[%s1109_s4 + $0x10] sm:$0xff] }
  0xc0   :  { %v507_v39 = vadd.f32 %v506_v22, %v488_v34 }
  0xc1   :  { %v490_v38 = vadd.f32 %v489_v32, %v471_v31  ;;  %v535_v41 = vmul.f32 %v502_v35, %v502_v35 }
  0xc2   :  { %v537_v45 = vmul.f32 %v507_v39, %v507_v39 }
  0xc6   :  { %v503_v36 = vpop.f32.mrf.mxu0 }
  0xc7   :  { %v508_v37 = vpop.f32.mrf.mxu1  ;;  %v504_v40 = vadd.f32 %v503_v36, %v485_v33 }
  0xc8   :  { %v509_v44 = vadd.f32 %v508_v37, %v490_v38 }
  0xc9   :  { %v526_v42 = vadd.f32 %v504_v40, %v502_v35  ;;  %v536_v43 = vmul.f32 %v504_v40, %v504_v40 }
  0xca   :  { %v538_v49 = vmul.f32 %v509_v44, %v509_v44 }
  0xcb   :  { %v539_v46 = vadd.f32 %v536_v43, %v535_v41  ;;  %v527_v47 = vadd.f32 %v526_v42, %v507_v39 }
  0xcd   :  { %v528_v48 = vadd.f32 %v527_v47, %v509_v44  ;;  %v540_v50 = vadd.f32 %v539_v46, %v537_v45 }
  0xcf   :  { %v529_v51 = vrot.slane %v528_v48, 4  ;;  %v541_v52 = vadd.f32 %v540_v50, %v538_v49 }
  0xd1   :  { %v530_v53 = vadd.f32 %v529_v51, %v528_v48  ;;  %v542_v54 = vrot.slane %v541_v52, 4 }
  0xd3   :  { %v531_v55 = vrot.slane %v530_v53, 2  ;;  %v543_v56 = vadd.f32 %v542_v54, %v541_v52 }
  0xd5   :  { %v532_v57 = vadd.f32 %v531_v55, %v530_v53  ;;  %v544_v58 = vrot.slane %v543_v56, 2 }
  0xd7   :  { %v533_v59 = vrot.slane %v532_v57, 1  ;;  %v545_v60 = vadd.f32 %v544_v58, %v543_v56 }
  0xd9   :  { %v534_v61 = vadd.f32 %v533_v59, %v532_v57  ;;  %v546_v62 = vrot.slane %v545_v60, 1 }
  0xdb   :  { %v547_v63 = vadd.f32 %v546_v62, %v545_v60  ;;  %v548_v0 = vmul.f32 0.03125, %v534_v61 }
  0xdd   :  { %v549_v1 = vmul.f32 0.03125, %v547_v63  ;;  %v550_v2 = vmul.f32 %v548_v0, %v548_v0  ;;  %v565_v14 = vsub.f32 %v502_v35, %v548_v0  ;;  %v566_v15 = vsub.f32 %v504_v40, %v548_v0 }
  0xde   :  { %v567_v16 = vsub.f32 %v507_v39, %v548_v0  ;;  %v568_v17 = vsub.f32 %v509_v44, %v548_v0 }
  0xdf   :  { %v551_v3 = vsub.f32 %v549_v1, %v550_v2 }
  0xe1   :  { %v553_v4 = vadd.f32 1e-05, %v551_v3 }
  0xe3   :  { %863 = vrsqrt.f32 %v553_v4  ;;  %vm560_vm1 = vweird.f32 %v553_v4 }
  0xe9   :  { %v864_v5 = vpop.eup %863 }
  0xea   :  { %v555_v6 = vmul.f32 %v864_v5, %v553_v4  ;;  %vm561_vm0 = vweird.f32 %v864_v5 }
  0xeb   :  { %vm562_vm2 = vmor %vm560_vm1, %vm561_vm0 }
  0xec   :  { %v556_v7 = vmul.f32 %v864_v5, %v555_v6 }
  0xee   :  { %v557_v8 = vmul.f32 0.5, %v556_v7 }
  0xf0   :  { %v558_v9 = vsub.f32 1.5, %v557_v8 }
  0xf2   :  { %v559_v11 = vmul.f32 %v864_v5, %v558_v9 }
  0xf4   :  { %v563_v12 = vsel %vm562_vm2, %v864_v5, %v559_v11 }
  0xf5   :  { %v564_v13 = vmul.f32 %v563_v12, %v552_v10 }
  0xf7   :  { %v570_v18 = vperm.slane %v564_v13, 0 }
  0xf9   :  { %v572_v20 = vmul.f32 %v570_v18, %v565_v14  ;;  %v573_v21 = vmul.f32 %v570_v18, %v566_v15  ;;  %v574_v22 = vmul.f32 %v570_v18, %v567_v16  ;;  %v575_v23 = vmul.f32 %v570_v18, %v568_v17 }
  0xfb   :  { %v580_v28 = vadd.f32 %v862_v19, %v572_v20  ;;  %v581_v29 = vadd.f32 %v862_v19, %v573_v21  ;;  %v582_v30 = vadd.f32 %v862_v19, %v574_v22  ;;  %v583_v31 = vadd.f32 %v862_v19, %v575_v23 }
  0xfd   :  { %v588_v32 = vadd.f32 %v584_v24, %v580_v28  ;;  %v589_v33 = vadd.f32 %v585_v25, %v581_v29  ;;  %v590_v34 = vadd.f32 %v586_v26, %v582_v30  ;;  %v591_v35 = vadd.f32 %v587_v27, %v583_v31 }
  0xff   :  { %v592_v36 = vmax.f32 %v588_v32, 0.0  ;;  %v593_v37 = vmax.f32 %v589_v33, 0.0  ;;  %v594_v38 = vmax.f32 %v590_v34, 0.0  ;;  %v595_v39 = vmax.f32 %v591_v35, 0.0 }
 0x101   :  { %596 = vst [vmem:[%s1110_s5] sm:$0xff] %v592_v36 }
 0x102   :  { %597 = vst [vmem:[%s1110_s5 + $0x8] sm:$0xff] %v593_v37 }
 0x103   :  { %598 = vst [vmem:[%s1110_s5 + $0x10] sm:$0xff] %v594_v38 }
 0x104   :  { %599 = vst [vmem:[%s1110_s5 + $0x18] sm:$0xff] %v595_v39 }

// kernel: fuse_model_forward.44
= control target key start
LH: loop header
LB: loop body
LE: loop exit
PB: predicated region body
PF: predicated region fallthrough
CT: control target
= control target key end

     0   :  { %s256_s1 = inlined_call_operand.vmem [shape: bf16[128,128], index: 1, kind: input, shape index: {}]   ;;  %s257_s3 = inlined_call_operand.vmem [shape: f32[1,128], index: 3, kind: input, shape index: {}]   ;;  %s258_s0 = inlined_call_operand.vmem [shape: bf16[8,128], index: 0, kind: input, shape index: {}]   ;;  %s259_s2 = inlined_call_operand.vmem [shape: f32[1,128], index: 2, kind: input, shape index: {}]   ;;  %s260_s4 = inlined_call_operand.vmem [shape: f32[8,128], index: 4, kind: output, shape index: {}]  }
   0x1   :  { %v191_v0 = vld [vmem:[%s256_s1 + $0x38] sm:$0xff]  ;;  %v190_v1 = vld [vmem:[%s256_s1 + $0x30] sm:$0xff]  ;;  %v189_v2 = vld [vmem:[%s256_s1 + $0x28] sm:$0xff] }
   0x2   :  { %88 = vmatpush.bf16.msra.mxu0 %v191_v0  ;;  %v188_v3 = vld [vmem:[%s256_s1 + $0x20] sm:$0xff]  ;;  %v187_v4 = vld [vmem:[%s256_s1 + $0x18] sm:$0xff]  ;;  %v186_v5 = vld [vmem:[%s256_s1 + $0x10] sm:$0xff] }
   0x3   :  { %v185_v6 = vld [vmem:[%s256_s1 + $0x8] sm:$0xff]  ;;  %v184_v7 = vld [vmem:[%s256_s1] sm:$0xff] }
   0x4   :  { %v23_v8 = vld [vmem:[%s258_s0] sm:$0xf] }
   0x5   :  { %v124_v34 = vld [vmem:[%s259_s2] sm:$0x1] }
   0x6   :  { %89 = vmatpush.bf16.msra.mxu0 %v190_v1  ;;  %v192_v40 = vld [vmem:[%s257_s3] ss:$0 sm:$0xff] }
   0xa   :  { %90 = vmatpush.bf16.msra.mxu0 %v189_v2 }
   0xe   :  { %91 = vmatpush.bf16.msra.mxu0 %v188_v3 }
  0x12   :  { %92 = vmatpush.bf16.msra.mxu0 %v187_v4 }
  0x16   :  { %93 = vmatpush.bf16.msra.mxu0 %v186_v5 }
  0x1a   :  { %94 = vmatpush.bf16.msra.mxu0 %v185_v6 }
  0x1e   :  { %95 = vmatpush.bf16.msra.mxu0 %v184_v7 }
  0x21   :  { %96 = vmatmul.bf16.vlgmr.msra.gmra.mxu0 %v23_v8 }
  0x9e   :  { %v97_v9 = vpop.f32.mrf.mxu0 }
  0x9f   :  { %v107_v10 = vrot.slane %v97_v9, 4  ;;  %v113_v11 = vmul.f32 %v97_v9, %v97_v9 }
  0xa1   :  { %v108_v12 = vadd.f32 %v107_v10, %v97_v9  ;;  %v114_v13 = vrot.slane %v113_v11, 4 }
  0xa3   :  { %v109_v14 = vrot.slane %v108_v12, 2  ;;  %v115_v15 = vadd.f32 %v114_v13, %v113_v11 }
  0xa5   :  { %v110_v16 = vadd.f32 %v109_v14, %v108_v12  ;;  %v116_v17 = vrot.slane %v115_v15, 2 }
  0xa6   :  { %v99_v18 = vpop.f32.mrf.mxu0 }
  0xa7   :  { %v111_v19 = vrot.slane %v110_v16, 1  ;;  %v117_v20 = vadd.f32 %v116_v17, %v115_v15 }
  0xa9   :  { %v112_v21 = vadd.f32 %v111_v19, %v110_v16  ;;  %v118_v22 = vrot.slane %v117_v20, 1 }
  0xab   :  { %v119_v23 = vadd.f32 %v118_v22, %v117_v20  ;;  %v120_v24 = vmul.f32 0.125, %v112_v21 }
  0xad   :  { %v121_v25 = vmul.f32 0.125, %v119_v23  ;;  %v122_v26 = vmul.f32 %v120_v24, %v120_v24  ;;  %v137_v38 = vsub.f32 %v97_v9, %v120_v24 }
  0xaf   :  { %v123_v27 = vsub.f32 %v121_v25, %v122_v26 }
  0xb1   :  { %v125_v28 = vadd.f32 1e-05, %v123_v27 }
  0xb3   :  { %193 = vrsqrt.f32 %v125_v28  ;;  %vm132_vm1 = vweird.f32 %v125_v28 }
  0xb9   :  { %v194_v29 = vpop.eup %193 }
  0xba   :  { %v127_v30 = vmul.f32 %v194_v29, %v125_v28  ;;  %vm133_vm0 = vweird.f32 %v194_v29 }
  0xbb   :  { %vm134_vm2 = vmor %vm132_vm1, %vm133_vm0 }
  0xbc   :  { %v128_v31 = vmul.f32 %v194_v29, %v127_v30 }
  0xbe   :  { %v129_v32 = vmul.f32 0.5, %v128_v31 }
  0xc0   :  { %v130_v33 = vsub.f32 1.5, %v129_v32 }
  0xc2   :  { %v131_v35 = vmul.f32 %v194_v29, %v130_v33 }
  0xc4   :  { %v135_v36 = vsel %vm134_vm2, %v194_v29, %v131_v35 }
  0xc5   :  { %v136_v37 = vmul.f32 %v135_v36, %v124_v34 }
  0xc7   :  { %v139_v39 = vperm.slane %v136_v37, 0 }
  0xc9   :  { %v141_v41 = vmul.f32 %v139_v39, %v137_v38 }
  0xcb   :  { %v146_v42 = vadd.f32 %v192_v40, %v141_v41 }
  0xcd   :  { %147 = vst [vmem:[%s260_s4] sm:$0xff] %v146_v42 }

// kernel: fuse_model_forward.43
= control target key start
LH: loop header
LB: loop body
LE: loop exit
PB: predicated region body
PF: predicated region fallthrough
CT: control target
= control target key end

     0   :  { %s847_s1 = inlined_call_operand.vmem [shape: bf16[640,128], index: 1, kind: input, shape index: {}]   ;;  %s848_s0 = inlined_call_operand.vmem [shape: bf16[8,640], index: 0, kind: input, shape index: {}]   ;;  %s849_s3 = inlined_call_operand.vmem [shape: f32[1,128], index: 3, kind: input, shape index: {}]   ;;  %s850_s2 = inlined_call_operand.vmem [shape: f32[1,128], index: 2, kind: input, shape index: {}]   ;;  %s851_s4 = inlined_call_operand.vmem [shape: f32[8,128], index: 4, kind: output, shape index: {}]  }
   0x1   :  { %v648_v0 = vld [vmem:[%s847_s1 + $0x38] sm:$0xff]  ;;  %v647_v3 = vld [vmem:[%s847_s1 + $0x30] sm:$0xff]  ;;  %v646_v8 = vld [vmem:[%s847_s1 + $0x28] sm:$0xff] }
   0x2   :  { %v664_v1 = vld [vmem:[%s847_s1 + $0xb8] sm:$0xff]  ;;  %364 = vmatpush.bf16.msra.mxu0 %v648_v0  ;;  %v663_v5 = vld [vmem:[%s847_s1 + $0xb0] sm:$0xff]  ;;  %v662_v9 = vld [vmem:[%s847_s1 + $0xa8] sm:$0xff] }
   0x3   :  { %v672_v2 = vld [vmem:[%s847_s1 + $0xf8] sm:$0xff]  ;;  %390 = vmatpush.bf16.msra.mxu2 %v664_v1  ;;  %v671_v6 = vld [vmem:[%s847_s1 + $0xf0] sm:$0xff]  ;;  %v670_v10 = vld [vmem:[%s847_s1 + $0xe8] sm:$0xff] }
   0x4   :  { %v656_v4 = vld [vmem:[%s847_s1 + $0x78] sm:$0xff]  ;;  %403 = vmatpush.bf16.msra.mxu3 %v672_v2  ;;  %v655_v7 = vld [vmem:[%s847_s1 + $0x70] sm:$0xff]  ;;  %v654_v11 = vld [vmem:[%s847_s1 + $0x68] sm:$0xff] }
   0x5   :  { %377 = vmatpush.bf16.msra.mxu1 %v656_v4  ;;  %v645_v12 = vld [vmem:[%s847_s1 + $0x20] sm:$0xff]  ;;  %v644_v16 = vld [vmem:[%s847_s1 + $0x18] sm:$0xff]  ;;  %v643_v20 = vld [vmem:[%s847_s1 + $0x10] sm:$0xff] }
   0x6   :  { %365 = vmatpush.bf16.msra.mxu0 %v647_v3  ;;  %v661_v13 = vld [vmem:[%s847_s1 + $0xa0] sm:$0xff]  ;;  %v660_v17 = vld [vmem:[%s847_s1 + $0x98] sm:$0xff]  ;;  %v659_v21 = vld [vmem:[%s847_s1 + $0x90] sm:$0xff] }
   0x7   :  { %391 = vmatpush.bf16.msra.mxu2 %v663_v5  ;;  %v669_v14 = vld [vmem:[%s847_s1 + $0xe0] sm:$0xff]  ;;  %v668_v18 = vld [vmem:[%s847_s1 + $0xd8] sm:$0xff]  ;;  %v667_v22 = vld [vmem:[%s847_s1 + $0xd0] sm:$0xff] }
   0x8   :  { %404 = vmatpush.bf16.msra.mxu3 %v671_v6  ;;  %v653_v15 = vld [vmem:[%s847_s1 + $0x60] sm:$0xff]  ;;  %v652_v19 = vld [vmem:[%s847_s1 + $0x58] sm:$0xff]  ;;  %v651_v23 = vld [vmem:[%s847_s1 + $0x50] sm:$0xff] }
   0x9   :  { %378 = vmatpush.bf16.msra.mxu1 %v655_v7  ;;  %v642_v24 = vld [vmem:[%s847_s1 + $0x8] sm:$0xff]  ;;  %v23_v25 = vld [vmem:[%s848_s0] sm:$0xff]  ;;  %v680_v33 = vld [vmem:[%s847_s1 + $0x138] sm:$0xff] }
   0xa   :  { %366 = vmatpush.bf16.msra.mxu0 %v646_v8  ;;  %v658_v26 = vld [vmem:[%s847_s1 + $0x88] sm:$0xff]  ;;  %v109_v30 = vunpack.c.l.b16 %v23_v25  ;;  %v641_v31 = vld [vmem:[%s847_s1] sm:$0xff]  ;;  %v110_v38 = vunpack.c.h.b16 %v23_v25  ;;  %v679_v41 = vld [vmem:[%s847_s1 + $0x130] sm:$0xff] }
   0xb   :  { %392 = vmatpush.bf16.msra.mxu2 %v662_v9  ;;  %v666_v27 = vld [vmem:[%s847_s1 + $0xc8] sm:$0xff]  ;;  %v657_v34 = vld [vmem:[%s847_s1 + $0x80] sm:$0xff]  ;;  %v676_v46 = vld [vmem:[%s847_s1 + $0x118] sm:$0xff] }
   0xc   :  { %405 = vmatpush.bf16.msra.mxu3 %v670_v10  ;;  %v24_v28 = vld [vmem:[%s848_s0 + $0x8] sm:$0xff]  ;;  %v665_v36 = vld [vmem:[%s847_s1 + $0xc0] sm:$0xff]  ;;  %v114_v39 = vpack.c.b16 %v109_v30, %v109_v30  ;;  %v115_v43 = vpack.c.b16 %v110_v38, %v110_v38  ;;  %v675_v47 = vld [vmem:[%s847_s1 + $0x110] sm:$0xff] }
   0xd   :  { %379 = vmatpush.bf16.msra.mxu1 %v654_v11  ;;  %v650_v29 = vld [vmem:[%s847_s1 + $0x48] sm:$0xff]  ;;  %v111_v32 = vunpack.c.l.b16 %v24_v28  ;;  %v112_v35 = vunpack.c.h.b16 %v24_v28  ;;  %v649_v37 = vld [vmem:[%s847_s1 + $0x40] sm:$0xff]  ;;  %v25_v49 = vld [vmem:[%s848_s0 + $0x10] sm:$0xf] }
   0xe   :  { %367 = vmatpush.bf16.msra.mxu0 %v645_v12  ;;  %v678_v44 = vld [vmem:[%s847_s1 + $0x128] sm:$0xff]  ;;  %v677_v45 = vld [vmem:[%s847_s1 + $0x120] sm:$0xff]  ;;  %v113_v50 = vunpack.c.l.b16 %v25_v49 }
   0xf   :  { %393 = vmatpush.bf16.msra.mxu2 %v661_v13  ;;  %v116_v40 = vpack.c.b16 %v111_v32, %v111_v32  ;;  %v117_v42 = vpack.c.b16 %v112_v35, %v112_v35  ;;  %v674_v48 = vld [vmem:[%s847_s1 + $0x108] sm:$0xff]  ;;  %v673_v51 = vld [vmem:[%s847_s1 + $0x100] sm:$0xff] }
  0x10   :  { %406 = vmatpush.bf16.msra.mxu3 %v669_v14  ;;  %v118_v52 = vpack.c.b16 %v113_v50, %v113_v50  ;;  %v681_v32 = vld [vmem:[%s849_s3] ss:$0 sm:$0xff] }
  0x11   :  { %380 = vmatpush.bf16.msra.mxu1 %v653_v15 }
  0x12   :  { %368 = vmatpush.bf16.msra.mxu0 %v644_v16 }
  0x13   :  { %394 = vmatpush.bf16.msra.mxu2 %v660_v17 }
  0x14   :  { %407 = vmatpush.bf16.msra.mxu3 %v668_v18 }
  0x15   :  { %381 = vmatpush.bf16.msra.mxu1 %v652_v19 }
  0x16   :  { %369 = vmatpush.bf16.msra.mxu0 %v643_v20 }
  0x17   :  { %395 = vmatpush.bf16.msra.mxu2 %v659_v21 }
  0x18   :  { %408 = vmatpush.bf16.msra.mxu3 %v667_v22 }
  0x19   :  { %382 = vmatpush.bf16.msra.mxu1 %v651_v23 }
  0x1a   :  { %370 = vmatpush.bf16.msra.mxu0 %v642_v24 }
  0x1b   :  { %396 = vmatpush.bf16.msra.mxu2 %v658_v26  ;;  %v452_v26 = vld [vmem:[%s850_s2] sm:$0x1] }
  0x1c   :  { %409 = vmatpush.bf16.msra.mxu3 %v666_v27 }
  0x1d   :  { %383 = vmatpush.bf16.msra.mxu1 %v650_v29 }
  0x1e   :  { %371 = vmatpush.bf16.msra.mxu0 %v641_v31 }
  0x1f   :  { %397 = vmatpush.bf16.msra.mxu2 %v657_v34 }
  0x20   :  { %410 = vmatpush.bf16.msra.mxu3 %v665_v36 }
  0x21   :  { %384 = vmatpush.bf16.msra.mxu1 %v649_v37  ;;  %372 = vmatmul.bf16.vlgmr.msra.gmra.mxu0 %v114_v39 }
  0x22   :  { %416 = vmatpush.bf16.msrb.mxu0 %v680_v33  ;;  %398 = vmatmul.bf16.vlgmr.msra.gmra.mxu2 %v116_v40 }
  0x23   :  { %411 = vmatmul.bf16.vlgmr.msra.gmra.mxu3 %v117_v42 }
  0x24   :  { %385 = vmatmul.bf16.vlgmr.msra.gmra.mxu1 %v115_v43 }
  0x26   :  { %417 = vmatpush.bf16.msrb.mxu0 %v679_v41 }
  0x2a   :  { %418 = vmatpush.bf16.msrb.mxu0 %v678_v44 }
  0x2e   :  { %419 = vmatpush.bf16.msrb.mxu0 %v677_v45 }
  0x32   :  { %420 = vmatpush.bf16.msrb.mxu0 %v676_v46 }
  0x36   :  { %421 = vmatpush.bf16.msrb.mxu0 %v675_v47 }
  0x3a   :  { %422 = vmatpush.bf16.msrb.mxu0 %v674_v48 }
  0x3e   :  { %423 = vmatpush.bf16.msrb.mxu0 %v673_v51 }
  0x41   :  { %424 = vmatmul.bf16.vlgmr.msrb.gmra.mxu0 %v118_v52 }
  0x9e   :  { %v373_v53 = vpop.f32.mrf.mxu0 }
  0xa1   :  { %v386_v54 = vpop.f32.mrf.mxu1 }
  0xa2   :  { %v387_v61 = vadd.f32 %v386_v54, %v373_v53 }
  0xa5   :  { %v399_v55 = vpop.f32.mrf.mxu2 }
  0xa6   :  { %v375_v56 = vpop.f32.mrf.mxu0  ;;  %v412_v57 = vpop.f32.mrf.mxu3  ;;  %v400_v62 = vadd.f32 %v399_v55, %v387_v61 }
  0xa8   :  { %v413_v63 = vadd.f32 %v412_v57, %v400_v62 }
  0xa9   :  { %v388_v58 = vpop.f32.mrf.mxu1 }
  0xad   :  { %v401_v59 = vpop.f32.mrf.mxu2 }
  0xae   :  { %v414_v60 = vpop.f32.mrf.mxu3 }
  0xbe   :  { %v425_v0 = vpop.f32.mrf.mxu0 }
  0xbf   :  { %v426_v1 = vadd.f32 %v425_v0, %v413_v63 }
  0xc1   :  { %v435_v2 = vrot.slane %v426_v1, 4  ;;  %v441_v3 = vmul.f32 %v426_v1, %v426_v1 }
  0xc3   :  { %v436_v4 = vadd.f32 %v435_v2, %v426_v1  ;;  %v442_v5 = vrot.slane %v441_v3, 4 }
  0xc5   :  { %v437_v6 = vrot.slane %v436_v4, 2  ;;  %v443_v7 = vadd.f32 %v442_v5, %v441_v3 }
  0xc6   :  { %v427_v8 = vpop.f32.mrf.mxu0 }
  0xc7   :  { %v438_v9 = vadd.f32 %v437_v6, %v436_v4  ;;  %v444_v10 = vrot.slane %v443_v7, 2 }
  0xc9   :  { %v439_v11 = vrot.slane %v438_v9, 1  ;;  %v445_v12 = vadd.f32 %v444_v10, %v443_v7 }
  0xcb   :  { %v440_v13 = vadd.f32 %v439_v11, %v438_v9  ;;  %v446_v14 = vrot.slane %v445_v12, 1 }
  0xcd   :  { %v447_v15 = vadd.f32 %v446_v14, %v445_v12  ;;  %v448_v16 = vmul.f32 0.125, %v440_v13 }
  0xcf   :  { %v449_v17 = vmul.f32 0.125, %v447_v15  ;;  %v450_v18 = vmul.f32 %v448_v16, %v448_v16  ;;  %v465_v30 = vsub.f32 %v426_v1, %v448_v16 }
  0xd1   :  { %v451_v19 = vsub.f32 %v449_v17, %v450_v18 }
  0xd3   :  { %v453_v20 = vadd.f32 1e-05, %v451_v19 }
  0xd5   :  { %682 = vrsqrt.f32 %v453_v20  ;;  %vm460_vm1 = vweird.f32 %v453_v20 }
  0xdb   :  { %v683_v21 = vpop.eup %682 }
  0xdc   :  { %v455_v22 = vmul.f32 %v683_v21, %v453_v20  ;;  %vm461_vm0 = vweird.f32 %v683_v21 }
  0xdd   :  { %vm462_vm2 = vmor %vm460_vm1, %vm461_vm0 }
  0xde   :  { %v456_v23 = vmul.f32 %v683_v21, %v455_v22 }
  0xe0   :  { %v457_v24 = vmul.f32 0.5, %v456_v23 }
  0xe2   :  { %v458_v25 = vsub.f32 1.5, %v457_v24 }
  0xe4   :  { %v459_v27 = vmul.f32 %v683_v21, %v458_v25 }
  0xe6   :  { %v463_v28 = vsel %vm462_vm2, %v683_v21, %v459_v27 }
  0xe7   :  { %v464_v29 = vmul.f32 %v463_v28, %v452_v26 }
  0xe9   :  { %v467_v31 = vperm.slane %v464_v29, 0 }
  0xeb   :  { %v469_v33 = vmul.f32 %v467_v31, %v465_v30 }
  0xed   :  { %v474_v34 = vadd.f32 %v681_v32, %v469_v33 }
  0xef   :  { %v475_v35 = vmax.f32 %v474_v34, 0.0 }
  0xf1   :  { %476 = vst [vmem:[%s851_s4] sm:$0xff] %v475_v35 }

// kernel: fuse_model_forward.45
= control target key start
LH: loop header
LB: loop body
LE: loop exit
PB: predicated region body
PF: predicated region fallthrough
CT: control target
= control target key end

     0   :  { %s1008_s18 = smov 0   ;;  %s1010_s19 = smov 0   ;;  %s1089_s0 = inlined_call_operand.vmem [shape: bf16[8,1152], index: 0, kind: input, shape index: {}]   ;;  %s1090_s1 = inlined_call_operand.vmem [shape: bf16[1152,128], index: 1, kind: input, shape index: {}]   ;;  %s1091_s2 = inlined_call_operand.vmem [shape: f32[1,128], index: 2, kind: input, shape index: {}]   ;;  %s1092_s3 = inlined_call_operand.vmem [shape: f32[1,128], index: 3, kind: input, shape index: {}]   ;;  %s1093_s4 = inlined_call_operand.vmem [shape: f32[8,128], index: 4, kind: input, shape index: {}]   ;;  %s1094_s5 = inlined_call_operand.vmem [shape: f32[8,128], index: 5, kind: output, shape index: {}]  }
   0x1   :  { %s1012_s20 = smov 0  }
   0x2 LB: > { %s27_s21 = sadd.s32 1, %s971_s19  ;;  %p797_p0 = scmp.ge.s32.totalorder %s975_s20, 1  ;;  %s975_s20 = sphi %s1012_s20, %s15_s20   ;;  %s971_s19 = sphi %s1010_s19, %s1096_s19   ;;  %s967_s18 = sphi %s1008_s18, %s1095_s18  }
   0x3   : > { %p28_p1 = scmp.ge.s32.totalorder %s27_s21, 3  ;;  %p261_p2 = scmp.lt.s32.totalorder %s975_s20, 4 }
   0x5   : > { %s1098_s21 = smov (%p28_p1, %s27_s21), 0  ;;  %p262_p3 = pnand %p797_p0, %p261_p2 }
   0x6   : > { %s316_s22 = smul.u32 (!%p262_p3), 3, %s967_s18  ;;  %p800_p6 = scmp.ne.s32.totalorder (!%p262_p3), %s967_s18, 0 }
   0x7   : > { %265 = sbr.rel (%p262_p3) target bundleno = 251 (0xfb), region = 40 }
   0x8   : > { %s326_s23 = smul.u32 (!%p262_p3), 48, %s967_s18  ;;  %p319_p4 = scmp.lt.s32.totalorder (!%p262_p3), %s316_s22, 8 }
   0xa   : > { %p327_p5 = scmp.lt.s32.totalorder (!%p262_p3), %s326_s23, 143 }
   0xc   : > { %s1100_s22 = smov (!%p319_p4, %s316_s22), 8  ;;  %s1102_s23 = smov (!%p327_p5, %s326_s23), 143 }
   0xd   : > { %s798_s24 = sshll.u32 %s1100_s22, 2  ;;  %s799_s28 = sshll.u32 %s1102_s23, 2 }
   0xe   : > { %s1033_s27 = scalar_lea.vmem %s1089_s0, %s798_s24  ;;  %s1038_s6 = scalar_lea.vmem %s1090_s1, %s799_s28 }
   0xf   : > { %358 = sbr.rel (%p800_p6) target bundleno = 22 (0x16), region = 44 }
  0x14   : > { %v977_v0 = vmov 0.0  }
  0x15   : > { %359 = vst [vmem:[#allocation2] sm:$0xff] %v977_v0 }
  0x16 PF: > { %v908_v1 = vld [vmem:[%s1038_s6 + $0x38] sm:$0xff]  ;;  %v907_v4 = vld [vmem:[%s1038_s6 + $0x30] sm:$0xff]  ;;  %v906_v7 = vld [vmem:[%s1038_s6 + $0x28] sm:$0xff]  ;;  %p897_p7 = scmp.ne.s32.totalorder %s967_s18, 2 }
  0x17   : > { %v916_v2 = vld [vmem:[%s1038_s6 + $0x78] sm:$0xff]  ;;  %566 = vmatpush.bf16.msra.mxu0 %v908_v1  ;;  %v915_v5 = vld [vmem:[%s1038_s6 + $0x70] sm:$0xff]  ;;  %v914_v8 = vld [vmem:[%s1038_s6 + $0x68] sm:$0xff] }
  0x18   : > { %v924_v3 = vld [vmem:[%s1038_s6 + $0xb8] sm:$0xff]  ;;  %579 = vmatpush.bf16.msra.mxu1 %v916_v2  ;;  %v923_v6 = vld [vmem:[%s1038_s6 + $0xb0] sm:$0xff]  ;;  %v922_v9 = vld [vmem:[%s1038_s6 + $0xa8] sm:$0xff] }
  0x19   : > { %592 = vmatpush.bf16.msra.mxu2 %v924_v3  ;;  %v905_v10 = vld [vmem:[%s1038_s6 + $0x20] sm:$0xff]  ;;  %v904_v13 = vld [vmem:[%s1038_s6 + $0x18] sm:$0xff]  ;;  %v903_v16 = vld [vmem:[%s1038_s6 + $0x10] sm:$0xff] }
  0x1a   : > { %v913_v11 = vld [vmem:[%s1038_s6 + $0x60] sm:$0xff]  ;;  %v912_v14 = vld [vmem:[%s1038_s6 + $0x58] sm:$0xff]  ;;  %v911_v17 = vld [vmem:[%s1038_s6 + $0x50] sm:$0xff] }
  0x1b   : > { %567 = vmatpush.bf16.msra.mxu0 %v907_v4  ;;  %v921_v12 = vld [vmem:[%s1038_s6 + $0xa0] sm:$0xff]  ;;  %v920_v15 = vld [vmem:[%s1038_s6 + $0x98] sm:$0xff]  ;;  %v919_v18 = vld [vmem:[%s1038_s6 + $0x90] sm:$0xff] }
  0x1c   : > { %580 = vmatpush.bf16.msra.mxu1 %v915_v5  ;;  %v902_v19 = vld [vmem:[%s1038_s6 + $0x8] sm:$0xff]  ;;  %v361_v21 = vld [vmem:[%s1033_s27] sm:$0xff] }
  0x1d   : > { %593 = vmatpush.bf16.msra.mxu2 %v923_v6  ;;  %v910_v20 = vld [vmem:[%s1038_s6 + $0x48] sm:$0xff]  ;;  %v413_v24 = vunpack.c.l.b16 %v361_v21  ;;  %v414_v25 = vunpack.c.h.b16 %v361_v21  ;;  %v901_v26 = vld [vmem:[%s1038_s6] sm:$0xff] }
  0x1e   : > { %v918_v22 = vld [vmem:[%s1038_s6 + $0x88] sm:$0xff]  ;;  %v909_v27 = vld [vmem:[%s1038_s6 + $0x40] sm:$0xff] }
  0x1f   : > { %568 = vmatpush.bf16.msra.mxu0 %v906_v7  ;;  %v362_v23 = vld [vmem:[%s1033_s27 + $0x8] sm:$0xf]  ;;  %v917_v29 = vld [vmem:[%s1038_s6 + $0x80] sm:$0xff]  ;;  %v416_v30 = vpack.c.b16 %v413_v24, %v413_v24  ;;  %v417_v31 = vpack.c.b16 %v414_v25, %v414_v25 }
  0x20   : > { %581 = vmatpush.bf16.msra.mxu1 %v914_v8  ;;  %v415_v28 = vunpack.c.l.b16 %v362_v23  ;;  %v360_v36 = vld [vmem:[#allocation2] sm:$0xff] }
  0x21   : > { %594 = vmatpush.bf16.msra.mxu2 %v922_v9 }
  0x22   : > { %v418_v32 = vpack.c.b16 %v415_v28, %v415_v28 }
  0x23   : > { %569 = vmatpush.bf16.msra.mxu0 %v905_v10 }
  0x24   : > { %582 = vmatpush.bf16.msra.mxu1 %v913_v11 }
  0x25   : > { %595 = vmatpush.bf16.msra.mxu2 %v921_v12 }
  0x27   : > { %570 = vmatpush.bf16.msra.mxu0 %v904_v13 }
  0x28   : > { %583 = vmatpush.bf16.msra.mxu1 %v912_v14 }
  0x29   : > { %596 = vmatpush.bf16.msra.mxu2 %v920_v15 }
  0x2b   : > { %571 = vmatpush.bf16.msra.mxu0 %v903_v16 }
  0x2c   : > { %584 = vmatpush.bf16.msra.mxu1 %v911_v17 }
  0x2d   : > { %597 = vmatpush.bf16.msra.mxu2 %v919_v18 }
  0x2f   : > { %572 = vmatpush.bf16.msra.mxu0 %v902_v19 }
  0x30   : > { %585 = vmatpush.bf16.msra.mxu1 %v910_v20 }
  0x31   : > { %598 = vmatpush.bf16.msra.mxu2 %v918_v22 }
  0x33   : > { %573 = vmatpush.bf16.msra.mxu0 %v901_v26 }
  0x34   : > { %586 = vmatpush.bf16.msra.mxu1 %v909_v27 }
  0x35   : > { %599 = vmatpush.bf16.msra.mxu2 %v917_v29 }
  0x36   : > { %574 = vmatmul.bf16.vlgmr.msra.gmra.mxu0 %v416_v30 }
  0x37   : > { %587 = vmatmul.bf16.vlgmr.msra.gmra.mxu1 %v417_v31 }
  0x38   : > { %600 = vmatmul.bf16.vlgmr.msra.gmra.mxu2 %v418_v32 }
  0xb3   : > { %v575_v33 = vpop.f32.mrf.mxu0 }
  0xb4   : > { %v588_v34 = vpop.f32.mrf.mxu1 }
  0xb5   : > { %v589_v35 = vadd.f32 %v588_v34, %v575_v33 }
  0xbb   : > { %v601_v37 = vpop.f32.mrf.mxu2  ;;  %v577_v39 = vpop.f32.mrf.mxu0 }
  0xbc   : > { %v602_v38 = vadd.f32 %v601_v37, %v589_v35  ;;  %v590_v40 = vpop.f32.mrf.mxu1 }
  0xbe   : > { %v605_v41 = vadd.f32 %v602_v38, %v360_v36 }
  0xbf   : > { %610 = sbr.rel (%p897_p7) target bundleno = 251 (0xfb), region = 48 }
  0xc0   : > { %606 = vst [vmem:[#allocation2] sm:$0xff] %v605_v41 }
  0xc3   : > { %v603_v42 = vpop.f32.mrf.mxu2 }
  0xc4   : > { %v629_v3 = vld [vmem:[%s1091_s2] sm:$0x1] }
  0xc5   : > { %v950_v9 = vld [vmem:[%s1092_s3] ss:$0 sm:$0xff] }
  0xc6   : > { %v652_v11 = vld [vmem:[%s1093_s4] sm:$0xff] }
  0xc7   : > { %v611_v43 = vld [vmem:[#allocation2] sm:$0xff] }
  0xc8   : > { %v612_v44 = vrot.slane %v611_v43, 4  ;;  %v618_v45 = vmul.f32 %v611_v43, %v611_v43 }
  0xca   : > { %v613_v46 = vadd.f32 %v612_v44, %v611_v43  ;;  %v619_v47 = vrot.slane %v618_v45, 4 }
  0xcc   : > { %v614_v48 = vrot.slane %v613_v46, 2  ;;  %v620_v49 = vadd.f32 %v619_v47, %v618_v45 }
  0xce   : > { %v615_v50 = vadd.f32 %v614_v48, %v613_v46  ;;  %v621_v51 = vrot.slane %v620_v49, 2 }
  0xd0   : > { %v616_v52 = vrot.slane %v615_v50, 1  ;;  %v622_v53 = vadd.f32 %v621_v51, %v620_v49 }
  0xd2   : > { %v617_v54 = vadd.f32 %v616_v52, %v615_v50  ;;  %v623_v55 = vrot.slane %v622_v53, 1 }
  0xd4   : > { %v624_v56 = vadd.f32 %v623_v55, %v622_v53  ;;  %v625_v57 = vmul.f32 0.125, %v617_v54 }
  0xd6   : > { %v626_v58 = vmul.f32 0.125, %v624_v56  ;;  %v627_v59 = vmul.f32 %v625_v57, %v625_v57  ;;  %v642_v7 = vsub.f32 %v611_v43, %v625_v57 }
  0xd8   : > { %v628_v60 = vsub.f32 %v626_v58, %v627_v59 }
  0xda   : > { %v630_v61 = vadd.f32 1e-05, %v628_v60 }
  0xdc   : > { %951 = vrsqrt.f32 %v630_v61  ;;  %vm637_vm0 = vweird.f32 %v630_v61 }
  0xe2   : > { %v952_v62 = vpop.eup %951 }
  0xe3   : > { %v632_v63 = vmul.f32 %v952_v62, %v630_v61  ;;  %vm638_vm1 = vweird.f32 %v952_v62 }
  0xe4   : > { %vm639_vm2 = vmor %vm637_vm0, %vm638_vm1 }
  0xe5   : > { %v633_v0 = vmul.f32 %v952_v62, %v632_v63 }
  0xe7   : > { %v634_v1 = vmul.f32 0.5, %v633_v0 }
  0xe9   : > { %v635_v2 = vsub.f32 1.5, %v634_v1 }
  0xeb   : > { %v636_v4 = vmul.f32 %v952_v62, %v635_v2 }
  0xed   : > { %v640_v5 = vsel %vm639_vm2, %v952_v62, %v636_v4 }
  0xee   : > { %v641_v6 = vmul.f32 %v640_v5, %v629_v3 }
  0xf0   : > { %v644_v8 = vperm.slane %v641_v6, 0 }
  0xf2   : > { %v646_v10 = vmul.f32 %v644_v8, %v642_v7 }
  0xf4   : > { %v651_v12 = vadd.f32 %v950_v9, %v646_v10 }
  0xf6   : > { %v653_v13 = vadd.f32 %v652_v11, %v651_v12 }
  0xf8   : > { %v654_v14 = vmax.f32 %v653_v13, 0.0 }
  0xfa   : > { %655 = vst [vmem:[%s1094_s5] sm:$0xff] %v654_v14 }
  0xfb PF: > { %s15_s20 = sadd.s32 1, %s975_s20   ;;  %s1095_s18 = smov %s971_s19 }
  0xfc   : > { %p12_p8 = scmp.ge.s32.totalorder %s15_s20, 5   ;;  %s1096_s19 = smov %s1098_s21 }
  0xfe   :  { %14 = sbr.rel (!%p12_p8) target bundleno = 2 (0x2), region = 90 }

// kernel: fuse_model_forward.46
= control target key start
LH: loop header
LB: loop body
LE: loop exit
PB: predicated region body
PF: predicated region fallthrough
CT: control target
= control target key end

     0   :  { %s927_s15 = smov 0   ;;  %s929_s16 = smov 0   ;;  %s1005_s0 = inlined_call_operand.vmem [shape: bf16[8,1152], index: 0, kind: input, shape index: {}]   ;;  %s1006_s1 = inlined_call_operand.vmem [shape: bf16[1152,128], index: 1, kind: input, shape index: {}]   ;;  %s1007_s2 = inlined_call_operand.vmem [shape: f32[1,128], index: 2, kind: input, shape index: {}]   ;;  %s1008_s3 = inlined_call_operand.vmem [shape: f32[1,128], index: 3, kind: input, shape index: {}]   ;;  %s1009_s4 = inlined_call_operand.vmem [shape: f32[8,128], index: 4, kind: output, shape index: {}]  }
   0x1   :  { %s931_s17 = smov 0  }
   0x2 LB: > { %s26_s18 = sadd.s32 1, %s895_s16  ;;  %p721_p0 = scmp.ge.s32.totalorder %s899_s17, 1  ;;  %s899_s17 = sphi %s931_s17, %s14_s17   ;;  %s895_s16 = sphi %s929_s16, %s1011_s16   ;;  %s891_s15 = sphi %s927_s15, %s1010_s15  }
   0x3   : > { %p27_p1 = scmp.ge.s32.totalorder %s26_s18, 3  ;;  %p222_p2 = scmp.lt.s32.totalorder %s899_s17, 4 }
   0x5   : > { %s1013_s18 = smov (%p27_p1, %s26_s18), 0  ;;  %p223_p3 = pnand %p721_p0, %p222_p2 }
   0x6   : > { %s268_s19 = smul.u32 (!%p223_p3), 3, %s891_s15  ;;  %p724_p6 = scmp.ne.s32.totalorder (!%p223_p3), %s891_s15, 0 }
   0x7   : > { %226 = sbr.rel (%p223_p3) target bundleno = 249 (0xf9), region = 36 }
   0x8   : > { %s278_s20 = smul.u32 (!%p223_p3), 48, %s891_s15  ;;  %p271_p4 = scmp.lt.s32.totalorder (!%p223_p3), %s268_s19, 8 }
   0xa   : > { %p279_p5 = scmp.lt.s32.totalorder (!%p223_p3), %s278_s20, 143 }
   0xc   : > { %s1015_s19 = smov (!%p271_p4, %s268_s19), 8  ;;  %s1017_s20 = smov (!%p279_p5, %s278_s20), 143 }
   0xd   : > { %s722_s21 = sshll.u32 %s1015_s19, 2  ;;  %s723_s25 = sshll.u32 %s1017_s20, 2 }
   0xe   : > { %s952_s24 = scalar_lea.vmem %s1005_s0, %s722_s21  ;;  %s957_s28 = scalar_lea.vmem %s1006_s1, %s723_s25 }
   0xf   : > { %303 = sbr.rel (%p724_p6) target bundleno = 22 (0x16), region = 40 }
  0x14   : > { %v901_v0 = vmov 0.0  }
  0x15   : > { %304 = vst [vmem:[#allocation2] sm:$0xff] %v901_v0 }
  0x16 PF: > { %v832_v1 = vld [vmem:[%s957_s28 + $0x38] sm:$0xff]  ;;  %v831_v4 = vld [vmem:[%s957_s28 + $0x30] sm:$0xff]  ;;  %v830_v7 = vld [vmem:[%s957_s28 + $0x28] sm:$0xff]  ;;  %p821_p7 = scmp.ne.s32.totalorder %s891_s15, 2 }
  0x17   : > { %v840_v2 = vld [vmem:[%s957_s28 + $0x78] sm:$0xff]  ;;  %511 = vmatpush.bf16.msra.mxu0 %v832_v1  ;;  %v839_v5 = vld [vmem:[%s957_s28 + $0x70] sm:$0xff]  ;;  %v838_v8 = vld [vmem:[%s957_s28 + $0x68] sm:$0xff] }
  0x18   : > { %v848_v3 = vld [vmem:[%s957_s28 + $0xb8] sm:$0xff]  ;;  %524 = vmatpush.bf16.msra.mxu1 %v840_v2  ;;  %v847_v6 = vld [vmem:[%s957_s28 + $0xb0] sm:$0xff]  ;;  %v846_v9 = vld [vmem:[%s957_s28 + $0xa8] sm:$0xff] }
  0x19   : > { %537 = vmatpush.bf16.msra.mxu2 %v848_v3  ;;  %v829_v10 = vld [vmem:[%s957_s28 + $0x20] sm:$0xff]  ;;  %v828_v13 = vld [vmem:[%s957_s28 + $0x18] sm:$0xff]  ;;  %v827_v16 = vld [vmem:[%s957_s28 + $0x10] sm:$0xff] }
  0x1a   : > { %v837_v11 = vld [vmem:[%s957_s28 + $0x60] sm:$0xff]  ;;  %v836_v14 = vld [vmem:[%s957_s28 + $0x58] sm:$0xff]  ;;  %v835_v17 = vld [vmem:[%s957_s28 + $0x50] sm:$0xff] }
  0x1b   : > { %512 = vmatpush.bf16.msra.mxu0 %v831_v4  ;;  %v845_v12 = vld [vmem:[%s957_s28 + $0xa0] sm:$0xff]  ;;  %v844_v15 = vld [vmem:[%s957_s28 + $0x98] sm:$0xff]  ;;  %v843_v18 = vld [vmem:[%s957_s28 + $0x90] sm:$0xff] }
  0x1c   : > { %525 = vmatpush.bf16.msra.mxu1 %v839_v5  ;;  %v826_v19 = vld [vmem:[%s957_s28 + $0x8] sm:$0xff]  ;;  %v306_v21 = vld [vmem:[%s952_s24] sm:$0xff] }
  0x1d   : > { %538 = vmatpush.bf16.msra.mxu2 %v847_v6  ;;  %v834_v20 = vld [vmem:[%s957_s28 + $0x48] sm:$0xff]  ;;  %v358_v24 = vunpack.c.l.b16 %v306_v21  ;;  %v359_v25 = vunpack.c.h.b16 %v306_v21  ;;  %v825_v26 = vld [vmem:[%s957_s28] sm:$0xff] }
  0x1e   : > { %v842_v22 = vld [vmem:[%s957_s28 + $0x88] sm:$0xff]  ;;  %v833_v27 = vld [vmem:[%s957_s28 + $0x40] sm:$0xff] }
  0x1f   : > { %513 = vmatpush.bf16.msra.mxu0 %v830_v7  ;;  %v307_v23 = vld [vmem:[%s952_s24 + $0x8] sm:$0xf]  ;;  %v841_v29 = vld [vmem:[%s957_s28 + $0x80] sm:$0xff]  ;;  %v361_v30 = vpack.c.b16 %v358_v24, %v358_v24  ;;  %v362_v31 = vpack.c.b16 %v359_v25, %v359_v25 }
  0x20   : > { %526 = vmatpush.bf16.msra.mxu1 %v838_v8  ;;  %v360_v28 = vunpack.c.l.b16 %v307_v23  ;;  %v305_v36 = vld [vmem:[#allocation2] sm:$0xff] }
  0x21   : > { %539 = vmatpush.bf16.msra.mxu2 %v846_v9 }
  0x22   : > { %v363_v32 = vpack.c.b16 %v360_v28, %v360_v28 }
  0x23   : > { %514 = vmatpush.bf16.msra.mxu0 %v829_v10 }
  0x24   : > { %527 = vmatpush.bf16.msra.mxu1 %v837_v11 }
  0x25   : > { %540 = vmatpush.bf16.msra.mxu2 %v845_v12 }
  0x27   : > { %515 = vmatpush.bf16.msra.mxu0 %v828_v13 }
  0x28   : > { %528 = vmatpush.bf16.msra.mxu1 %v836_v14 }
  0x29   : > { %541 = vmatpush.bf16.msra.mxu2 %v844_v15 }
  0x2b   : > { %516 = vmatpush.bf16.msra.mxu0 %v827_v16 }
  0x2c   : > { %529 = vmatpush.bf16.msra.mxu1 %v835_v17 }
  0x2d   : > { %542 = vmatpush.bf16.msra.mxu2 %v843_v18 }
  0x2f   : > { %517 = vmatpush.bf16.msra.mxu0 %v826_v19 }
  0x30   : > { %530 = vmatpush.bf16.msra.mxu1 %v834_v20 }
  0x31   : > { %543 = vmatpush.bf16.msra.mxu2 %v842_v22 }
  0x33   : > { %518 = vmatpush.bf16.msra.mxu0 %v825_v26 }
  0x34   : > { %531 = vmatpush.bf16.msra.mxu1 %v833_v27 }
  0x35   : > { %544 = vmatpush.bf16.msra.mxu2 %v841_v29 }
  0x36   : > { %519 = vmatmul.bf16.vlgmr.msra.gmra.mxu0 %v361_v30 }
  0x37   : > { %532 = vmatmul.bf16.vlgmr.msra.gmra.mxu1 %v362_v31 }
  0x38   : > { %545 = vmatmul.bf16.vlgmr.msra.gmra.mxu2 %v363_v32 }
  0xb3   : > { %v520_v33 = vpop.f32.mrf.mxu0 }
  0xb4   : > { %v533_v34 = vpop.f32.mrf.mxu1 }
  0xb5   : > { %v534_v35 = vadd.f32 %v533_v34, %v520_v33 }
  0xbb   : > { %v546_v37 = vpop.f32.mrf.mxu2  ;;  %v522_v39 = vpop.f32.mrf.mxu0 }
  0xbc   : > { %v547_v38 = vadd.f32 %v546_v37, %v534_v35  ;;  %v535_v40 = vpop.f32.mrf.mxu1 }
  0xbe   : > { %v550_v41 = vadd.f32 %v547_v38, %v305_v36 }
  0xbf   : > { %555 = sbr.rel (%p821_p7) target bundleno = 249 (0xf9), region = 44 }
  0xc0   : > { %551 = vst [vmem:[#allocation2] sm:$0xff] %v550_v41 }
  0xc3   : > { %v548_v42 = vpop.f32.mrf.mxu2 }
  0xc4   : > { %v574_v3 = vld [vmem:[%s1007_s2] sm:$0x1] }
  0xc5   : > { %v874_v9 = vld [vmem:[%s1008_s3] ss:$0 sm:$0xff] }
  0xc7   : > { %v556_v43 = vld [vmem:[#allocation2] sm:$0xff] }
  0xc8   : > { %v557_v44 = vrot.slane %v556_v43, 4  ;;  %v563_v45 = vmul.f32 %v556_v43, %v556_v43 }
  0xca   : > { %v558_v46 = vadd.f32 %v557_v44, %v556_v43  ;;  %v564_v47 = vrot.slane %v563_v45, 4 }
  0xcc   : > { %v559_v48 = vrot.slane %v558_v46, 2  ;;  %v565_v49 = vadd.f32 %v564_v47, %v563_v45 }
  0xce   : > { %v560_v50 = vadd.f32 %v559_v48, %v558_v46  ;;  %v566_v51 = vrot.slane %v565_v49, 2 }
  0xd0   : > { %v561_v52 = vrot.slane %v560_v50, 1  ;;  %v567_v53 = vadd.f32 %v566_v51, %v565_v49 }
  0xd2   : > { %v562_v54 = vadd.f32 %v561_v52, %v560_v50  ;;  %v568_v55 = vrot.slane %v567_v53, 1 }
  0xd4   : > { %v569_v56 = vadd.f32 %v568_v55, %v567_v53  ;;  %v570_v57 = vmul.f32 0.125, %v562_v54 }
  0xd6   : > { %v571_v58 = vmul.f32 0.125, %v569_v56  ;;  %v572_v59 = vmul.f32 %v570_v57, %v570_v57  ;;  %v587_v7 = vsub.f32 %v556_v43, %v570_v57 }
  0xd8   : > { %v573_v60 = vsub.f32 %v571_v58, %v572_v59 }
  0xda   : > { %v575_v61 = vadd.f32 1e-05, %v573_v60 }
  0xdc   : > { %875 = vrsqrt.f32 %v575_v61  ;;  %vm582_vm0 = vweird.f32 %v575_v61 }
  0xe2   : > { %v876_v62 = vpop.eup %875 }
  0xe3   : > { %v577_v63 = vmul.f32 %v876_v62, %v575_v61  ;;  %vm583_vm1 = vweird.f32 %v876_v62 }
  0xe4   : > { %vm584_vm2 = vmor %vm582_vm0, %vm583_vm1 }
  0xe5   : > { %v578_v0 = vmul.f32 %v876_v62, %v577_v63 }
  0xe7   : > { %v579_v1 = vmul.f32 0.5, %v578_v0 }
  0xe9   : > { %v580_v2 = vsub.f32 1.5, %v579_v1 }
  0xeb   : > { %v581_v4 = vmul.f32 %v876_v62, %v580_v2 }
  0xed   : > { %v585_v5 = vsel %vm584_vm2, %v876_v62, %v581_v4 }
  0xee   : > { %v586_v6 = vmul.f32 %v585_v5, %v574_v3 }
  0xf0   : > { %v589_v8 = vperm.slane %v586_v6, 0 }
  0xf2   : > { %v591_v10 = vmul.f32 %v589_v8, %v587_v7 }
  0xf4   : > { %v596_v11 = vadd.f32 %v874_v9, %v591_v10 }
  0xf6   : > { %v597_v12 = vmax.f32 %v596_v11, 0.0 }
  0xf8   : > { %598 = vst [vmem:[%s1009_s4] sm:$0xff] %v597_v12 }
  0xf9 PF: > { %s14_s17 = sadd.s32 1, %s899_s17   ;;  %s1010_s15 = smov %s895_s16 }
  0xfa   : > { %p11_p8 = scmp.ge.s32.totalorder %s14_s17, 5   ;;  %s1011_s16 = smov %s1013_s18 }
  0xfc   :  { %13 = sbr.rel (!%p11_p8) target bundleno = 2 (0x2), region = 83 }

// kernel: fuse_model_forward.68
= control target key start
LH: loop header
LB: loop body
LE: loop exit
PB: predicated region body
PF: predicated region fallthrough
CT: control target
= control target key end

     0   :  { %s208_s1 = inlined_call_operand.vmem [shape: bf16[128,128], index: 1, kind: input, shape index: {}]   ;;  %s209_s2 = inlined_call_operand.vmem [shape: f32[1,128], index: 2, kind: input, shape index: {}]   ;;  %s210_s0 = inlined_call_operand.vmem [shape: bf16[8,128], index: 0, kind: input, shape index: {}]   ;;  %s211_s3 = inlined_call_operand.vmem [shape: f32[8,128], index: 3, kind: output, shape index: {}]  }
   0x1   :  { %v153_v0 = vld [vmem:[%s208_s1 + $0x38] sm:$0xff]  ;;  %v152_v1 = vld [vmem:[%s208_s1 + $0x30] sm:$0xff]  ;;  %v151_v2 = vld [vmem:[%s208_s1 + $0x28] sm:$0xff] }
   0x2   :  { %85 = vmatpush.bf16.msra.mxu0 %v153_v0  ;;  %v150_v3 = vld [vmem:[%s208_s1 + $0x20] sm:$0xff]  ;;  %v149_v4 = vld [vmem:[%s208_s1 + $0x18] sm:$0xff]  ;;  %v148_v5 = vld [vmem:[%s208_s1 + $0x10] sm:$0xff] }
   0x3   :  { %v147_v6 = vld [vmem:[%s208_s1 + $0x8] sm:$0xff]  ;;  %v146_v7 = vld [vmem:[%s208_s1] sm:$0xff] }
   0x4   :  { %v20_v8 = vld [vmem:[%s210_s0] sm:$0xf] }
   0x5   :  { %v154_v9 = vld [vmem:[%s209_s2] ss:$0 sm:$0xff] }
   0x6   :  { %86 = vmatpush.bf16.msra.mxu0 %v152_v1 }
   0xa   :  { %87 = vmatpush.bf16.msra.mxu0 %v151_v2 }
   0xe   :  { %88 = vmatpush.bf16.msra.mxu0 %v150_v3 }
  0x12   :  { %89 = vmatpush.bf16.msra.mxu0 %v149_v4 }
  0x16   :  { %90 = vmatpush.bf16.msra.mxu0 %v148_v5 }
  0x1a   :  { %91 = vmatpush.bf16.msra.mxu0 %v147_v6 }
  0x1e   :  { %92 = vmatpush.bf16.msra.mxu0 %v146_v7 }
  0x21   :  { %93 = vmatmul.bf16.vlgmr.msra.gmra.mxu0 %v20_v8 }
  0x9e   :  { %v94_v10 = vpop.f32.mrf.mxu0 }
  0x9f   :  { %v108_v11 = vadd.f32 %v154_v9, %v94_v10 }
  0xa1   :  { %109 = vst [vmem:[%s211_s3] sm:$0xff] %v108_v11 }
  0xa6   :  { %v96_v12 = vpop.f32.mrf.mxu0 }

// kernel: fuse_model_forward.69
= control target key start
LH: loop header
LB: loop body
LE: loop exit
PB: predicated region body
PF: predicated region fallthrough
CT: control target
= control target key end

     0   :  { %s376_s1 = inlined_call_operand.vmem [shape: bf16[128,256], index: 1, kind: input, shape index: {}]   ;;  %s377_s0 = inlined_call_operand.vmem [shape: bf16[8,128], index: 0, kind: input, shape index: {}]   ;;  %s378_s2 = inlined_call_operand.vmem [shape: f32[1,256], index: 2, kind: input, shape index: {}]   ;;  %s379_s3 = inlined_call_operand.vmem [shape: f32[8,256], index: 3, kind: output, shape index: {}]  }
   0x1   :  { %v226_v0 = vld [vmem:[%s376_s1 + $0x70] sm:$0xf]  ;;  %v247_v1 = vld [vmem:[%s376_s1 + $0x74] sm:$0xf0]  ;;  %v246_v2 = vld [vmem:[%s376_s1 + $0x74] sm:$0xf] }
   0x2   :  { %v227_v3 = vor.u32 %v247_v1, %v226_v0  ;;  %v228_v4 = vld [vmem:[%s376_s1 + $0x78] sm:$0xf0]  ;;  %v218_v5 = vld [vmem:[%s376_s1 + $0x60] sm:$0xf]  ;;  %v245_v6 = vld [vmem:[%s376_s1 + $0x64] sm:$0xf0] }
   0x3   :  { %v231_v7 = vor.u32 %v246_v2, %v228_v4  ;;  %v244_v8 = vld [vmem:[%s376_s1 + $0x64] sm:$0xf]  ;;  %v220_v9 = vld [vmem:[%s376_s1 + $0x68] sm:$0xf0]  ;;  %v219_v10 = vor.u32 %v245_v6, %v218_v5  ;;  %v210_v12 = vld [vmem:[%s376_s1 + $0x50] sm:$0xf] }
   0x4   :  { %119 = vmatpush.bf16.msra.mxu0 %v227_v3  ;;  %v223_v11 = vor.u32 %v244_v8, %v220_v9  ;;  %v243_v13 = vld [vmem:[%s376_s1 + $0x54] sm:$0xf0]  ;;  %v242_v14 = vld [vmem:[%s376_s1 + $0x54] sm:$0xf]  ;;  %v212_v15 = vld [vmem:[%s376_s1 + $0x58] sm:$0xf0] }
   0x5   :  { %132 = vmatpush.bf16.msra.mxu1 %v231_v7  ;;  %v211_v16 = vor.u32 %v243_v13, %v210_v12  ;;  %v215_v17 = vor.u32 %v242_v14, %v212_v15  ;;  %v202_v18 = vld [vmem:[%s376_s1 + $0x40] sm:$0xf]  ;;  %v241_v19 = vld [vmem:[%s376_s1 + $0x44] sm:$0xf0]  ;;  %v240_v20 = vld [vmem:[%s376_s1 + $0x44] sm:$0xf] }
   0x6   :  { %v204_v21 = vld [vmem:[%s376_s1 + $0x48] sm:$0xf0]  ;;  %v203_v22 = vor.u32 %v241_v19, %v202_v18  ;;  %v194_v24 = vld [vmem:[%s376_s1 + $0x30] sm:$0xf]  ;;  %v239_v25 = vld [vmem:[%s376_s1 + $0x34] sm:$0xf0] }
   0x7   :  { %v207_v23 = vor.u32 %v240_v20, %v204_v21  ;;  %v238_v26 = vld [vmem:[%s376_s1 + $0x34] sm:$0xf]  ;;  %v196_v27 = vld [vmem:[%s376_s1 + $0x38] sm:$0xf0]  ;;  %v195_v28 = vor.u32 %v239_v25, %v194_v24  ;;  %v186_v30 = vld [vmem:[%s376_s1 + $0x20] sm:$0xf] }
   0x8   :  { %120 = vmatpush.bf16.msra.mxu0 %v219_v10  ;;  %v199_v29 = vor.u32 %v238_v26, %v196_v27  ;;  %v237_v31 = vld [vmem:[%s376_s1 + $0x24] sm:$0xf0]  ;;  %v236_v32 = vld [vmem:[%s376_s1 + $0x24] sm:$0xf]  ;;  %v188_v33 = vld [vmem:[%s376_s1 + $0x28] sm:$0xf0] }
   0x9   :  { %133 = vmatpush.bf16.msra.mxu1 %v223_v11  ;;  %v187_v34 = vor.u32 %v237_v31, %v186_v30  ;;  %v191_v35 = vor.u32 %v236_v32, %v188_v33  ;;  %v178_v36 = vld [vmem:[%s376_s1 + $0x10] sm:$0xf]  ;;  %v235_v37 = vld [vmem:[%s376_s1 + $0x14] sm:$0xf0]  ;;  %v234_v38 = vld [vmem:[%s376_s1 + $0x14] sm:$0xf] }
   0xa   :  { %v180_v39 = vld [vmem:[%s376_s1 + $0x18] sm:$0xf0]  ;;  %v179_v40 = vor.u32 %v235_v37, %v178_v36  ;;  %v170_v42 = vld [vmem:[%s376_s1] sm:$0xf]  ;;  %v233_v43 = vld [vmem:[%s376_s1 + $0x4] sm:$0xf0] }
   0xb   :  { %v183_v41 = vor.u32 %v234_v38, %v180_v39  ;;  %v232_v44 = vld [vmem:[%s376_s1 + $0x4] sm:$0xf]  ;;  %v172_v45 = vld [vmem:[%s376_s1 + $0x8] sm:$0xf0]  ;;  %v171_v46 = vor.u32 %v233_v43, %v170_v42  ;;  %v22_v48 = vld [vmem:[%s377_s0] sm:$0xf] }
   0xc   :  { %121 = vmatpush.bf16.msra.mxu0 %v211_v16  ;;  %v175_v47 = vor.u32 %v232_v44, %v172_v45  ;;  %v154_v49 = vld [vmem:[%s378_s2] sm:$0x3] }
   0xd   :  { %134 = vmatpush.bf16.msra.mxu1 %v215_v17  ;;  %v156_v50 = vperm.slane %v154_v49, 0  ;;  %v157_v51 = vperm.slane %v154_v49, 1 }
  0x10   :  { %122 = vmatpush.bf16.msra.mxu0 %v203_v22 }
  0x11   :  { %135 = vmatpush.bf16.msra.mxu1 %v207_v23 }
  0x14   :  { %123 = vmatpush.bf16.msra.mxu0 %v195_v28 }
  0x15   :  { %136 = vmatpush.bf16.msra.mxu1 %v199_v29 }
  0x18   :  { %124 = vmatpush.bf16.msra.mxu0 %v187_v34 }
  0x19   :  { %137 = vmatpush.bf16.msra.mxu1 %v191_v35 }
  0x1c   :  { %125 = vmatpush.bf16.msra.mxu0 %v179_v40 }
  0x1d   :  { %138 = vmatpush.bf16.msra.mxu1 %v183_v41 }
  0x20   :  { %126 = vmatpush.bf16.msra.mxu0 %v171_v46 }
  0x21   :  { %139 = vmatpush.bf16.msra.mxu1 %v175_v47 }
  0x23   :  { %127 = vmatmul.bf16.vlgmr.msra.gmra.mxu0 %v22_v48 }
  0x24   :  { %140 = vmatmul.bf16.vlgmr.msra.gmra.mxu1 %v22_v48 }
  0xa0   :  { %v128_v52 = vpop.f32.mrf.mxu0 }
  0xa1   :  { %v160_v53 = vadd.f32 %v156_v50, %v128_v52  ;;  %v141_v54 = vpop.f32.mrf.mxu1 }
  0xa2   :  { %v161_v55 = vadd.f32 %v157_v51, %v141_v54 }
  0xa3   :  { %162 = vst [vmem:[%s379_s3] sm:$0xff] %v160_v53 }
  0xa4   :  { %163 = vst [vmem:[%s379_s3 + $0x8] sm:$0xff] %v161_v55 }
  0xa8   :  { %v130_v56 = vpop.f32.mrf.mxu0 }
  0xa9   :  { %v143_v57 = vpop.f32.mrf.mxu1 }

// kernel: fuse_model_forward.71
= control target key start
LH: loop header
LB: loop body
LE: loop exit
PB: predicated region body
PF: predicated region fallthrough
CT: control target
= control target key end

     0   :  { %s1126_s12 = smov 0   ;;  %s1128_s13 = smov 0   ;;  %s1280_s0 = inlined_call_operand.vmem [shape: bf16[8,1152], index: 0, kind: input, shape index: {}]   ;;  %s1281_s1 = inlined_call_operand.vmem [shape: bf16[1152,256], index: 1, kind: input, shape index: {}]   ;;  %s1282_s2 = inlined_call_operand.vmem [shape: f32[1,256], index: 2, kind: input, shape index: {}]   ;;  %s1283_s3 = inlined_call_operand.vmem [shape: f32[8,256], index: 3, kind: output, shape index: {}]  }
   0x1   :  { %s1130_s14 = smov 0  }
   0x2 LB: > { %s25_s15 = sadd.s32 1, %s1099_s13  ;;  %p805_p0 = scmp.ge.s32.totalorder %s1103_s14, 1  ;;  %s1103_s14 = sphi %s1130_s14, %s13_s14   ;;  %s1099_s13 = sphi %s1128_s13, %s1285_s13   ;;  %s1095_s12 = sphi %s1126_s12, %s1284_s12  }
   0x3   : > { %p26_p1 = scmp.ge.s32.totalorder %s25_s15, 3  ;;  %p194_p2 = scmp.lt.s32.totalorder %s1103_s14, 4 }
   0x5   : > { %s1287_s15 = smov (%p26_p1, %s25_s15), 0  ;;  %p195_p3 = pnand %p805_p0, %p194_p2 }
   0x6   : > { %s240_s16 = smul.u32 (!%p195_p3), 3, %s1095_s12  ;;  %p809_p6 = scmp.ne.s32.totalorder (!%p195_p3), %s1095_s12, 0 }
   0x7   : > { %198 = sbr.rel (%p195_p3) target bundleno = 232 (0xe8), region = 32 }
   0x8   : > { %s250_s17 = smul.u32 (!%p195_p3), 48, %s1095_s12  ;;  %p243_p4 = scmp.lt.s32.totalorder (!%p195_p3), %s240_s16, 8 }
   0xa   : > { %p252_p5 = scmp.lt.s32.totalorder (!%p195_p3), %s250_s17, 143 }
   0xc   : > { %s1289_s16 = smov (!%p243_p4, %s240_s16), 8  ;;  %s1291_s17 = smov (!%p252_p5, %s250_s17), 143 }
   0xd   : > { %s806_s18 = sshll.u32 %s1289_s16, 2  ;;  %s1007_s22 = sshll.u32 %s1291_s17, 3 }
   0xe   : > { %s1151_s21 = scalar_lea.vmem %s1280_s0, %s806_s18  ;;  %s1156_s25 = scalar_lea.vmem %s1281_s1, %s1007_s22 }
   0xf   : > { %280 = sbr.rel (%p809_p6) target bundleno = 23 (0x17), region = 36 }
  0x14   : > { %v1105_v0 = vmov 0.0  }
  0x15   : > { %281 = vst [vmem:[#allocation2] sm:$0xff] %v1105_v0 }
  0x16   : > { %282 = vst [vmem:[#allocation2 + $0x8] sm:$0xff] %v1105_v0 }
  0x17 PF: > { %v868_v1 = vld [vmem:[%s1156_s25 + $0x70] sm:$0xf]  ;;  %v1023_v2 = vld [vmem:[%s1156_s25 + $0x74] sm:$0xf0]  ;;  %v860_v6 = vld [vmem:[%s1156_s25 + $0x60] sm:$0xf] }
  0x18   : > { %v932_v3 = vld [vmem:[%s1156_s25 + $0xf0] sm:$0xf]  ;;  %v869_v4 = vor.u32 %v1023_v2, %v868_v1  ;;  %v1039_v5 = vld [vmem:[%s1156_s25 + $0xf4] sm:$0xf0]  ;;  %v1021_v7 = vld [vmem:[%s1156_s25 + $0x64] sm:$0xf0] }
  0x19   : > { %v933_v8 = vor.u32 %v1039_v5, %v932_v3  ;;  %v924_v9 = vld [vmem:[%s1156_s25 + $0xe0] sm:$0xf]  ;;  %v1037_v10 = vld [vmem:[%s1156_s25 + $0xe4] sm:$0xf0]  ;;  %v861_v11 = vor.u32 %v1021_v7, %v860_v6  ;;  %v852_v12 = vld [vmem:[%s1156_s25 + $0x50] sm:$0xf] }
  0x1a   : > { %586 = vmatpush.bf16.msra.mxu0 %v869_v4  ;;  %v925_v13 = vor.u32 %v1037_v10, %v924_v9  ;;  %v1019_v14 = vld [vmem:[%s1156_s25 + $0x54] sm:$0xf0]  ;;  %v996_v15 = vld [vmem:[%s1156_s25 + $0x170] sm:$0xf]  ;;  %v988_v20 = vld [vmem:[%s1156_s25 + $0x160] sm:$0xf] }
  0x1b   : > { %599 = vmatpush.bf16.msra.mxu1 %v933_v8  ;;  %v1055_v16 = vld [vmem:[%s1156_s25 + $0x174] sm:$0xf0]  ;;  %v916_v17 = vld [vmem:[%s1156_s25 + $0xd0] sm:$0xf]  ;;  %v1053_v21 = vld [vmem:[%s1156_s25 + $0x164] sm:$0xf0]  ;;  %v853_v23 = vor.u32 %v1019_v14, %v852_v12 }
  0x1c   : > { %v1035_v18 = vld [vmem:[%s1156_s25 + $0xd4] sm:$0xf0]  ;;  %v997_v19 = vor.u32 %v1055_v16, %v996_v15  ;;  %v1022_v22 = vld [vmem:[%s1156_s25 + $0x74] sm:$0xf]  ;;  %v844_v24 = vld [vmem:[%s1156_s25 + $0x40] sm:$0xf]  ;;  %v989_v26 = vor.u32 %v1053_v21, %v988_v20 }
  0x1d   : > { %v1017_v25 = vld [vmem:[%s1156_s25 + $0x44] sm:$0xf0]  ;;  %v870_v27 = vld [vmem:[%s1156_s25 + $0x78] sm:$0xf0]  ;;  %v917_v28 = vor.u32 %v1035_v18, %v916_v17  ;;  %v908_v29 = vld [vmem:[%s1156_s25 + $0xc0] sm:$0xf] }
  0x1e   : > { %587 = vmatpush.bf16.msra.mxu0 %v861_v11  ;;  %612 = vmatpush.bf16.msra.mxu2 %v997_v19  ;;  %v1033_v30 = vld [vmem:[%s1156_s25 + $0xc4] sm:$0xf0]  ;;  %v873_v31 = vor.u32 %v1022_v22, %v870_v27  ;;  %v980_v32 = vld [vmem:[%s1156_s25 + $0x150] sm:$0xf]  ;;  %v1051_v33 = vld [vmem:[%s1156_s25 + $0x154] sm:$0xf0]  ;;  %v845_v37 = vor.u32 %v1017_v25, %v844_v24 }
  0x1f   : > { %600 = vmatpush.bf16.msra.mxu1 %v925_v13  ;;  %v1020_v34 = vld [vmem:[%s1156_s25 + $0x64] sm:$0xf]  ;;  %v862_v35 = vld [vmem:[%s1156_s25 + $0x68] sm:$0xf0]  ;;  %v836_v38 = vld [vmem:[%s1156_s25 + $0x30] sm:$0xf]  ;;  %v981_v40 = vor.u32 %v1051_v33, %v980_v32  ;;  %v909_v42 = vor.u32 %v1033_v30, %v908_v29 }
  0x20   : > { %625 = vmatpush.bf16.msra.mxu3 %v873_v31  ;;  %v865_v36 = vor.u32 %v1020_v34, %v862_v35  ;;  %v1015_v39 = vld [vmem:[%s1156_s25 + $0x34] sm:$0xf0]  ;;  %v972_v41 = vld [vmem:[%s1156_s25 + $0x140] sm:$0xf]  ;;  %v1049_v43 = vld [vmem:[%s1156_s25 + $0x144] sm:$0xf0] }
  0x21   : > { %v1018_v44 = vld [vmem:[%s1156_s25 + $0x54] sm:$0xf]  ;;  %v854_v45 = vld [vmem:[%s1156_s25 + $0x58] sm:$0xf0]  ;;  %v900_v46 = vld [vmem:[%s1156_s25 + $0xb0] sm:$0xf]  ;;  %v837_v49 = vor.u32 %v1015_v39, %v836_v38  ;;  %v973_v51 = vor.u32 %v1049_v43, %v972_v41 }
  0x22   : > { %588 = vmatpush.bf16.msra.mxu0 %v853_v23  ;;  %613 = vmatpush.bf16.msra.mxu2 %v989_v26  ;;  %v1031_v47 = vld [vmem:[%s1156_s25 + $0xb4] sm:$0xf0]  ;;  %v857_v48 = vor.u32 %v1018_v44, %v854_v45  ;;  %v828_v50 = vld [vmem:[%s1156_s25 + $0x20] sm:$0xf]  ;;  %v1016_v52 = vld [vmem:[%s1156_s25 + $0x44] sm:$0xf] }
  0x23   : > { %601 = vmatpush.bf16.msra.mxu1 %v917_v28  ;;  %v846_v53 = vld [vmem:[%s1156_s25 + $0x48] sm:$0xf0]  ;;  %v901_v54 = vor.u32 %v1031_v47, %v900_v46  ;;  %v1013_v55 = vld [vmem:[%s1156_s25 + $0x24] sm:$0xf0]  ;;  %v964_v56 = vld [vmem:[%s1156_s25 + $0x130] sm:$0xf] }
  0x24   : > { %626 = vmatpush.bf16.msra.mxu3 %v865_v36  ;;  %v1047_v57 = vld [vmem:[%s1156_s25 + $0x134] sm:$0xf0]  ;;  %v892_v58 = vld [vmem:[%s1156_s25 + $0xa0] sm:$0xf]  ;;  %v1029_v59 = vld [vmem:[%s1156_s25 + $0xa4] sm:$0xf0]  ;;  %v849_v60 = vor.u32 %v1016_v52, %v846_v53  ;;  %v829_v61 = vor.u32 %v1013_v55, %v828_v50 }
  0x25   : > { %v820_v62 = vld [vmem:[%s1156_s25 + $0x10] sm:$0xf]  ;;  %v965_v63 = vor.u32 %v1047_v57, %v964_v56  ;;  %v1014_v0 = vld [vmem:[%s1156_s25 + $0x34] sm:$0xf]  ;;  %v838_v1 = vld [vmem:[%s1156_s25 + $0x38] sm:$0xf0]  ;;  %v893_v2 = vor.u32 %v1029_v59, %v892_v58 }
  0x26   : > { %589 = vmatpush.bf16.msra.mxu0 %v845_v37  ;;  %614 = vmatpush.bf16.msra.mxu2 %v981_v40  ;;  %v1011_v3 = vld [vmem:[%s1156_s25 + $0x14] sm:$0xf0]  ;;  %v956_v4 = vld [vmem:[%s1156_s25 + $0x120] sm:$0xf]  ;;  %v1045_v5 = vld [vmem:[%s1156_s25 + $0x124] sm:$0xf0]  ;;  %v841_v10 = vor.u32 %v1014_v0, %v838_v1 }
  0x27   : > { %602 = vmatpush.bf16.msra.mxu1 %v909_v42  ;;  %v884_v6 = vld [vmem:[%s1156_s25 + $0x90] sm:$0xf]  ;;  %v1027_v7 = vld [vmem:[%s1156_s25 + $0x94] sm:$0xf0]  ;;  %v812_v8 = vld [vmem:[%s1156_s25] sm:$0xf]  ;;  %v821_v11 = vor.u32 %v1011_v3, %v820_v62  ;;  %v957_v12 = vor.u32 %v1045_v5, %v956_v4 }
  0x28   : > { %627 = vmatpush.bf16.msra.mxu3 %v857_v48  ;;  %v1009_v9 = vld [vmem:[%s1156_s25 + $0x4] sm:$0xf0]  ;;  %v1012_v13 = vld [vmem:[%s1156_s25 + $0x24] sm:$0xf]  ;;  %v830_v14 = vld [vmem:[%s1156_s25 + $0x28] sm:$0xf0]  ;;  %v885_v16 = vor.u32 %v1027_v7, %v884_v6 }
  0x29   : > { %v285_v15 = vld [vmem:[%s1151_s21] sm:$0xff]  ;;  %v948_v18 = vld [vmem:[%s1156_s25 + $0x110] sm:$0xf]  ;;  %v1043_v19 = vld [vmem:[%s1156_s25 + $0x114] sm:$0xf0]  ;;  %v833_v25 = vor.u32 %v1012_v13, %v830_v14  ;;  %v813_v27 = vor.u32 %v1009_v9, %v812_v8  ;;  %p1002_p7 = scmp.ne.s32.totalorder %s1095_s12, 2 }
  0x2a   : > { %590 = vmatpush.bf16.msra.mxu0 %v837_v49  ;;  %615 = vmatpush.bf16.msra.mxu2 %v973_v51  ;;  %v876_v17 = vld [vmem:[%s1156_s25 + $0x80] sm:$0xf]  ;;  %v1025_v20 = vld [vmem:[%s1156_s25 + $0x84] sm:$0xf0]  ;;  %v1038_v21 = vld [vmem:[%s1156_s25 + $0xf4] sm:$0xf]  ;;  %v337_v26 = vunpack.c.l.b16 %v285_v15  ;;  %v949_v28 = vor.u32 %v1043_v19, %v948_v18  ;;  %v338_v29 = vunpack.c.h.b16 %v285_v15 }
  0x2b   : > { %603 = vmatpush.bf16.msra.mxu1 %v901_v54  ;;  %v934_v22 = vld [vmem:[%s1156_s25 + $0xf8] sm:$0xf0]  ;;  %v1054_v23 = vld [vmem:[%s1156_s25 + $0x174] sm:$0xf]  ;;  %v286_v32 = vld [vmem:[%s1151_s21 + $0x8] sm:$0xf]  ;;  %v877_v33 = vor.u32 %v1025_v20, %v876_v17 }
  0x2c   : > { %628 = vmatpush.bf16.msra.mxu3 %v849_v60  ;;  %v998_v24 = vld [vmem:[%s1156_s25 + $0x178] sm:$0xf0]  ;;  %v1010_v30 = vld [vmem:[%s1156_s25 + $0x14] sm:$0xf]  ;;  %v937_v34 = vor.u32 %v1038_v21, %v934_v22  ;;  %v940_v35 = vld [vmem:[%s1156_s25 + $0x100] sm:$0xf]  ;;  %v340_v42 = vpack.c.b16 %v337_v26, %v337_v26  ;;  %v339_v44 = vunpack.c.l.b16 %v286_v32  ;;  %v1231_v45 = vpack.c.b16 %v338_v29, %v338_v29 }
  0x2d   : > { %v822_v31 = vld [vmem:[%s1156_s25 + $0x18] sm:$0xf0]  ;;  %v1041_v36 = vld [vmem:[%s1156_s25 + $0x104] sm:$0xf0]  ;;  %v1001_v37 = vor.u32 %v1054_v23, %v998_v24  ;;  %v1036_v38 = vld [vmem:[%s1156_s25 + $0xe4] sm:$0xf] }
  0x2e   : > { %591 = vmatpush.bf16.msra.mxu0 %v829_v61  ;;  %616 = vmatpush.bf16.msra.mxu2 %v965_v63  ;;  %v926_v39 = vld [vmem:[%s1156_s25 + $0xe8] sm:$0xf0]  ;;  %v1052_v40 = vld [vmem:[%s1156_s25 + $0x164] sm:$0xf]  ;;  %v825_v43 = vor.u32 %v1010_v30, %v822_v31  ;;  %v941_v46 = vor.u32 %v1041_v36, %v940_v35  ;;  %v1034_v51 = vld [vmem:[%s1156_s25 + $0xd4] sm:$0xf]  ;;  %v342_v55 = vpack.c.b16 %v339_v44, %v339_v44 }
  0x2f   : > { %604 = vmatpush.bf16.msra.mxu1 %v893_v2  ;;  %v990_v41 = vld [vmem:[%s1156_s25 + $0x168] sm:$0xf0]  ;;  %v1008_v47 = vld [vmem:[%s1156_s25 + $0x4] sm:$0xf]  ;;  %v929_v49 = vor.u32 %v1036_v38, %v926_v39  ;;  %v918_v52 = vld [vmem:[%s1156_s25 + $0xd8] sm:$0xf0] }
  0x30   : > { %629 = vmatpush.bf16.msra.mxu3 %v841_v10  ;;  %v814_v48 = vld [vmem:[%s1156_s25 + $0x8] sm:$0xf0]  ;;  %v993_v50 = vor.u32 %v1052_v40, %v990_v41  ;;  %v1050_v53 = vld [vmem:[%s1156_s25 + $0x154] sm:$0xf]  ;;  %v982_v54 = vld [vmem:[%s1156_s25 + $0x158] sm:$0xf0]  ;;  %v921_v57 = vor.u32 %v1034_v51, %v918_v52 }
  0x31   : > { %v817_v56 = vor.u32 %v1008_v47, %v814_v48  ;;  %v985_v58 = vor.u32 %v1050_v53, %v982_v54  ;;  %v1032_v59 = vld [vmem:[%s1156_s25 + $0xc4] sm:$0xf]  ;;  %v910_v60 = vld [vmem:[%s1156_s25 + $0xc8] sm:$0xf0]  ;;  %v1030_v1 = vld [vmem:[%s1156_s25 + $0xb4] sm:$0xf] }
  0x32   : > { %592 = vmatpush.bf16.msra.mxu0 %v821_v11  ;;  %617 = vmatpush.bf16.msra.mxu2 %v957_v12  ;;  %v1048_v61 = vld [vmem:[%s1156_s25 + $0x144] sm:$0xf]  ;;  %v974_v62 = vld [vmem:[%s1156_s25 + $0x148] sm:$0xf0]  ;;  %v913_v63 = vor.u32 %v1032_v59, %v910_v60  ;;  %v902_v2 = vld [vmem:[%s1156_s25 + $0xb8] sm:$0xf0] }
  0x33   : > { %605 = vmatpush.bf16.msra.mxu1 %v885_v16  ;;  %v977_v0 = vor.u32 %v1048_v61, %v974_v62  ;;  %v1046_v3 = vld [vmem:[%s1156_s25 + $0x134] sm:$0xf]  ;;  %v966_v4 = vld [vmem:[%s1156_s25 + $0x138] sm:$0xf0]  ;;  %v905_v5 = vor.u32 %v1030_v1, %v902_v2  ;;  %v1028_v7 = vld [vmem:[%s1156_s25 + $0xa4] sm:$0xf] }
  0x34   : > { %630 = vmatpush.bf16.msra.mxu3 %v833_v25  ;;  %v969_v6 = vor.u32 %v1046_v3, %v966_v4  ;;  %v894_v8 = vld [vmem:[%s1156_s25 + $0xa8] sm:$0xf0]  ;;  %v1044_v9 = vld [vmem:[%s1156_s25 + $0x124] sm:$0xf]  ;;  %v1026_v13 = vld [vmem:[%s1156_s25 + $0x94] sm:$0xf] }
  0x35   : > { %v958_v10 = vld [vmem:[%s1156_s25 + $0x128] sm:$0xf0]  ;;  %v897_v11 = vor.u32 %v1028_v7, %v894_v8  ;;  %v886_v14 = vld [vmem:[%s1156_s25 + $0x98] sm:$0xf0]  ;;  %v1042_v15 = vld [vmem:[%s1156_s25 + $0x114] sm:$0xf] }
  0x36   : > { %593 = vmatpush.bf16.msra.mxu0 %v813_v27  ;;  %618 = vmatpush.bf16.msra.mxu2 %v949_v28  ;;  %v961_v12 = vor.u32 %v1044_v9, %v958_v10  ;;  %v950_v16 = vld [vmem:[%s1156_s25 + $0x118] sm:$0xf0]  ;;  %v889_v17 = vor.u32 %v1026_v13, %v886_v14  ;;  %v1024_v19 = vld [vmem:[%s1156_s25 + $0x84] sm:$0xf]  ;;  %v878_v20 = vld [vmem:[%s1156_s25 + $0x88] sm:$0xf0] }
  0x37   : > { %606 = vmatpush.bf16.msra.mxu1 %v877_v33  ;;  %v953_v18 = vor.u32 %v1042_v15, %v950_v16  ;;  %v1040_v21 = vld [vmem:[%s1156_s25 + $0x104] sm:$0xf]  ;;  %v942_v22 = vld [vmem:[%s1156_s25 + $0x108] sm:$0xf0]  ;;  %v881_v23 = vor.u32 %v1024_v19, %v878_v20 }
  0x38   : > { %631 = vmatpush.bf16.msra.mxu3 %v825_v43  ;;  %v945_v24 = vor.u32 %v1040_v21, %v942_v22  ;;  %v283_v30 = vld [vmem:[#allocation2] sm:$0xff]  ;;  %v284_v40 = vld [vmem:[#allocation2 + $0x8] sm:$0xff] }
  0x39   : > { %594 = vmatmul.bf16.vlgmr.msra.gmra.mxu0 %v340_v42 }
  0x3a   : > { %638 = vmatpush.bf16.msrb.mxu0 %v937_v34  ;;  %607 = vmatmul.bf16.vlgmr.msra.gmra.mxu1 %v1231_v45 }
  0x3b   : > { %651 = vmatpush.bf16.msrb.mxu1 %v1001_v37  ;;  %619 = vmatpush.bf16.msra.mxu2 %v941_v46 }
  0x3c   : > { %632 = vmatpush.bf16.msra.mxu3 %v817_v56 }
  0x3e   : > { %639 = vmatpush.bf16.msrb.mxu0 %v929_v49  ;;  %620 = vmatmul.bf16.vlgmr.msra.gmra.mxu2 %v342_v55 }
  0x3f   : > { %652 = vmatpush.bf16.msrb.mxu1 %v993_v50  ;;  %633 = vmatmul.bf16.vlgmr.msra.gmra.mxu3 %v340_v42 }
  0x42   : > { %640 = vmatpush.bf16.msrb.mxu0 %v921_v57 }
  0x43   : > { %653 = vmatpush.bf16.msrb.mxu1 %v985_v58 }
  0x46   : > { %641 = vmatpush.bf16.msrb.mxu0 %v913_v63 }
  0x47   : > { %654 = vmatpush.bf16.msrb.mxu1 %v977_v0 }
  0x4a   : > { %642 = vmatpush.bf16.msrb.mxu0 %v905_v5 }
  0x4b   : > { %655 = vmatpush.bf16.msrb.mxu1 %v969_v6 }
  0x4e   : > { %643 = vmatpush.bf16.msrb.mxu0 %v897_v11 }
  0x4f   : > { %656 = vmatpush.bf16.msrb.mxu1 %v961_v12 }
  0x52   : > { %644 = vmatpush.bf16.msrb.mxu0 %v889_v17 }
  0x53   : > { %657 = vmatpush.bf16.msrb.mxu1 %v953_v18 }
  0x56   : > { %645 = vmatpush.bf16.msrb.mxu0 %v881_v23 }
  0x57   : > { %658 = vmatpush.bf16.msrb.mxu1 %v945_v24 }
  0x59   : > { %646 = vmatmul.bf16.vlgmr.msrb.gmra.mxu0 %v1231_v45 }
  0x5a   : > { %659 = vmatmul.bf16.vlgmr.msrb.gmra.mxu1 %v342_v55 }
  0xb6   : > { %v595_v25 = vpop.f32.mrf.mxu0 }
  0xb7   : > { %v608_v26 = vpop.f32.mrf.mxu1 }
  0xb8   : > { %v609_v27 = vadd.f32 %v608_v26, %v595_v25 }
  0xbe   : > { %v597_v28 = vpop.f32.mrf.mxu0 }
  0xbf   : > { %v610_v29 = vpop.f32.mrf.mxu1 }
  0xc1   : > { %v621_v31 = vpop.f32.mrf.mxu2 }
  0xc2   : > { %v622_v32 = vadd.f32 %v621_v31, %v609_v27  ;;  %v634_v34 = vpop.f32.mrf.mxu3 }
  0xc4   : > { %v664_v33 = vadd.f32 %v622_v32, %v283_v30 }
  0xc6   : > { %666 = vst [vmem:[#allocation2] sm:$0xff] %v664_v33 }
  0xc9   : > { %v623_v35 = vpop.f32.mrf.mxu2 }
  0xca   : > { %v636_v36 = vpop.f32.mrf.mxu3 }
  0xd6   : > { %v647_v37 = vpop.f32.mrf.mxu0 }
  0xd7   : > { %v648_v38 = vadd.f32 %v647_v37, %v634_v34  ;;  %v660_v39 = vpop.f32.mrf.mxu1 }
  0xd9   : > { %v661_v41 = vadd.f32 %v660_v39, %v648_v38 }
  0xdb   : > { %v665_v42 = vadd.f32 %v661_v41, %v284_v40  ;;  %671 = sbr.rel (%p1002_p7) target bundleno = 232 (0xe8), region = 40 }
  0xdd   : > { %667 = vst [vmem:[#allocation2 + $0x8] sm:$0xff] %v665_v42 }
  0xde   : > { %v649_v43 = vpop.f32.mrf.mxu0 }
  0xdf   : > { %v662_v44 = vpop.f32.mrf.mxu1 }
  0xe0   : > { %v672_v45 = vld [vmem:[#allocation2] sm:$0xff] }
  0xe1   : > { %v674_v46 = vld [vmem:[%s1282_s2] sm:$0x3] }
  0xe2   : > { %v676_v48 = vperm.slane %v674_v46, 0  ;;  %v677_v49 = vperm.slane %v674_v46, 1 }
  0xe4   : > { %v673_v47 = vld [vmem:[#allocation2 + $0x8] sm:$0xff]  ;;  %v680_v50 = vadd.f32 %v676_v48, %v672_v45 }
  0xe5   : > { %v681_v51 = vadd.f32 %v677_v49, %v673_v47 }
  0xe6   : > { %682 = vst [vmem:[%s1283_s3] sm:$0xff] %v680_v50 }
  0xe7   : > { %683 = vst [vmem:[%s1283_s3 + $0x8] sm:$0xff] %v681_v51 }
  0xe8 PF: > { %s13_s14 = sadd.s32 1, %s1103_s14   ;;  %s1284_s12 = smov %s1099_s13 }
  0xe9   : > { %p10_p8 = scmp.ge.s32.totalorder %s13_s14, 5   ;;  %s1285_s13 = smov %s1287_s15 }
  0xeb   :  { %12 = sbr.rel (!%p10_p8) target bundleno = 2 (0x2), region = 76 }

</bundles_post_ra>
